<compile_context>
chip_gen: v5e
topology: v5e:2x2
jax: 0.10.0
libtpu: 0.0.40
codegen_flags: <defaults>
</compile_context>

<pallas_src>
from functools import partial

import jax
import jax.numpy as jnp
from jax.experimental import pallas as pl
from jax.experimental.pallas import tpu as pltpu

BN_EPS = 1e-5


def _round_up(v, m):
    return (v + m - 1) // m * m


def _pad2(a, rows, cols):
    return jnp.pad(a, ((0, rows - a.shape[0]), (0, cols - a.shape[1])))


def _chip_budget():
    """Generation-aware (max_tile, vmem_limit_bytes, resident_x_budget_bytes)."""
    kind = ""
    try:
        dev = jax.devices()[0]
        if dev.platform == "tpu":
            kind = (getattr(dev, "device_kind", "") or "").lower()
    except Exception:
        pass
    if "v7" in kind:
        # v7x: only 64 MiB VMEM per TensorCore -> conservative tiles / limits.
        return 512, 48 * 1024 * 1024, 8 * 1024 * 1024
    # v5e / v6e: 128 MiB VMEM -> big tiles amortize per-grid-step overhead.
    return 1024, 96 * 1024 * 1024, 24 * 1024 * 1024


MAX_TILE, VMEM_LIMIT, X_RESIDENT_BUDGET = _chip_budget()


def _pick_tile(n, dp, hp):
    """Largest square row/contraction tile whose stage-A working set fits VMEM."""
    np128 = _round_up(n, 128)
    for t in (1024, 512, 256, 128):
        if t > MAX_TILE or t > np128:
            continue
        ws = (2 * t * t * 2              # adjacency tiles (bf16, double buffered)
              + 2 * t * dp * 2           # streamed x_k tiles (bf16)
              + 2 * t * dp * 4           # self-term x tiles (f32)
              + 2 * (dp * hp + hp) * 4   # W1 / b1
              + t * dp * 4               # f32 accumulator scratch
              + 2 * t * hp * 2           # h1 output tiles (bf16)
              + 2 * 2 * hp * 4)          # stats tiles
        if ws <= 0.6 * VMEM_LIMIT:
            return t
    return 128


# ---------------------------------------------------------------------------
# Kernel A: grid (row_tiles, k_tiles)
#   aggr accumulation (A @ x, bf16 MXU), GIN combine, Linear1, partial BN1 stats
# ---------------------------------------------------------------------------
def _make_kernel_a(t, n_nodes, x_resident):
    def kernel(eps_ref, a_ref, xk_ref, xi_ref, w1_ref, b1_ref,
               h1_ref, st_ref, acc_ref):
        # program_id read at top level only (never inside pl.when bodies).
        i = pl.program_id(0)
        k = pl.program_id(1)
        last_k = pl.num_programs(1) - 1

        @pl.when(k == 0)
        def _():
            acc_ref[...] = jnp.zeros_like(acc_ref)

        if x_resident:
            xk = xk_ref[pl.ds(k * t, t), :]   # slice the VMEM-resident bf16 x
        else:
            xk = xk_ref[...]                  # streamed bf16 tile
        # bf16 x bf16 MXU contraction, f32 accumulation (no f32 upcast).
        acc_ref[...] += jnp.dot(a_ref[...], xk, preferred_element_type=jnp.float32)

        @pl.when(k == last_k)
        def _():
            z = (1.0 + eps_ref[0]) * xi_ref[...] + acc_ref[...]
            h1 = jnp.dot(z, w1_ref[...],
                         preferred_element_type=jnp.float32) + b1_ref[...]
            h1_ref[...] = h1.astype(h1_ref.dtype)
            # masked partial BN1 stats over real nodes only ((t,1) iota mask).
            rows = i * t + jax.lax.broadcasted_iota(jnp.int32, (t, 1), 0)
            mf = (rows < n_nodes).astype(jnp.float32)
            hm = h1 * mf
            st_ref[0, 0:1, :] = jnp.sum(hm, axis=0, keepdims=True)
            st_ref[0, 1:2, :] = jnp.sum(hm * h1, axis=0, keepdims=True)

    return kernel


# ---------------------------------------------------------------------------
# Kernel B: grid (row_tiles,)
#   BN1 (folded scale/shift) + ReLU + Linear2 + partial BN2 stats
# ---------------------------------------------------------------------------
def _make_kernel_b(t, n_nodes):
    def kernel(h1_ref, sc1_ref, sh1_ref, w2_ref, b2_ref, h_ref, st_ref):
        i = pl.program_id(0)
        h1n = jnp.maximum(h1_ref[...] * sc1_ref[...] + sh1_ref[...], 0.0)
        h = jnp.dot(h1n, w2_ref[...],
                    preferred_element_type=jnp.float32) + b2_ref[...]
        h_ref[...] = h.astype(h_ref.dtype)
        rows = i * t + jax.lax.broadcasted_iota(jnp.int32, (t, 1), 0)
        mf = (rows < n_nodes).astype(jnp.float32)
        hm = h * mf
        st_ref[0, 0:1, :] = jnp.sum(hm, axis=0, keepdims=True)
        st_ref[0, 1:2, :] = jnp.sum(hm * h, axis=0, keepdims=True)

    return kernel


# Fused variant (batch_norm=False): ReLU (+ residual) applied directly, no stage C
def _make_kernel_b_fused(residual):
    if residual:
        def kernel(h1_ref, sc1_ref, sh1_ref, w2_ref, b2_ref, x_ref, o_ref):
            h1n = jnp.maximum(h1_ref[...] * sc1_ref[...] + sh1_ref[...], 0.0)
            h = jnp.dot(h1n, w2_ref[...],
                        preferred_element_type=jnp.float32) + b2_ref[...]
            o_ref[...] = jnp.maximum(h, 0.0) + x_ref[...]
    else:
        def kernel(h1_ref, sc1_ref, sh1_ref, w2_ref, b2_ref, o_ref):
            h1n = jnp.maximum(h1_ref[...] * sc1_ref[...] + sh1_ref[...], 0.0)
            h = jnp.dot(h1n, w2_ref[...],
                        preferred_element_type=jnp.float32) + b2_ref[...]
            o_ref[...] = jnp.maximum(h, 0.0)
    return kernel


# ---------------------------------------------------------------------------
# Kernel C: grid (row_tiles,)   BN2 (folded) + ReLU (+ residual)
# ---------------------------------------------------------------------------
def _make_kernel_c(residual):
    if residual:
        def kernel(h_ref, sc2_ref, sh2_ref, x_ref, o_ref):
            h = h_ref[...] * sc2_ref[...] + sh2_ref[...]
            o_ref[...] = jnp.maximum(h, 0.0) + x_ref[...]
    else:
        def kernel(h_ref, sc2_ref, sh2_ref, o_ref):
            h = h_ref[...] * sc2_ref[...] + sh2_ref[...]
            o_ref[...] = jnp.maximum(h, 0.0)
    return kernel


@partial(jax.jit, static_argnames=("batch_norm", "residual", "force_stream_x"))
def gin_layer(x, edge_index, params, eps=0.0, batch_norm=True, residual=True,
              force_stream_x=False):
    """x: [N, in_dim] f32; edge_index: [2, E] int32 (row0=src, row1=dst)."""
    n, in_dim = x.shape
    hid = params["w1"].shape[1]
    out_dim = params["w2"].shape[1]
    if in_dim != out_dim:
        residual = False

    dp = _round_up(in_dim, 128)
    hp = _round_up(hid, 128)
    op = _round_up(out_dim, 128)
    t = _pick_tile(n, dp, hp)
    npad = _round_up(n, t)
    n_row = npad // t
    n_k = npad // t
    x_resident = (not force_stream_x) and (npad * dp * 2 <= X_RESIDENT_BUDGET)

    # dense adjacency A[dst, src] += 1 in bf16 (exact for edge multiplicity<=256)
    # TODO(synk): for sparse graphs replace dense A with CSR + scalar-prefetch
    #             neighbor gather (PrefetchScalarGridSpec) to avoid O(N^2) traffic.
    src, dst = edge_index[0], edge_index[1]
    adj = (jnp.zeros((npad, npad), jnp.float32)
           .at[dst, src].add(1.0)
           .astype(jnp.bfloat16))

    xf = _pad2(x.astype(jnp.float32), npad, dp)     # f32 self-term / residual
    xb = xf.astype(jnp.bfloat16)                    # bf16 MXU stream for A@x
    w1 = _pad2(params["w1"], dp, hp)
    b1 = _pad2(params["b1"], 1, hp)
    g1 = _pad2(params["g1"], 1, hp)
    be1 = _pad2(params["be1"], 1, hp)
    w2 = _pad2(params["w2"], hp, op)
    b2 = _pad2(params["b2"], 1, op)
    gh = _pad2(params["gh"], 1, op)
    bh = _pad2(params["bh"], 1, op)
    eps_arr = jnp.reshape(jnp.asarray(eps, jnp.float32), (1,))

    xk_spec = (pl.BlockSpec((npad, dp), lambda i, k: (0, 0)) if x_resident
               else pl.BlockSpec((t, dp), lambda i, k: (k, 0)))

    # ---- stage A: aggregation + GIN combine + Linear1 + partial BN1 stats ---
    h1, st1 = pl.pallas_call(
        _make_kernel_a(t, n, x_resident),
        grid=(n_row, n_k),
        in_specs=[
            pl.BlockSpec(memory_space=pltpu.MemorySpace.SMEM),   # eps scalar
            pl.BlockSpec((t, t), lambda i, k: (i, k)),           # adjacency tile
            xk_spec,                                             # neighbor x (bf16)
            pl.BlockSpec((t, dp), lambda i, k: (i, 0)),          # self x (f32)
            pl.BlockSpec((dp, hp), lambda i, k: (0, 0)),         # W1 (resident)
            pl.BlockSpec((1, hp), lambda i, k: (0, 0)),          # b1 (resident)
        ],
        out_specs=[
            pl.BlockSpec((t, hp), lambda i, k: (i, 0)),          # h1 (bf16)
            pl.BlockSpec((1, 2, hp), lambda i, k: (i, 0, 0)),    # partial stats
        ],
        out_shape=[
            jax.ShapeDtypeStruct((npad, hp), jnp.bfloat16),
            jax.ShapeDtypeStruct((n_row, 2, hp), jnp.float32),
        ],
        scratch_shapes=[pltpu.VMEM((t, dp), jnp.float32)],
        compiler_params=pltpu.CompilerParams(
            dimension_semantics=("parallel", "arbitrary"),
            vmem_limit_bytes=VMEM_LIMIT),
        cost_estimate=pl.CostEstimate(
            flops=2 * npad * npad * dp + 2 * npad * dp * hp,
            transcendentals=0,
            bytes_accessed=(2 * npad * npad
                            + 2 * npad * dp * (1 if x_resident else n_row)
                            + 4 * npad * dp + 2 * npad * hp)),
    )(eps_arr, adj, xb, xf, w1, b1)

    # ---- BN1 finalize, folded into scale/shift ------------------------------
    inv_n = 1.0 / n
    m1 = jnp.sum(st1[:, 0, :], axis=0, keepdims=True) * inv_n
    v1 = jnp.maximum(jnp.sum(st1[:, 1, :], axis=0, keepdims=True) * inv_n
                     - m1 * m1, 0.0)
    sc1 = g1 * jax.lax.rsqrt(v1 + BN_EPS)
    sh1 = be1 - m1 * sc1

    cp_row = pltpu.CompilerParams(dimension_semantics=("parallel",),
                                  vmem_limit_bytes=VMEM_LIMIT)

    if batch_norm:
        # ---- stage B: BN1 + ReLU + Linear2 + partial BN2 stats --------------
        h, st2 = pl.pallas_call(
            _make_kernel_b(t, n),
            grid=(n_row,),
            in_specs=[
                pl.BlockSpec((t, hp), lambda i: (i, 0)),
                pl.BlockSpec((1, hp), lambda i: (0, 0)),
                pl.BlockSpec((1, hp), lambda i: (0, 0)),
                pl.BlockSpec((hp, op), lambda i: (0, 0)),
                pl.BlockSpec((1, op), lambda i: (0, 0)),
            ],
            out_specs=[
                pl.BlockSpec((t, op), lambda i: (i, 0)),
                pl.BlockSpec((1, 2, op), lambda i: (i, 0, 0)),
            ],
            out_shape=[
                jax.ShapeDtypeStruct((npad, op), jnp.bfloat16),
                jax.ShapeDtypeStruct((n_row, 2, op), jnp.float32),
            ],
            compiler_params=cp_row,
        )(h1, sc1, sh1, w2, b2)

        mh = jnp.sum(st2[:, 0, :], axis=0, keepdims=True) * inv_n
        vh = jnp.maximum(jnp.sum(st2[:, 1, :], axis=0, keepdims=True) * inv_n
                         - mh * mh, 0.0)
        sc2 = gh * jax.lax.rsqrt(vh + BN_EPS)
        sh2 = bh - mh * sc2

        # ---- stage C: BN2 + ReLU (+ residual) --------------------------------
        in_specs_c = [
            pl.BlockSpec((t, op), lambda i: (i, 0)),
            pl.BlockSpec((1, op), lambda i: (0, 0)),
            pl.BlockSpec((1, op), lambda i: (0, 0)),
        ]
        args_c = [h, sc2, sh2]
        if residual:
            in_specs_c.append(pl.BlockSpec((t, dp), lambda i: (i, 0)))
            args_c.append(xf)
        out_p = pl.pallas_call(
            _make_kernel_c(residual),
            grid=(n_row,),
            in_specs=in_specs_c,
            out_specs=pl.BlockSpec((t, op), lambda i: (i, 0)),
            out_shape=jax.ShapeDtypeStruct((npad, op), jnp.float32),
            compiler_params=cp_row,
        )(*args_c)
    else:
        # ---- fused stage B: BN1 + ReLU + Linear2 + ReLU (+ residual) ---------
        in_specs_b = [
            pl.BlockSpec((t, hp), lambda i: (i, 0)),
            pl.BlockSpec((1, hp), lambda i: (0, 0)),
            pl.BlockSpec((1, hp), lambda i: (0, 0)),
            pl.BlockSpec((hp, op), lambda i: (0, 0)),
            pl.BlockSpec((1, op), lambda i: (0, 0)),
        ]
        args_b = [h1, sc1, sh1, w2, b2]
        if residual:
            in_specs_b.append(pl.BlockSpec((t, dp), lambda i: (i, 0)))
            args_b.append(xf)
        out_p = pl.pallas_call(
            _make_kernel_b_fused(residual),
            grid=(n_row,),
            in_specs=in_specs_b,
            out_specs=pl.BlockSpec((t, op), lambda i: (i, 0)),
            out_shape=jax.ShapeDtypeStruct((npad, op), jnp.float32),
            compiler_params=cp_row,
        )(*args_b)

    return out_p[:n, :out_dim]


def init_params(key, in_dim, out_dim):
    hid = out_dim
    k1, k2, k3, k4 = jax.random.split(key, 4)
    w1 = (jax.random.uniform(k1, (in_dim, hid), jnp.float32, -1.0, 1.0)
          / jnp.sqrt(in_dim).astype(jnp.float32))
    b1 = (jax.random.uniform(k2, (1, hid), jnp.float32, -1.0, 1.0)
          / jnp.sqrt(in_dim).astype(jnp.float32))
    w2 = (jax.random.uniform(k3, (hid, out_dim), jnp.float32, -1.0, 1.0)
          / jnp.sqrt(hid).astype(jnp.float32))
    b2 = (jax.random.uniform(k4, (1, out_dim), jnp.float32, -1.0, 1.0)
          / jnp.sqrt(hid).astype(jnp.float32))
    return dict(
        w1=w1, b1=b1,
        g1=jnp.ones((1, hid), jnp.float32), be1=jnp.zeros((1, hid), jnp.float32),
        w2=w2, b2=b2,
        gh=jnp.ones((1, out_dim), jnp.float32), bh=jnp.zeros((1, out_dim), jnp.float32),
    )


def gin_layer_ref(x, edge_index, params, eps=0.0, batch_norm=True, residual=True):
    """Pure-JAX f32 reference of the same forward pass."""
    src, dst = edge_index[0], edge_index[1]
    aggr = jnp.zeros_like(x).at[dst].add(x[src])
    z = (1.0 + eps) * x + aggr
    h1 = z @ params["w1"] + params["b1"]
    m1 = h1.mean(0, keepdims=True)
    v1 = h1.var(0, keepdims=True)
    h1 = (h1 - m1) / jnp.sqrt(v1 + BN_EPS) * params["g1"] + params["be1"]
    h1 = jnp.maximum(h1, 0.0)
    h = h1 @ params["w2"] + params["b2"]
    if batch_norm:
        mh = h.mean(0, keepdims=True)
        vh = h.var(0, keepdims=True)
        h = (h - mh) / jnp.sqrt(vh + BN_EPS) * params["gh"] + params["bh"]
    h = jnp.maximum(h, 0.0)
    if residual and x.shape[1] == h.shape[1]:
        h = x + h
    return h


if __name__ == "__main__":
    key = jax.random.PRNGKey(0)
    kx, ke, kp = jax.random.split(key, 3)

    # N=300 -> multi-tile grid (2x2 with t=256) exercising the k-accumulator
    # and the masked padded-row BN statistics.
    N, IN_DIM, OUT_DIM, E = 300, 32, 32, 900
    x = jax.random.normal(kx, (N, IN_DIM), jnp.float32)
    edge_index = jax.random.randint(ke, (2, E), 0, N, dtype=jnp.int32)
    params = init_params(kp, IN_DIM, OUT_DIM)

    configs = [
        dict(batch_norm=True, residual=True, force_stream_x=False),
        dict(batch_norm=True, residual=True, force_stream_x=True),   # streamed-x path
        dict(batch_norm=False, residual=True, force_stream_x=False),  # fused stage B
        dict(batch_norm=True, residual=False, force_stream_x=False),  # no residual input
    ]
    for cfg in configs:
        out = gin_layer(x, edge_index, params, eps=0.05,
                        batch_norm=cfg["batch_norm"], residual=cfg["residual"],
                        force_stream_x=cfg["force_stream_x"])
        jax.block_until_ready(out)
        assert out.shape == (N, OUT_DIM) and out.dtype == jnp.float32
        ref = gin_layer_ref(x, edge_index, params, eps=0.05,
                            batch_norm=cfg["batch_norm"], residual=cfg["residual"])
        max_err = float(jnp.max(jnp.abs(out - ref)))
        mean_err = float(jnp.mean(jnp.abs(out - ref)))
        # bf16 streaming of x / h1 / h gives ~1e-3 relative error on O(1) values;
        # BN amplification bounds the worst case well under these tolerances.
        assert max_err < 1e-1 and mean_err < 2e-2, (cfg, max_err, mean_err)

    print("KERNEL_OK")
</pallas_src>

<mosaic_0001>
module attributes {stable_mosaic.version = 11 : i64} {
  func.func @kernel(%arg0: i32, %arg1: i32, %arg2: memref<1xf32, #tpu.memory_space<smem>>, %arg3: memref<256x256xbf16, #tpu.memory_space<vmem>>, %arg4: memref<512x128xbf16, #tpu.memory_space<vmem>>, %arg5: memref<256x128xf32, #tpu.memory_space<vmem>>, %arg6: memref<128x128xf32, #tpu.memory_space<vmem>>, %arg7: memref<1x128xf32, #tpu.memory_space<vmem>>, %arg8: memref<256x128xbf16, #tpu.memory_space<vmem>>, %arg9: memref<1x2x128xf32, #tpu.memory_space<vmem>>, %arg10: memref<256x128xf32, #tpu.memory_space<vmem>>) attributes {dimension_semantics = [#tpu.dimension_semantics<parallel>, #tpu.dimension_semantics<arbitrary>], iteration_bounds = array<i64: 2, 2>, scalar_prefetch = 0 : i64, scratch_operands = 1 : i64, tpu.core_type = #tpu.core_type<tc>, window_params = [{transform_indices = @transform_0, window_bounds = array<i64: 1>}, {transform_indices = @transform_1, window_bounds = array<i64: 256, 256>}, {pipeline_mode = #tpu.pipeline_mode<synchronous>, transform_indices = @transform_2, window_bounds = array<i64: 512, 128>}, {transform_indices = @transform_3, window_bounds = array<i64: 256, 128>}, {pipeline_mode = #tpu.pipeline_mode<synchronous>, transform_indices = @transform_4, window_bounds = array<i64: 128, 128>}, {pipeline_mode = #tpu.pipeline_mode<synchronous>, transform_indices = @transform_5, window_bounds = array<i64: 1, 128>}, {transform_indices = @transform_6, window_bounds = array<i64: 256, 128>}, {transform_indices = @transform_7, window_bounds = array<i64: 1, 2, 128>}]} {
    %c0_i32 = arith.constant 0 : i32
    %0 = arith.cmpi eq, %arg1, %c0_i32 : i32
    %1 = arith.extui %0 : i1 to i32
    %c0_i32_0 = arith.constant 0 : i32
    %2 = arith.cmpi ne, %1, %c0_i32_0 : i32
    scf.if %2 {
      %cst_8 = arith.constant 0.000000e+00 : f32
      %14 = vector.broadcast %cst_8 : f32 to vector<256x128xf32>
      %c0_9 = arith.constant 0 : index
      %c0_10 = arith.constant 0 : index
      %15 = vector.load %arg10[%c0_9, %c0_10] : memref<256x128xf32, #tpu.memory_space<vmem>>, vector<256x128xf32>
      tpu.vector_store %arg10[%c0_9, %c0_10], %14 {strides = array<i32>} : memref<256x128xf32, #tpu.memory_space<vmem>>, vector<256x128xf32>,
    } else {
    }
    %c256_i32 = arith.constant 256 : i32
    %3 = arith.muli %arg1, %c256_i32 : i32
    %4 = arith.index_cast %3 : i32 to index
    %c0 = arith.constant 0 : index
    %5 = vector.load %arg4[%4, %c0] : memref<512x128xbf16, #tpu.memory_space<vmem>>, vector<256x128xbf16>
    %c0_1 = arith.constant 0 : index
    %c0_2 = arith.constant 0 : index
    %6 = vector.load %arg10[%c0_1, %c0_2] : memref<256x128xf32, #tpu.memory_space<vmem>>, vector<256x128xf32>
    %c0_3 = arith.constant 0 : index
    %c0_4 = arith.constant 0 : index
    %7 = vector.load %arg3[%c0_3, %c0_4] : memref<256x256xbf16, #tpu.memory_space<vmem>>, vector<256x256xbf16>
    %cst = arith.constant dense<0.000000e+00> : vector<256x128xf32>
    %8 = tpu.matmul %7, %5, %cst {dimension_numbers = #tpu.dot_dimension_numbers<[1], [0], [0], [1], [0, 0, 1, 1], [], []>} : vector<256x256xbf16>, vector<256x128xbf16>, vector<256x128xf32> -> vector<256x128xf32>
    %9 = arith.addf %6, %8 : vector<256x128xf32>
    %c0_5 = arith.constant 0 : index
    %c0_6 = arith.constant 0 : index
    %10 = vector.load %arg10[%c0_5, %c0_6] : memref<256x128xf32, #tpu.memory_space<vmem>>, vector<256x128xf32>
    tpu.vector_store %arg10[%c0_5, %c0_6], %9 {strides = array<i32>} : memref<256x128xf32, #tpu.memory_space<vmem>>, vector<256x128xf32>,
    %c1_i32 = arith.constant 1 : i32
    %11 = arith.cmpi eq, %arg1, %c1_i32 : i32
    %12 = arith.extui %11 : i1 to i32
    %c0_i32_7 = arith.constant 0 : i32
    %13 = arith.cmpi ne, %12, %c0_i32_7 : i32
    scf.if %13 {
      %c0_8 = arith.constant 0 : index
      %14 = memref.load %arg2[%c0_8] : memref<1xf32, #tpu.memory_space<smem>>
      %cst_9 = arith.constant 1.000000e+00 : f32
      %15 = arith.addf %cst_9, %14 : f32
      %c0_10 = arith.constant 0 : index
      %c0_11 = arith.constant 0 : index
      %16 = vector.load %arg5[%c0_10, %c0_11] : memref<256x128xf32, #tpu.memory_space<vmem>>, vector<256x128xf32>
      %17 = vector.broadcast %15 : f32 to vector<256x128xf32>
      %18 = arith.mulf %17, %16 : vector<256x128xf32>
      %c0_12 = arith.constant 0 : index
      %c0_13 = arith.constant 0 : index
      %19 = vector.load %arg10[%c0_12, %c0_13] : memref<256x128xf32, #tpu.memory_space<vmem>>, vector<256x128xf32>
      %20 = arith.addf %18, %19 : vector<256x128xf32>
      %c0_14 = arith.constant 0 : index
      %c0_15 = arith.constant 0 : index
      %21 = vector.load %arg6[%c0_14, %c0_15] : memref<128x128xf32, #tpu.memory_space<vmem>>, vector<128x128xf32>
      %cst_16 = arith.constant dense<0.000000e+00> : vector<256x128xf32>
      %22 = tpu.matmul %20, %21, %cst_16 {dimension_numbers = #tpu.dot_dimension_numbers<[1], [0], [0], [1], [0, 0, 1, 1], [], []>} : vector<256x128xf32>, vector<128x128xf32>, vector<256x128xf32> -> vector<256x128xf32>
      %c0_17 = arith.constant 0 : index
      %c0_18 = arith.constant 0 : index
      %23 = vector.load %arg7[%c0_17, %c0_18] : memref<1x128xf32, #tpu.memory_space<vmem>>, vector<1x128xf32>
      %24 = vector.broadcast %23 : vector<1x128xf32> to vector<256x128xf32>
      %25 = arith.addf %22, %24 : vector<256x128xf32>
      %26 = arith.truncf %25 : vector<256x128xf32> to vector<256x128xbf16>
      %c0_19 = arith.constant 0 : index
      %c0_20 = arith.constant 0 : index
      %27 = vector.load %arg8[%c0_19, %c0_20] : memref<256x128xbf16, #tpu.memory_space<vmem>>, vector<256x128xbf16>
      tpu.vector_store %arg8[%c0_19, %c0_20], %26 {strides = array<i32>} : memref<256x128xbf16, #tpu.memory_space<vmem>>, vector<256x128xbf16>,
      %c256_i32_21 = arith.constant 256 : i32
      %28 = arith.muli %arg0, %c256_i32_21 : i32
      %29 = tpu.iota {dimensions = array<i32: 0>} : vector<256x1xi32>
      %30 = vector.broadcast %28 : i32 to vector<256x1xi32>
      %31 = arith.addi %30, %29 : vector<256x1xi32>
      %c300_i32 = arith.constant 300 : i32
      %32 = vector.broadcast %c300_i32 : i32 to vector<256x1xi32>
      %33 = arith.cmpi slt, %31, %32 : vector<256x1xi32>
      %34 = arith.extui %33 : vector<256x1xi1> to vector<256x1xi32>
      %35 = arith.sitofp %34 : vector<256x1xi32> to vector<256x1xf32>
      %36 = vector.broadcast %35 : vector<256x1xf32> to vector<256x128xf32>
      %37 = arith.mulf %25, %36 : vector<256x128xf32>
      %cst_22 = arith.constant dense<0.000000e+00> : vector<128xf32>
      %38 = vector.multi_reduction <add>, %37, %cst_22 [0] : vector<256x128xf32> to vector<128xf32>
      %39 = vector.shape_cast %38 : vector<128xf32> to vector<1x128xf32>
      %c0_23 = arith.constant 0 : index
      %c0_24 = arith.constant 0 : index
      %c0_25 = arith.constant 0 : index
      %40 = vector.load %arg9[%c0_23, %c0_24, %c0_25] : memref<1x2x128xf32, #tpu.memory_space<vmem>>, vector<1x1x128xf32>
      %41 = vector.shape_cast %40 : vector<1x1x128xf32> to vector<1x128xf32>
      %42 = vector.shape_cast %39 : vector<1x128xf32> to vector<1x1x128xf32>
      tpu.vector_store %arg9[%c0_23, %c0_24, %c0_25], %42 {strides = array<i32>} : memref<1x2x128xf32, #tpu.memory_space<vmem>>, vector<1x1x128xf32>,
      %43 = arith.mulf %37, %25 : vector<256x128xf32>
      %cst_26 = arith.constant dense<0.000000e+00> : vector<128xf32>
      %44 = vector.multi_reduction <add>, %43, %cst_26 [0] : vector<256x128xf32> to vector<128xf32>
      %45 = vector.shape_cast %44 : vector<128xf32> to vector<1x128xf32>
      %c0_27 = arith.constant 0 : index
      %c1 = arith.constant 1 : index
      %c0_28 = arith.constant 0 : index
      %46 = vector.load %arg9[%c0_27, %c1, %c0_28] : memref<1x2x128xf32, #tpu.memory_space<vmem>>, vector<1x1x128xf32>
      %47 = vector.shape_cast %46 : vector<1x1x128xf32> to vector<1x128xf32>
      %48 = vector.shape_cast %45 : vector<1x128xf32> to vector<1x1x128xf32>
      tpu.vector_store %arg9[%c0_27, %c1, %c0_28], %48 {strides = array<i32>} : memref<1x2x128xf32, #tpu.memory_space<vmem>>, vector<1x1x128xf32>,
    } else {
    }
    return
  }
  func.func @transform_0(%arg0: i32, %arg1: i32) -> i32 {
    %c0_i32 = arith.constant 0 : i32
    %c0_i32_0 = arith.constant 0 : i32
    return %c0_i32 : i32
  }
  func.func @transform_1(%arg0: i32, %arg1: i32) -> (i32, i32) {
    %c0_i32 = arith.constant 0 : i32
    return %arg0, %arg1 : i32, i32
  }
  func.func @transform_2(%arg0: i32, %arg1: i32) -> (i32, i32) {
    %c0_i32 = arith.constant 0 : i32
    %c0_i32_0 = arith.constant 0 : i32
    %c0_i32_1 = arith.constant 0 : i32
    return %c0_i32, %c0_i32_0 : i32, i32
  }
  func.func @transform_3(%arg0: i32, %arg1: i32) -> (i32, i32) {
    %c0_i32 = arith.constant 0 : i32
    %c0_i32_0 = arith.constant 0 : i32
    return %arg0, %c0_i32 : i32, i32
  }
  func.func @transform_4(%arg0: i32, %arg1: i32) -> (i32, i32) {
    %c0_i32 = arith.constant 0 : i32
    %c0_i32_0 = arith.constant 0 : i32
    %c0_i32_1 = arith.constant 0 : i32
    return %c0_i32, %c0_i32_0 : i32, i32
  }
  func.func @transform_5(%arg0: i32, %arg1: i32) -> (i32, i32) {
    %c0_i32 = arith.constant 0 : i32
    %c0_i32_0 = arith.constant 0 : i32
    %c0_i32_1 = arith.constant 0 : i32
    return %c0_i32, %c0_i32_0 : i32, i32
  }
  func.func @transform_6(%arg0: i32, %arg1: i32) -> (i32, i32) {
    %c0_i32 = arith.constant 0 : i32
    %c0_i32_0 = arith.constant 0 : i32
    return %arg0, %c0_i32 : i32, i32
  }
  func.func @transform_7(%arg0: i32, %arg1: i32) -> (i32, i32, i32) {
    %c0_i32 = arith.constant 0 : i32
    %c0_i32_0 = arith.constant 0 : i32
    %c0_i32_1 = arith.constant 0 : i32
    return %arg0, %c0_i32, %c0_i32_0 : i32, i32, i32
  }
}

module attributes {stable_mosaic.version = 11 : i64} {
  func.func @kernel(%arg0: i32, %arg1: memref<256x128xbf16, #tpu.memory_space<vmem>>, %arg2: memref<1x128xf32, #tpu.memory_space<vmem>>, %arg3: memref<1x128xf32, #tpu.memory_space<vmem>>, %arg4: memref<128x128xf32, #tpu.memory_space<vmem>>, %arg5: memref<1x128xf32, #tpu.memory_space<vmem>>, %arg6: memref<256x128xbf16, #tpu.memory_space<vmem>>, %arg7: memref<1x2x128xf32, #tpu.memory_space<vmem>>) attributes {dimension_semantics = [#tpu.dimension_semantics<parallel>], iteration_bounds = array<i64: 2>, scalar_prefetch = 0 : i64, scratch_operands = 0 : i64, tpu.core_type = #tpu.core_type<tc>, window_params = [{transform_indices = @transform_0, window_bounds = array<i64: 256, 128>}, {pipeline_mode = #tpu.pipeline_mode<synchronous>, transform_indices = @transform_1, window_bounds = array<i64: 1, 128>}, {pipeline_mode = #tpu.pipeline_mode<synchronous>, transform_indices = @transform_2, window_bounds = array<i64: 1, 128>}, {pipeline_mode = #tpu.pipeline_mode<synchronous>, transform_indices = @transform_3, window_bounds = array<i64: 128, 128>}, {pipeline_mode = #tpu.pipeline_mode<synchronous>, transform_indices = @transform_4, window_bounds = array<i64: 1, 128>}, {transform_indices = @transform_5, window_bounds = array<i64: 256, 128>}, {transform_indices = @transform_6, window_bounds = array<i64: 1, 2, 128>}]} {
    %c0 = arith.constant 0 : index
    %c0_0 = arith.constant 0 : index
    %0 = vector.load %arg1[%c0, %c0_0] : memref<256x128xbf16, #tpu.memory_space<vmem>>, vector<256x128xbf16>
    %c0_1 = arith.constant 0 : index
    %c0_2 = arith.constant 0 : index
    %1 = vector.load %arg2[%c0_1, %c0_2] : memref<1x128xf32, #tpu.memory_space<vmem>>, vector<1x128xf32>
    %2 = arith.extf %0 : vector<256x128xbf16> to vector<256x128xf32>
    %3 = vector.broadcast %1 : vector<1x128xf32> to vector<256x128xf32>
    %4 = arith.mulf %2, %3 : vector<256x128xf32>
    %c0_3 = arith.constant 0 : index
    %c0_4 = arith.constant 0 : index
    %5 = vector.load %arg3[%c0_3, %c0_4] : memref<1x128xf32, #tpu.memory_space<vmem>>, vector<1x128xf32>
    %6 = vector.broadcast %5 : vector<1x128xf32> to vector<256x128xf32>
    %7 = arith.addf %4, %6 : vector<256x128xf32>
    %cst = arith.constant 0.000000e+00 : f32
    %8 = vector.broadcast %cst : f32 to vector<256x128xf32>
    %9 = arith.maximumf %7, %8 : vector<256x128xf32>
    %c0_5 = arith.constant 0 : index
    %c0_6 = arith.constant 0 : index
    %10 = vector.load %arg4[%c0_5, %c0_6] : memref<128x128xf32, #tpu.memory_space<vmem>>, vector<128x128xf32>
    %cst_7 = arith.constant dense<0.000000e+00> : vector<256x128xf32>
    %11 = tpu.matmul %9, %10, %cst_7 {dimension_numbers = #tpu.dot_dimension_numbers<[1], [0], [0], [1], [0, 0, 1, 1], [], []>} : vector<256x128xf32>, vector<128x128xf32>, vector<256x128xf32> -> vector<256x128xf32>
    %c0_8 = arith.constant 0 : index
    %c0_9 = arith.constant 0 : index
    %12 = vector.load %arg5[%c0_8, %c0_9] : memref<1x128xf32, #tpu.memory_space<vmem>>, vector<1x128xf32>
    %13 = vector.broadcast %12 : vector<1x128xf32> to vector<256x128xf32>
    %14 = arith.addf %11, %13 : vector<256x128xf32>
    %15 = arith.truncf %14 : vector<256x128xf32> to vector<256x128xbf16>
    %c0_10 = arith.constant 0 : index
    %c0_11 = arith.constant 0 : index
    %16 = vector.load %arg6[%c0_10, %c0_11] : memref<256x128xbf16, #tpu.memory_space<vmem>>, vector<256x128xbf16>
    tpu.vector_store %arg6[%c0_10, %c0_11], %15 {strides = array<i32>} : memref<256x128xbf16, #tpu.memory_space<vmem>>, vector<256x128xbf16>,
    %c256_i32 = arith.constant 256 : i32
    %17 = arith.muli %arg0, %c256_i32 : i32
    %18 = tpu.iota {dimensions = array<i32: 0>} : vector<256x1xi32>
    %19 = vector.broadcast %17 : i32 to vector<256x1xi32>
    %20 = arith.addi %19, %18 : vector<256x1xi32>
    %c300_i32 = arith.constant 300 : i32
    %21 = vector.broadcast %c300_i32 : i32 to vector<256x1xi32>
    %22 = arith.cmpi slt, %20, %21 : vector<256x1xi32>
    %23 = arith.extui %22 : vector<256x1xi1> to vector<256x1xi32>
    %24 = arith.sitofp %23 : vector<256x1xi32> to vector<256x1xf32>
    %25 = vector.broadcast %24 : vector<256x1xf32> to vector<256x128xf32>
    %26 = arith.mulf %14, %25 : vector<256x128xf32>
    %cst_12 = arith.constant dense<0.000000e+00> : vector<128xf32>
    %27 = vector.multi_reduction <add>, %26, %cst_12 [0] : vector<256x128xf32> to vector<128xf32>
    %28 = vector.shape_cast %27 : vector<128xf32> to vector<1x128xf32>
    %c0_13 = arith.constant 0 : index
    %c0_14 = arith.constant 0 : index
    %c0_15 = arith.constant 0 : index
    %29 = vector.load %arg7[%c0_13, %c0_14, %c0_15] : memref<1x2x128xf32, #tpu.memory_space<vmem>>, vector<1x1x128xf32>
    %30 = vector.shape_cast %29 : vector<1x1x128xf32> to vector<1x128xf32>
    %31 = vector.shape_cast %28 : vector<1x128xf32> to vector<1x1x128xf32>
    tpu.vector_store %arg7[%c0_13, %c0_14, %c0_15], %31 {strides = array<i32>} : memref<1x2x128xf32, #tpu.memory_space<vmem>>, vector<1x1x128xf32>,
    %32 = arith.mulf %26, %14 : vector<256x128xf32>
    %cst_16 = arith.constant dense<0.000000e+00> : vector<128xf32>
    %33 = vector.multi_reduction <add>, %32, %cst_16 [0] : vector<256x128xf32> to vector<128xf32>
    %34 = vector.shape_cast %33 : vector<128xf32> to vector<1x128xf32>
    %c0_17 = arith.constant 0 : index
    %c1 = arith.constant 1 : index
    %c0_18 = arith.constant 0 : index
    %35 = vector.load %arg7[%c0_17, %c1, %c0_18] : memref<1x2x128xf32, #tpu.memory_space<vmem>>, vector<1x1x128xf32>
    %36 = vector.shape_cast %35 : vector<1x1x128xf32> to vector<1x128xf32>
    %37 = vector.shape_cast %34 : vector<1x128xf32> to vector<1x1x128xf32>
    tpu.vector_store %arg7[%c0_17, %c1, %c0_18], %37 {strides = array<i32>} : memref<1x2x128xf32, #tpu.memory_space<vmem>>, vector<1x1x128xf32>,
    return
  }
  func.func @transform_0(%arg0: i32) -> (i32, i32) {
    %c0_i32 = arith.constant 0 : i32
    %c0_i32_0 = arith.constant 0 : i32
    return %arg0, %c0_i32 : i32, i32
  }
  func.func @transform_1(%arg0: i32) -> (i32, i32) {
    %c0_i32 = arith.constant 0 : i32
    %c0_i32_0 = arith.constant 0 : i32
    %c0_i32_1 = arith.constant 0 : i32
    return %c0_i32, %c0_i32_0 : i32, i32
  }
  func.func @transform_2(%arg0: i32) -> (i32, i32) {
    %c0_i32 = arith.constant 0 : i32
    %c0_i32_0 = arith.constant 0 : i32
    %c0_i32_1 = arith.constant 0 : i32
    return %c0_i32, %c0_i32_0 : i32, i32
  }
  func.func @transform_3(%arg0: i32) -> (i32, i32) {
    %c0_i32 = arith.constant 0 : i32
    %c0_i32_0 = arith.constant 0 : i32
    %c0_i32_1 = arith.constant 0 : i32
    return %c0_i32, %c0_i32_0 : i32, i32
  }
  func.func @transform_4(%arg0: i32) -> (i32, i32) {
    %c0_i32 = arith.constant 0 : i32
    %c0_i32_0 = arith.constant 0 : i32
    %c0_i32_1 = arith.constant 0 : i32
    return %c0_i32, %c0_i32_0 : i32, i32
  }
  func.func @transform_5(%arg0: i32) -> (i32, i32) {
    %c0_i32 = arith.constant 0 : i32
    %c0_i32_0 = arith.constant 0 : i32
    return %arg0, %c0_i32 : i32, i32
  }
  func.func @transform_6(%arg0: i32) -> (i32, i32, i32) {
    %c0_i32 = arith.constant 0 : i32
    %c0_i32_0 = arith.constant 0 : i32
    %c0_i32_1 = arith.constant 0 : i32
    return %arg0, %c0_i32, %c0_i32_0 : i32, i32, i32
  }
}

module attributes {stable_mosaic.version = 11 : i64} {
  func.func @kernel(%arg0: i32, %arg1: memref<256x128xbf16, #tpu.memory_space<vmem>>, %arg2: memref<1x128xf32, #tpu.memory_space<vmem>>, %arg3: memref<1x128xf32, #tpu.memory_space<vmem>>, %arg4: memref<256x128xf32, #tpu.memory_space<vmem>>, %arg5: memref<256x128xf32, #tpu.memory_space<vmem>>) attributes {dimension_semantics = [#tpu.dimension_semantics<parallel>], iteration_bounds = array<i64: 2>, scalar_prefetch = 0 : i64, scratch_operands = 0 : i64, tpu.core_type = #tpu.core_type<tc>, window_params = [{transform_indices = @transform_0, window_bounds = array<i64: 256, 128>}, {pipeline_mode = #tpu.pipeline_mode<synchronous>, transform_indices = @transform_1, window_bounds = array<i64: 1, 128>}, {pipeline_mode = #tpu.pipeline_mode<synchronous>, transform_indices = @transform_2, window_bounds = array<i64: 1, 128>}, {transform_indices = @transform_3, window_bounds = array<i64: 256, 128>}, {transform_indices = @transform_4, window_bounds = array<i64: 256, 128>}]} {
    %c0 = arith.constant 0 : index
    %c0_0 = arith.constant 0 : index
    %0 = vector.load %arg1[%c0, %c0_0] : memref<256x128xbf16, #tpu.memory_space<vmem>>, vector<256x128xbf16>
    %c0_1 = arith.constant 0 : index
    %c0_2 = arith.constant 0 : index
    %1 = vector.load %arg2[%c0_1, %c0_2] : memref<1x128xf32, #tpu.memory_space<vmem>>, vector<1x128xf32>
    %2 = arith.extf %0 : vector<256x128xbf16> to vector<256x128xf32>
    %3 = vector.broadcast %1 : vector<1x128xf32> to vector<256x128xf32>
    %4 = arith.mulf %2, %3 : vector<256x128xf32>
    %c0_3 = arith.constant 0 : index
    %c0_4 = arith.constant 0 : index
    %5 = vector.load %arg3[%c0_3, %c0_4] : memref<1x128xf32, #tpu.memory_space<vmem>>, vector<1x128xf32>
    %6 = vector.broadcast %5 : vector<1x128xf32> to vector<256x128xf32>
    %7 = arith.addf %4, %6 : vector<256x128xf32>
    %cst = arith.constant 0.000000e+00 : f32
    %8 = vector.broadcast %cst : f32 to vector<256x128xf32>
    %9 = arith.maximumf %7, %8 : vector<256x128xf32>
    %c0_5 = arith.constant 0 : index
    %c0_6 = arith.constant 0 : index
    %10 = vector.load %arg4[%c0_5, %c0_6] : memref<256x128xf32, #tpu.memory_space<vmem>>, vector<256x128xf32>
    %11 = arith.addf %9, %10 : vector<256x128xf32>
    %c0_7 = arith.constant 0 : index
    %c0_8 = arith.constant 0 : index
    %12 = vector.load %arg5[%c0_7, %c0_8] : memref<256x128xf32, #tpu.memory_space<vmem>>, vector<256x128xf32>
    tpu.vector_store %arg5[%c0_7, %c0_8], %11 {strides = array<i32>} : memref<256x128xf32, #tpu.memory_space<vmem>>, vector<256x128xf32>,
    return
  }
  func.func @transform_0(%arg0: i32) -> (i32, i32) {
    %c0_i32 = arith.constant 0 : i32
    %c0_i32_0 = arith.constant 0 : i32
    return %arg0, %c0_i32 : i32, i32
  }
  func.func @transform_1(%arg0: i32) -> (i32, i32) {
    %c0_i32 = arith.constant 0 : i32
    %c0_i32_0 = arith.constant 0 : i32
    %c0_i32_1 = arith.constant 0 : i32
    return %c0_i32, %c0_i32_0 : i32, i32
  }
  func.func @transform_2(%arg0: i32) -> (i32, i32) {
    %c0_i32 = arith.constant 0 : i32
    %c0_i32_0 = arith.constant 0 : i32
    %c0_i32_1 = arith.constant 0 : i32
    return %c0_i32, %c0_i32_0 : i32, i32
  }
  func.func @transform_3(%arg0: i32) -> (i32, i32) {
    %c0_i32 = arith.constant 0 : i32
    %c0_i32_0 = arith.constant 0 : i32
    return %arg0, %c0_i32 : i32, i32
  }
  func.func @transform_4(%arg0: i32) -> (i32, i32) {
    %c0_i32 = arith.constant 0 : i32
    %c0_i32_0 = arith.constant 0 : i32
    return %arg0, %c0_i32 : i32, i32
  }
}

</mosaic_0001>

<bundles_post_ra>
// kernel: gin_layer.4
= control target key start
LH: loop header
LB: loop body
LE: loop exit
PB: predicated region body
PF: predicated region fallthrough
CT: control target
= control target key end

     0   :  { %s1344_s21 = smov 0   ;;  %s1836_s0 = inlined_call_operand.vmem [shape: bf16[512,128], index: 0, kind: input, shape index: {}]   ;;  %s1837_s1 = inlined_call_operand.vmem [shape: f32[1,128], index: 1, kind: input, shape index: {}]   ;;  %s1838_s2 = inlined_call_operand.vmem [shape: f32[1,128], index: 2, kind: input, shape index: {}]   ;;  %s1839_s3 = inlined_call_operand.vmem [shape: f32[128,128], index: 3, kind: input, shape index: {}]   ;;  %s1840_s4 = inlined_call_operand.vmem [shape: f32[1,128], index: 4, kind: input, shape index: {}]   ;;  %s1841_s5 = inlined_call_operand.vmem [shape: bf16[512,128], index: 5, kind: output, shape index: {0}]   ;;  %s1842_s6 = inlined_call_operand.vmem [shape: f32[2,2,128], index: 6, kind: output, shape index: {1}]  }
   0x1 LB: > { %s1350_s22 = sadd.s32 4294967295, %s1306_s21   ;;  %p1025_p0 = scmp.ge.s32.totalorder %s1306_s21, 1  ;;  %s1306_s21 = sphi %s1344_s21, %s17_s21  }
   0x2   : > { %p216_p1 = scmp.lt.s32.totalorder %s1306_s21, 3 }
   0x4   : > { %p217_p2 = pnand %p1025_p0, %p216_p1 }
   0x5   : > { %s1026_s27 = sshll.u32 (!%p217_p2), %s1350_s22, 5  ;;  %p262_p4 = scmp.lt.s32.totalorder (!%p217_p2), %s1350_s22, 1 }
   0x6   : > { %220 = sbr.rel (%p217_p2) target bundleno = 294 (0x126), region = 40  ;;  %p251_p3 = scmp.lt.s32.totalorder (!%p217_p2), %s1026_s27, 63 }
   0xb   : > { %v449_v0 = vld [vmem:[%s1839_s3 + $0x78] sm:$0xff]  ;;  %v448_v1 = vld [vmem:[%s1839_s3 + $0x70] sm:$0xff]  ;;  %v447_v2 = vld [vmem:[%s1839_s3 + $0x68] sm:$0xff]  ;;  %s1844_s27 = smov (!%p251_p3, %s1026_s27), 63 }
   0xc   : > { %454 = vmatpush.msra.mxu0 %v449_v0  ;;  %1240 = vmatpush.msra.mxu1 %v449_v0  ;;  %v446_v3 = vld [vmem:[%s1839_s3 + $0x60] sm:$0xff]  ;;  %v445_v4 = vld [vmem:[%s1839_s3 + $0x58] sm:$0xff]  ;;  %s1027_s10 = sshll.u32 %s1844_s27, 2  ;;  %v444_v5 = vld [vmem:[%s1839_s3 + $0x50] sm:$0xff]  ;;  %s1031_s27 = sshll.u32 %s1350_s22, 8 }
   0xd   : > { %1241 = vmatpush.msra.mxu2 %v449_v0  ;;  %1242 = vmatpush.msra.mxu3 %v449_v0  ;;  %v443_v6 = vld [vmem:[%s1839_s3 + $0x48] sm:$0xff]  ;;  %s1384_s17 = scalar_lea.vmem %s1836_s0, %s1027_s10  ;;  %v442_v7 = vld [vmem:[%s1839_s3 + $0x40] sm:$0xff]  ;;  %v441_v10 = vld [vmem:[%s1839_s3 + $0x38] sm:$0xff]  ;;  %s1525_s26 = scalar_lea.vmem %s1841_s5, %s1027_s10 }
   0xe   : > { %455 = vmatpush.msra.mxu0 %v448_v1  ;;  %1243 = vmatpush.msra.mxu1 %v448_v1  ;;  %v1067_v8 = vld [vmem:[%s1384_s17] sm:$0xff]   ;;  %v440_v12 = vld [vmem:[%s1839_s3 + $0x30] sm:$0xff]  ;;  %v439_v16 = vld [vmem:[%s1839_s3 + $0x28] sm:$0xff]  ;;  %s1846_s22 = smov (!%p262_p4, %s1350_s22), 1 }
   0xf   : > { %1244 = vmatpush.msra.mxu2 %v448_v1  ;;  %1245 = vmatpush.msra.mxu3 %v448_v1  ;;  %v1213_v9 = vld [vmem:[%s1384_s17 + $0x20] sm:$0xff]   ;;  %v1068_v13 = vunpack.c.l.bf16 %v1067_v8  ;;  %v437_v22 = vld [vmem:[%s1839_s3 + $0x18] sm:$0xff]  ;;  %v436_v24 = vld [vmem:[%s1839_s3 + $0x10] sm:$0xff]  ;;  %v1069_v26 = vunpack.c.h.bf16 %v1067_v8  ;;  %s1030_s10 = sshll.u32 %s1846_s22, 1 }
  0x10   : > { %456 = vmatpush.msra.mxu0 %v447_v2  ;;  %1246 = vmatpush.msra.mxu1 %v447_v2  ;;  %v1217_v11 = vld [vmem:[%s1384_s17 + $0x40] sm:$0xff]   ;;  %v1084_v15 = vunpack.c.l.bf16 %v1213_v9  ;;  %v1085_v28 = vunpack.c.h.bf16 %v1213_v9  ;;  %v435_v30 = vld [vmem:[%s1839_s3 + $0x8] sm:$0xff]  ;;  %s265_s30 = scalar_lea.vmem %s1842_s6, %s1030_s10 }
  0x11   : > { %1247 = vmatpush.msra.mxu2 %v447_v2  ;;  %1248 = vmatpush.msra.mxu3 %v447_v2  ;;  %v1401_v14 = vld [vmem:[%s1837_s1] ss:$0 sm:$0xff]  ;;  %v1100_v17 = vunpack.c.l.bf16 %v1217_v11  ;;  %v1101_v32 = vunpack.c.h.bf16 %v1217_v11  ;;  %v1210_v38 = vld [vmem:[%s1384_s17 + $0x8] sm:$0xff]  }
  0x12   : > { %457 = vmatpush.msra.mxu0 %v446_v3  ;;  %1249 = vmatpush.msra.mxu1 %v446_v3  ;;  %v438_v18 = vld [vmem:[%s1839_s3 + $0x20] sm:$0xff]  ;;  %v334_v19 = vmul.f32 %v1401_v14, %v1068_v13  ;;  %v342_v21 = vmul.f32 %v1401_v14, %v1084_v15  ;;  %v335_v36 = vmul.f32 %v1401_v14, %v1069_v26  ;;  %v1214_v40 = vld [vmem:[%s1384_s17 + $0x28] sm:$0xff]   ;;  %v1072_v44 = vunpack.c.l.bf16 %v1210_v38  ;;  %v1215_v13 = vld [vmem:[%s1384_s17 + $0x30] sm:$0xff]  }
  0x13   : > { %1250 = vmatpush.msra.mxu2 %v446_v3  ;;  %1251 = vmatpush.msra.mxu3 %v446_v3  ;;  %v1413_v20 = vld [vmem:[%s1838_s2] ss:$0 sm:$0xff]  ;;  %v350_v23 = vmul.f32 %v1401_v14, %v1100_v17  ;;  %v343_v39 = vmul.f32 %v1401_v14, %v1085_v28  ;;  %v351_v43 = vmul.f32 %v1401_v14, %v1101_v32  ;;  %v1218_v45 = vld [vmem:[%s1384_s17 + $0x48] sm:$0xff]   ;;  %v1088_v49 = vunpack.c.l.bf16 %v1214_v40 }
  0x14   : > { %458 = vmatpush.msra.mxu0 %v445_v4  ;;  %1252 = vmatpush.msra.mxu1 %v445_v4  ;;  %v370_v25 = vadd.f32 %v1413_v20, %v334_v19  ;;  %v378_v27 = vadd.f32 %v1413_v20, %v342_v21  ;;  %v1221_v29 = vld [vmem:[%s1384_s17 + $0x60] sm:$0xff]   ;;  %v371_v47 = vadd.f32 %v1413_v20, %v335_v36  ;;  %v1104_v52 = vunpack.c.l.bf16 %v1218_v45  ;;  %v1222_v3 = vld [vmem:[%s1384_s17 + $0x68] sm:$0xff]   ;;  %v1219_v19 = vld [vmem:[%s1384_s17 + $0x50] sm:$0xff]  }
  0x15   : > { %1253 = vmatpush.msra.mxu2 %v445_v4  ;;  %1254 = vmatpush.msra.mxu3 %v445_v4  ;;  %v386_v31 = vadd.f32 %v1413_v20, %v350_v23  ;;  %v1116_v33 = vunpack.c.l.bf16 %v1221_v29  ;;  %v434_v34 = vld [vmem:[%s1839_s3] sm:$0xff]  ;;  %v379_v48 = vadd.f32 %v1413_v20, %v343_v39  ;;  %v387_v51 = vadd.f32 %v1413_v20, %v351_v43 }
  0x16   : > { %459 = vmatpush.msra.mxu0 %v444_v5  ;;  %1255 = vmatpush.msra.mxu1 %v444_v5  ;;  %v402_v35 = vmax.f32 %v370_v25, 0.0  ;;  %v410_v37 = vmax.f32 %v378_v27, 0.0  ;;  %v1117_v53 = vunpack.c.h.bf16 %v1221_v29  ;;  %v336_v54 = vmul.f32 %v1401_v14, %v1072_v44 }
  0x17   : > { %1256 = vmatpush.msra.mxu2 %v444_v5  ;;  %1257 = vmatpush.msra.mxu3 %v444_v5  ;;  %v358_v41 = vmul.f32 %v1401_v14, %v1116_v33  ;;  %v418_v42 = vmax.f32 %v386_v31, 0.0  ;;  %v403_v55 = vmax.f32 %v371_v47, 0.0  ;;  %v411_v56 = vmax.f32 %v379_v48, 0.0 }
  0x18   : > { %460 = vmatpush.msra.mxu0 %v443_v6  ;;  %1258 = vmatpush.msra.mxu1 %v443_v6  ;;  %v344_v57 = vmul.f32 %v1401_v14, %v1088_v49  ;;  %v359_v58 = vmul.f32 %v1401_v14, %v1117_v53  ;;  %v419_v59 = vmax.f32 %v387_v51, 0.0  ;;  %v352_v60 = vmul.f32 %v1401_v14, %v1104_v52  ;;  %v1212_v51 = vld [vmem:[%s1384_s17 + $0x18] sm:$0xff]  }
  0x19   : > { %1259 = vmatpush.msra.mxu2 %v443_v6  ;;  %1260 = vmatpush.msra.mxu3 %v443_v6  ;;  %v394_v46 = vadd.f32 %v1413_v20, %v358_v41  ;;  %v372_v62 = vadd.f32 %v1413_v20, %v336_v54  ;;  %v1073_v63 = vunpack.c.h.bf16 %v1210_v38  ;;  %v1089_v1 = vunpack.c.h.bf16 %v1214_v40  ;;  %v1223_v41 = vld [vmem:[%s1384_s17 + $0x70] sm:$0xff]   ;;  %v1216_v52 = vld [vmem:[%s1384_s17 + $0x38] sm:$0xff]  }
  0x1a   : > { %461 = vmatpush.msra.mxu0 %v442_v7  ;;  %1261 = vmatpush.msra.mxu1 %v442_v7  ;;  %v395_v61 = vadd.f32 %v1413_v20, %v359_v58  ;;  %v380_v0 = vadd.f32 %v1413_v20, %v344_v57  ;;  %v388_v4 = vadd.f32 %v1413_v20, %v352_v60  ;;  %v1105_v5 = vunpack.c.h.bf16 %v1218_v45 }
  0x1b   : > { %1262 = vmatpush.msra.mxu2 %v442_v7  ;;  %1263 = vmatpush.msra.mxu3 %v442_v7  ;;  %v426_v50 = vmax.f32 %v394_v46, 0.0  ;;  %v1120_v6 = vunpack.c.l.bf16 %v1222_v3  ;;  %v404_v7 = vmax.f32 %v372_v62, 0.0  ;;  %v337_v8 = vmul.f32 %v1401_v14, %v1073_v63  ;;  %v1224_v63 = vld [vmem:[%s1384_s17 + $0x78] sm:$0xff]  }
  0x1c   : > { %462 = vmatpush.msra.mxu0 %v441_v10  ;;  %1264 = vmatpush.msra.mxu1 %v441_v10  ;;  %v427_v2 = vmax.f32 %v395_v61, 0.0  ;;  %v412_v9 = vmax.f32 %v380_v0, 0.0  ;;  %v345_v11 = vmul.f32 %v1401_v14, %v1089_v1  ;;  %v420_v15 = vmax.f32 %v388_v4, 0.0 }
  0x1d   : > { %1265 = vmatpush.msra.mxu2 %v441_v10  ;;  %1266 = vmatpush.msra.mxu3 %v441_v10  ;;  %v1211_v10 = vld [vmem:[%s1384_s17 + $0x10] sm:$0xff]   ;;  %v373_v21 = vadd.f32 %v1413_v20, %v337_v8  ;;  %v1092_v23 = vunpack.c.l.bf16 %v1215_v13  ;;  %v1108_v26 = vunpack.c.l.bf16 %v1219_v19  ;;  %v1121_v27 = vunpack.c.h.bf16 %v1222_v3 }
  0x1e   : > { %463 = vmatpush.msra.mxu0 %v440_v12  ;;  %1267 = vmatpush.msra.mxu1 %v440_v12  ;;  %v1093_v39 = vunpack.c.h.bf16 %v1215_v13  ;;  %v1109_v44 = vunpack.c.h.bf16 %v1219_v19  ;;  %v1125_v46 = vunpack.c.h.bf16 %v1223_v41  ;;  %v1080_v60 = vunpack.c.l.bf16 %v1212_v51 }
  0x1f   : > { %1268 = vmatpush.msra.mxu2 %v440_v12  ;;  %1269 = vmatpush.msra.mxu3 %v440_v12  ;;  %v360_v12 = vmul.f32 %v1401_v14, %v1120_v6  ;;  %v405_v29 = vmax.f32 %v373_v21, 0.0  ;;  %v346_v31 = vmul.f32 %v1401_v14, %v1092_v23  ;;  %v361_v32 = vmul.f32 %v1401_v14, %v1121_v27 }
  0x20   : > { %464 = vmatpush.msra.mxu0 %v439_v16  ;;  %1270 = vmatpush.msra.mxu1 %v439_v16  ;;  %v363_v58 = vmul.f32 %v1401_v14, %v1125_v46  ;;  %v1096_v62 = vunpack.c.l.bf16 %v1216_v52  ;;  %v1128_v3 = vunpack.c.l.bf16 %v1224_v63  ;;  %v1081_v13 = vunpack.c.h.bf16 %v1212_v51 }
  0x21   : > { %1271 = vmatpush.msra.mxu2 %v439_v16  ;;  %1272 = vmatpush.msra.mxu3 %v439_v16  ;;  %v353_v16 = vmul.f32 %v1401_v14, %v1105_v5  ;;  %v396_v17 = vadd.f32 %v1413_v20, %v360_v12  ;;  %v382_v38 = vadd.f32 %v1413_v20, %v346_v31  ;;  %v1129_v21 = vunpack.c.h.bf16 %v1224_v63 }
  0x22   : > { %465 = vmatpush.msra.mxu0 %v438_v18  ;;  %1273 = vmatpush.msra.mxu1 %v438_v18  ;;  %v340_v5 = vmul.f32 %v1401_v14, %v1080_v60  ;;  %v341_v23 = vmul.f32 %v1401_v14, %v1081_v13 }
  0x23   : > { %1274 = vmatpush.msra.mxu2 %v438_v18  ;;  %1275 = vmatpush.msra.mxu3 %v438_v18  ;;  %v1076_v18 = vunpack.c.l.bf16 %v1211_v10  ;;  %v389_v25 = vadd.f32 %v1413_v20, %v353_v16  ;;  %v414_v49 = vmax.f32 %v382_v38, 0.0  ;;  %v1097_v16 = vunpack.c.h.bf16 %v1216_v52 }
  0x24   : > { %466 = vmatpush.msra.mxu0 %v437_v22  ;;  %1276 = vmatpush.msra.mxu1 %v437_v22  ;;  %v376_v12 = vadd.f32 %v1413_v20, %v340_v5  ;;  %v1566_v5 = vstv %s1031_s27 }
  0x25   : > { %1277 = vmatpush.msra.mxu2 %v437_v22  ;;  %1278 = vmatpush.msra.mxu3 %v437_v22  ;;  %v381_v22 = vadd.f32 %v1413_v20, %v345_v11  ;;  %v338_v28 = vmul.f32 %v1401_v14, %v1076_v18  ;;  %v421_v33 = vmax.f32 %v389_v25, 0.0  ;;  %v364_v11 = vmul.f32 %v1401_v14, %v1128_v3 }
  0x26   : > { %467 = vmatpush.msra.mxu0 %v436_v24  ;;  %1279 = vmatpush.msra.mxu1 %v436_v24  ;;  %v349_v25 = vmul.f32 %v1401_v14, %v1097_v16 }
  0x27   : > { %1280 = vmatpush.msra.mxu2 %v436_v24  ;;  %1281 = vmatpush.msra.mxu3 %v436_v24  ;;  %v428_v24 = vmax.f32 %v396_v17, 0.0  ;;  %v374_v36 = vadd.f32 %v1413_v20, %v338_v28  ;;  %v400_v19 = vadd.f32 %v1413_v20, %v364_v11 }
  0x28   : > { %468 = vmatpush.msra.mxu0 %v435_v30  ;;  %1282 = vmatpush.msra.mxu1 %v435_v30  ;;  %v385_v31 = vadd.f32 %v1413_v20, %v349_v25 }
  0x29   : > { %1283 = vmatpush.msra.mxu2 %v435_v30  ;;  %1284 = vmatpush.msra.mxu3 %v435_v30  ;;  %v413_v30 = vmax.f32 %v381_v22, 0.0  ;;  %v406_v47 = vmax.f32 %v374_v36, 0.0  ;;  %v408_v22 = vmax.f32 %v376_v12, 0.0  ;;  %v432_v28 = vmax.f32 %v400_v19, 0.0 }
  0x2a   : > { %469 = vmatpush.msra.mxu0 %v434_v34  ;;  %1285 = vmatpush.msra.mxu1 %v434_v34 }
  0x2b   : > { %470 = vmatmul.f32.vlgmr.msra.gmra.mxu0 %v402_v35  ;;  %494 = vmatmul.f32.vlgmr.msra.gmra.mxu1 %v410_v37  ;;  %v397_v35 = vadd.f32 %v1413_v20, %v361_v32  ;;  %v1077_v37 = vunpack.c.h.bf16 %v1211_v10 }
  0x2c   : > { %1286 = vmatpush.msra.mxu2 %v434_v34  ;;  %1287 = vmatpush.msra.mxu3 %v434_v34  ;;  %v354_v34 = vmul.f32 %v1401_v14, %v1108_v26 }
  0x2d   : > { %518 = vmatmul.f32.vlgmr.msra.gmra.mxu2 %v418_v42  ;;  %542 = vmatmul.f32.vlgmr.msra.gmra.mxu3 %v426_v50  ;;  %v429_v40 = vmax.f32 %v397_v35, 0.0  ;;  %v1124_v42 = vunpack.c.l.bf16 %v1223_v41  ;;  %v339_v48 = vmul.f32 %v1401_v14, %v1077_v37  ;;  %v347_v50 = vmul.f32 %v1401_v14, %v1093_v39  ;;  %v1506_v39 = vld [vmem:[%s1840_s4] ss:$0 sm:$0xff] }
  0x2e   : > { %v390_v43 = vadd.f32 %v1413_v20, %v354_v34  ;;  %v417_v35 = vmax.f32 %v385_v31, 0.0 }
  0x2f   : > { %v362_v45 = vmul.f32 %v1401_v14, %v1124_v42  ;;  %v383_v61 = vadd.f32 %v1413_v20, %v347_v50 }
  0x30   : > { %v422_v54 = vmax.f32 %v390_v43, 0.0 }
  0x31   : > { %v398_v53 = vadd.f32 %v1413_v20, %v362_v45  ;;  %v415_v6 = vmax.f32 %v383_v61, 0.0 }
  0x33   : > { %473 = vmatmul.f32.gmra.mxu0 %v403_v55  ;;  %497 = vmatmul.f32.gmra.mxu1 %v411_v56  ;;  %v355_v55 = vmul.f32 %v1401_v14, %v1109_v44  ;;  %v1220_v56 = vld [vmem:[%s1384_s17 + $0x58] sm:$0xff]   ;;  %v430_v57 = vmax.f32 %v398_v53, 0.0 }
  0x34   : > { %v1112_v1 = vunpack.c.l.bf16 %v1220_v56  ;;  %v1113_v18 = vunpack.c.h.bf16 %v1220_v56  ;;  %v632_v56 = vlaneseq }
  0x35   : > { %521 = vmatmul.f32.gmra.mxu2 %v419_v59  ;;  %545 = vmatmul.f32.gmra.mxu3 %v427_v2  ;;  %v375_v59 = vadd.f32 %v1413_v20, %v339_v48  ;;  %v391_v0 = vadd.f32 %v1413_v20, %v355_v55  ;;  %v399_v2 = vadd.f32 %v1413_v20, %v363_v58 }
  0x36   : > { %v357_v27 = vmul.f32 %v1401_v14, %v1113_v18  ;;  %v1551_v60 = vshrl.u32 %v632_v56, 7 }
  0x37   : > { %v407_v4 = vmax.f32 %v375_v59, 0.0  ;;  %v423_v8 = vmax.f32 %v391_v0, 0.0  ;;  %v431_v10 = vmax.f32 %v399_v2, 0.0 }
  0x38   : > { %v393_v32 = vadd.f32 %v1413_v20, %v357_v27  ;;  %v636_v11 = vadd.s32 24, %v1551_v60  ;;  %v641_v13 = vadd.s32 64, %v1551_v60 }
  0x3a   : > { %v425_v36 = vmax.f32 %v393_v32, 0.0  ;;  %v669_v19 = vadd.s32 %v1566_v5, %v636_v11  ;;  %v1308_v32 = vmov 0.0  }
  0x3b   : > { %476 = vmatmul.f32.gmra.mxu0 %v404_v7  ;;  %500 = vmatmul.f32.gmra.mxu1 %v412_v9  ;;  %v348_v7 = vmul.f32 %v1401_v14, %v1096_v62  ;;  %v356_v9 = vmul.f32 %v1401_v14, %v1112_v1 }
  0x3c   : > { %vm701_vm3 = vcmp.lt.s32.totalorder %v669_v19, 300 }
  0x3d   : > { %524 = vmatmul.f32.gmra.mxu2 %v420_v15  ;;  %548 = vmatmul.f32.gmra.mxu3 %v428_v24  ;;  %v384_v15 = vadd.f32 %v1413_v20, %v348_v7  ;;  %v392_v17 = vadd.f32 %v1413_v20, %v356_v9  ;;  %v635_v9 = vadd.s32 16, %v1551_v60 }
  0x3f   : > { %v416_v24 = vmax.f32 %v384_v15, 0.0  ;;  %v424_v26 = vmax.f32 %v392_v17, 0.0  ;;  %v642_v15 = vadd.s32 72, %v1551_v60  ;;  %v668_v16 = vadd.s32 %v1566_v5, %v635_v9 }
  0x41   : > { %v675_v27 = vadd.s32 %v1566_v5, %v642_v15  ;;  %vm700_vm2 = vcmp.lt.s32.totalorder %v668_v16, 300 }
  0x43   : > { %479 = vmatmul.f32.gmra.mxu0 %v405_v29  ;;  %503 = vmatmul.f32.gmra.mxu1 %v413_v30  ;;  %v365_v29 = vmul.f32 %v1401_v14, %v1129_v21  ;;  %v377_v30 = vadd.f32 %v1413_v20, %v341_v23  ;;  %v637_v23 = vadd.s32 32, %v1551_v60  ;;  %vm707_vm5 = vcmp.lt.s32.totalorder %v675_v27, 300 }
  0x45   : > { %527 = vmatmul.f32.gmra.mxu2 %v421_v33  ;;  %551 = vmatmul.f32.gmra.mxu3 %v429_v40  ;;  %v401_v33 = vadd.f32 %v1413_v20, %v365_v29  ;;  %v409_v34 = vmax.f32 %v377_v30, 0.0  ;;  %v638_v29 = vadd.s32 40, %v1551_v60  ;;  %v639_v30 = vadd.s32 48, %v1551_v60 }
  0x47   : > { %v433_v37 = vmax.f32 %v401_v33, 0.0 }
  0x4b   : > { %482 = vmatmul.f32.gmra.mxu0 %v406_v47  ;;  %506 = vmatmul.f32.gmra.mxu1 %v414_v49 }
  0x4d   : > { %530 = vmatmul.f32.gmra.mxu2 %v422_v54  ;;  %554 = vmatmul.f32.gmra.mxu3 %v430_v57 }
  0x53   : > { %485 = vmatmul.f32.gmra.mxu0 %v407_v4  ;;  %509 = vmatmul.f32.gmra.mxu1 %v415_v6  ;;  %v634_v6 = vadd.s32 8, %v1551_v60 }
  0x55   : > { %533 = vmatmul.f32.gmra.mxu2 %v423_v8  ;;  %557 = vmatmul.f32.gmra.mxu3 %v431_v10  ;;  %v666_v10 = vadd.s32 %v1566_v5, %v1551_v60  ;;  %v667_v12 = vadd.s32 %v1566_v5, %v634_v6 }
  0x57   : > { %vm698_vm0 = vcmp.lt.s32.totalorder %v666_v10, 300  ;;  %vm699_vm1 = vcmp.lt.s32.totalorder %v667_v12, 300  ;;  %v1637_v10 = vsel %vm707_vm5, 1.0, %v1308_v32 }
  0x58   : > { %v1033_v33 = vsel %vm699_vm1, 1.0, %v1308_v32 }
  0x5b   : > { %488 = vmatmul.f32.gmra.mxu0 %v408_v22  ;;  %512 = vmatmul.f32.gmra.mxu1 %v416_v24 }
  0x5d   : > { %536 = vmatmul.f32.gmra.mxu2 %v424_v26  ;;  %560 = vmatmul.f32.gmra.mxu3 %v432_v28  ;;  %v674_v26 = vadd.s32 %v1566_v5, %v641_v13  ;;  %v640_v13 = vadd.s32 56, %v1551_v60 }
  0x5f   : > { %vm706_vm4 = vcmp.lt.s32.totalorder %v674_v26, 300 }
  0x60   : > { %v1040_v9 = vsel %vm706_vm4, 1.0, %v1308_v32 }
  0x63   : > { %491 = vmatmul.f32.gmra.mxu0 %v409_v34  ;;  %515 = vmatmul.f32.gmra.mxu1 %v417_v35  ;;  %v1032_v35 = vsel %vm698_vm0, 1.0, %v1308_v32 }
  0x65   : > { %539 = vmatmul.f32.gmra.mxu2 %v425_v36  ;;  %563 = vmatmul.f32.gmra.mxu3 %v433_v37  ;;  %v643_v36 = vadd.s32 80, %v1551_v60  ;;  %v649_v37 = vadd.s32 128, %v1551_v60 }
  0xa8   : > { %v471_v14 = vpop.f32.mrf.mxu0  ;;  %v495_v38 = vpop.f32.mrf.mxu1 }
  0xa9   : > { %v1509_v20 = vadd.f32 %v1506_v39, %v471_v14  ;;  %v1515_v43 = vadd.f32 %v1506_v39, %v495_v38  ;;  %v670_v14 = vadd.s32 %v1566_v5, %v637_v23  ;;  %v1034_v38 = vsel %vm700_vm2, 1.0, %v1308_v32 }
  0xab   : > { %vm702_vm6 = vcmp.lt.s32.totalorder %v670_v14, 300 }
  0xac   : > { %v1036_v12 = vsel %vm702_vm6, 1.0, %v1308_v32 }
  0xb0   : > { %v474_v40 = vpop.f32.mrf.mxu0  ;;  %v498_v41 = vpop.f32.mrf.mxu1 }
  0xb1   : > { %v1512_v42 = vadd.f32 %v1506_v39, %v474_v40  ;;  %v1518_v44 = vadd.f32 %v1506_v39, %v498_v41  ;;  %v519_v45 = vpop.f32.mrf.mxu2  ;;  %v543_v46 = vpop.f32.mrf.mxu3 }
  0xb2   : > { %v1534_v53 = vadd.f32 %v1506_v39, %v519_v45  ;;  %v1545_v58 = vadd.f32 %v1506_v39, %v543_v46  ;;  %v1035_v45 = vsel %vm701_vm3, 1.0, %v1308_v32 }
  0xb3   : > { %v1133_v47 = vpack.c.bf16 %v1512_v42, %v1509_v20  ;;  %v1153_v48 = vpack.c.bf16 %v1518_v44, %v1515_v43  ;;  %v795_v41 = vmul.f32 %v1033_v33, %v1512_v42 }
  0xb5   : > { %1134 = vst [vmem:[%s1525_s26] sm:$0xff] %v1133_v47   ;;  %v671_v47 = vadd.s32 %v1566_v5, %v638_v29 }
  0xb6   : > { %1228 = vst [vmem:[%s1525_s26 + $0x20] sm:$0xff] %v1153_v48   ;;  %v672_v48 = vadd.s32 %v1566_v5, %v639_v30 }
  0xb7   : > { %vm703_vm7 = vcmp.lt.s32.totalorder %v671_v47, 300 }
  0xb8   : > { %v477_v49 = vpop.f32.mrf.mxu0  ;;  %v501_v50 = vpop.f32.mrf.mxu1  ;;  %vm704_vm8 = vcmp.lt.s32.totalorder %v672_v48, 300  ;;  %v1037_v19 = vsel %vm703_vm7, 1.0, %v1308_v32 }
  0xb9   : > { %v522_v51 = vpop.f32.mrf.mxu2  ;;  %v546_v52 = vpop.f32.mrf.mxu3  ;;  %v1555_v63 = vadd.f32 %v1506_v39, %v477_v49  ;;  %v1561_v1 = vadd.f32 %v1506_v39, %v501_v50  ;;  %v1038_v27 = vsel %vm704_vm8, 1.0, %v1308_v32 }
  0xba   : > { %v1537_v54 = vadd.f32 %v1506_v39, %v522_v51  ;;  %v1540_v55 = vadd.f32 %v1506_v39, %v546_v52 }
  0xbc   : > { %v1173_v57 = vpack.c.bf16 %v1537_v54, %v1534_v53  ;;  %v1193_v59 = vpack.c.bf16 %v1540_v55, %v1545_v58 }
  0xbe   : > { %1232 = vst [vmem:[%s1525_s26 + $0x40] sm:$0xff] %v1173_v57  }
  0xbf   : > { %1236 = vst [vmem:[%s1525_s26 + $0x60] sm:$0xff] %v1193_v59  }
  0xc0   : > { %v480_v61 = vpop.f32.mrf.mxu0  ;;  %v504_v62 = vpop.f32.mrf.mxu1 }
  0xc1   : > { %v1558_v0 = vadd.f32 %v1506_v39, %v480_v61  ;;  %v1564_v2 = vadd.f32 %v1506_v39, %v504_v62  ;;  %v525_v3 = vpop.f32.mrf.mxu2  ;;  %v549_v4 = vpop.f32.mrf.mxu3  ;;  %v794_v61 = vmul.f32 %v1032_v35, %v1509_v20  ;;  %v676_v62 = vadd.s32 %v1566_v5, %v643_v36 }
  0xc2   : > { %v1586_v24 = vadd.f32 %v1506_v39, %v525_v3  ;;  %v1602_v34 = vadd.f32 %v1506_v39, %v549_v4  ;;  %v682_v3 = vadd.s32 %v1566_v5, %v649_v37  ;;  %v796_v4 = vmul.f32 %v1034_v38, %v1555_v63 }
  0xc3   : > { %v1138_v7 = vpack.c.bf16 %v1558_v0, %v1555_v63  ;;  %v1158_v8 = vpack.c.bf16 %v1564_v2, %v1561_v1  ;;  %v797_v11 = vmul.f32 %v1035_v45, %v1558_v0  ;;  %v864_v15 = vmul.f32 %v794_v61, %v1509_v20 }
  0xc4   : > { %v826_v16 = vadd.f32 %v795_v41, %v794_v61  ;;  %vm708_vm9 = vcmp.lt.s32.totalorder %v676_v62, 300  ;;  %vm714_vm10 = vcmp.lt.s32.totalorder %v682_v3, 300  ;;  %v646_v45 = vadd.s32 104, %v1551_v60 }
  0xc5   : > { %1225 = vst [vmem:[%s1525_s26 + $0x8] sm:$0xff] %v1138_v7   ;;  %v867_v20 = vmul.f32 %v797_v11, %v1558_v0 }
  0xc6   : > { %1229 = vst [vmem:[%s1525_s26 + $0x28] sm:$0xff] %v1158_v8   ;;  %v865_v8 = vmul.f32 %v795_v41, %v1512_v42  ;;  %v866_v42 = vmul.f32 %v796_v4, %v1555_v63  ;;  %v645_v41 = vadd.s32 96, %v1551_v60  ;;  %v679_v62 = vadd.s32 %v1566_v5, %v646_v45 }
  0xc8   : > { %v483_v17 = vpop.f32.mrf.mxu0  ;;  %v507_v18 = vpop.f32.mrf.mxu1  ;;  %vm711_vm14 = vcmp.lt.s32.totalorder %v679_v62, 300 }
  0xc9   : > { %v528_v21 = vpop.f32.mrf.mxu2  ;;  %v552_v22 = vpop.f32.mrf.mxu3  ;;  %v484_v50 = vadd.f32 %v1506_v39, %v483_v17  ;;  %v1620_v52 = vadd.f32 %v1506_v39, %v507_v18  ;;  %v644_v17 = vadd.s32 88, %v1551_v60  ;;  %v650_v18 = vadd.s32 136, %v1551_v60 }
  0xca   : > { %v1589_v25 = vadd.f32 %v1506_v39, %v528_v21  ;;  %v1594_v28 = vadd.f32 %v1506_v39, %v552_v22  ;;  %v896_v21 = vadd.f32 %v865_v8, %v864_v15  ;;  %v827_v22 = vadd.f32 %v826_v16, %v796_v4 }
  0xcb   : > { %v798_v23 = vmul.f32 %v1036_v12, %v484_v50  ;;  %v802_v4 = vmul.f32 %v1040_v9, %v1515_v43  ;;  %v1681_v8 = vadd.s32 %v1566_v5, %v650_v18  ;;  %v647_v9 = vadd.s32 112, %v1551_v60 }
  0xcc   : > { %v1178_v31 = vpack.c.bf16 %v1589_v25, %v1586_v24  ;;  %v1198_v40 = vpack.c.bf16 %v1594_v28, %v1602_v34  ;;  %v897_v0 = vadd.f32 %v896_v21, %v866_v42 }
  0xcd   : > { %v868_v47 = vmul.f32 %v798_v23, %v484_v50  ;;  %v680_v45 = vadd.s32 %v1566_v5, %v647_v9  ;;  %vm715_vm15 = vcmp.lt.s32.totalorder %v1681_v8, 300 }
  0xce   : > { %1233 = vst [vmem:[%s1525_s26 + $0x48] sm:$0xff] %v1178_v31   ;;  %v673_v31 = vadd.s32 %v1566_v5, %v640_v13 }
  0xcf   : > { %1237 = vst [vmem:[%s1525_s26 + $0x68] sm:$0xff] %v1198_v40   ;;  %v677_v40 = vadd.s32 %v1566_v5, %v644_v17  ;;  %vm712_vm0 = vcmp.lt.s32.totalorder %v680_v45, 300 }
  0xd0   : > { %v486_v46 = vpop.f32.mrf.mxu0  ;;  %v510_v49 = vpop.f32.mrf.mxu1  ;;  %vm705_vm11 = vcmp.lt.s32.totalorder %v673_v31, 300 }
  0xd1   : > { %v487_v51 = vadd.f32 %v1506_v39, %v486_v46  ;;  %v1623_v56 = vadd.f32 %v1506_v39, %v510_v49  ;;  %v531_v57 = vpop.f32.mrf.mxu2  ;;  %v555_v59 = vpop.f32.mrf.mxu3  ;;  %v828_v46 = vadd.f32 %v827_v22, %v797_v11  ;;  %vm709_vm12 = vcmp.lt.s32.totalorder %v677_v40, 300 }
  0xd2   : > { %v1654_v63 = vadd.f32 %v1506_v39, %v531_v57  ;;  %v1660_v14 = vadd.f32 %v1506_v39, %v555_v59  ;;  %v1042_v57 = vsel %vm708_vm9, 1.0, %v1308_v32  ;;  %v1676_v59 = vsel %vm714_vm10, 1.0, %v1308_v32 }
  0xd3   : > { %v1143_v6 = vpack.c.bf16 %v487_v51, %v484_v50  ;;  %v1163_v7 = vpack.c.bf16 %v1623_v56, %v1620_v52  ;;  %v799_v36 = vmul.f32 %v1037_v19, %v487_v51  ;;  %v829_v50 = vadd.f32 %v828_v46, %v798_v23 }
  0xd4   : > { %v678_v11 = vadd.s32 %v1566_v5, %v645_v41  ;;  %v1039_v15 = vsel %vm705_vm11, 1.0, %v1308_v32  ;;  %v803_v22 = vmul.f32 %v1637_v10, %v1518_v44  ;;  %v872_v46 = vmul.f32 %v802_v4, %v1515_v43 }
  0xd5   : > { %1226 = vst [vmem:[%s1525_s26 + $0x10] sm:$0xff] %v1143_v6   ;;  %v898_v6 = vadd.f32 %v897_v0, %v867_v20  ;;  %v830_v12 = vadd.f32 %v829_v50, %v799_v36  ;;  %v1045_v43 = vsel %vm711_vm14, 1.0, %v1308_v32 }
  0xd6   : > { %1230 = vst [vmem:[%s1525_s26 + $0x30] sm:$0xff] %v1163_v7   ;;  %v869_v7 = vmul.f32 %v799_v36, %v487_v51  ;;  %vm710_vm13 = vcmp.lt.s32.totalorder %v678_v11, 300  ;;  %v652_v36 = vadd.s32 152, %v1551_v60 }
  0xd7   : > { %v899_v3 = vadd.f32 %v898_v6, %v868_v47  ;;  %v1043_v47 = vsel %vm709_vm12, 1.0, %v1308_v32  ;;  %v1044_v50 = vsel %vm710_vm13, 1.0, %v1308_v32 }
  0xd8   : > { %v489_v26 = vpop.f32.mrf.mxu0  ;;  %v513_v29 = vpop.f32.mrf.mxu1  ;;  %v805_v40 = vmul.f32 %v1043_v47, %v1564_v2 }
  0xd9   : > { %v490_v30 = vadd.f32 %v1506_v39, %v489_v26  ;;  %v534_v33 = vpop.f32.mrf.mxu2  ;;  %v558_v35 = vpop.f32.mrf.mxu3  ;;  %v1690_v17 = vadd.f32 %v1506_v39, %v513_v29  ;;  %v900_v23 = vadd.f32 %v899_v3, %v869_v7  ;;  %v651_v26 = vadd.s32 144, %v1551_v60 }
  0xda   : > { %v1657_v37 = vadd.f32 %v1506_v39, %v534_v33  ;;  %v1663_v38 = vadd.f32 %v1506_v39, %v558_v35  ;;  %v804_v35 = vmul.f32 %v1042_v57, %v1561_v1 }
  0xdb   : > { %v800_v61 = vmul.f32 %v1038_v27, %v490_v30  ;;  %v648_v27 = vadd.s32 120, %v1551_v60 }
  0xdc   : > { %v1183_v48 = vpack.c.bf16 %v1657_v37, %v1654_v63  ;;  %v1203_v49 = vpack.c.bf16 %v1663_v38, %v1660_v14  ;;  %v874_v6 = vmul.f32 %v804_v35, %v1561_v1 }
  0xdd   : > { %v870_v42 = vmul.f32 %v800_v61, %v490_v30  ;;  %v831_v20 = vadd.f32 %v830_v12, %v800_v61  ;;  %v681_v61 = vadd.s32 %v1566_v5, %v648_v27  ;;  %v657_v27 = vadd.s32 192, %v1551_v60 }
  0xde   : > { %1234 = vst [vmem:[%s1525_s26 + $0x50] sm:$0xff] %v1183_v48   ;;  %v684_v48 = vadd.s32 %v1566_v5, %v651_v26 }
  0xdf   : > { %1238 = vst [vmem:[%s1525_s26 + $0x70] sm:$0xff] %v1203_v49   ;;  %v901_v0 = vadd.f32 %v900_v23, %v870_v42  ;;  %vm713_vm1 = vcmp.lt.s32.totalorder %v681_v61, 300  ;;  %v1046_v42 = vsel %vm712_vm0, 1.0, %v1308_v32  ;;  %v690_v8 = vadd.s32 %v1566_v5, %v657_v27 }
  0xe0   : > { %v492_v13 = vpop.f32.mrf.mxu0  ;;  %v516_v16 = vpop.f32.mrf.mxu1  ;;  %vm716_vm2 = vcmp.lt.s32.totalorder %v684_v48, 300 }
  0xe1   : > { %v493_v51 = vadd.f32 %v1506_v39, %v492_v13  ;;  %v1693_v18 = vadd.f32 %v1506_v39, %v516_v16  ;;  %v537_v19 = vpop.f32.mrf.mxu2  ;;  %v561_v21 = vpop.f32.mrf.mxu3  ;;  %v1050_v47 = vsel %vm716_vm2, 1.0, %v1308_v32  ;;  %vm722_vm6 = vcmp.lt.s32.totalorder %v690_v8, 300 }
  0xe2   : > { %v1721_v13 = vadd.f32 %v1506_v39, %v537_v19  ;;  %v1727_v11 = vadd.f32 %v1506_v39, %v561_v21 }
  0xe3   : > { %v1148_v31 = vpack.c.bf16 %v493_v51, %v490_v30  ;;  %v801_v33 = vmul.f32 %v1039_v15, %v493_v51  ;;  %v1168_v29 = vpack.c.bf16 %v1693_v18, %v1690_v17  ;;  %v873_v30 = vmul.f32 %v803_v22, %v1518_v44 }
  0xe4   : > { %v685_v44 = vadd.s32 %v1566_v5, %v652_v36  ;;  %v806_v15 = vmul.f32 %v1044_v50, %v1620_v52 }
  0xe5   : > { %1227 = vst [vmem:[%s1525_s26 + $0x18] sm:$0xff] %v1148_v31   ;;  %v832_v10 = vadd.f32 %v831_v20, %v801_v33  ;;  %v871_v41 = vmul.f32 %v801_v33, %v493_v51  ;;  %v653_v51 = vadd.s32 160, %v1551_v60  ;;  %v1047_v20 = vsel %vm713_vm1, 1.0, %v1308_v32 }
  0xe6   : > { %1231 = vst [vmem:[%s1525_s26 + $0x38] sm:$0xff] %v1168_v29   ;;  %v654_v31 = vadd.s32 168, %v1551_v60  ;;  %v876_v33 = vmul.f32 %v806_v15, %v1620_v52  ;;  %v808_v29 = vmul.f32 %v1046_v42, %v1690_v17  ;;  %vm717_vm3 = vcmp.lt.s32.totalorder %v685_v44, 300 }
  0xe7   : > { %v833_v49 = vadd.f32 %v832_v10, %v802_v4  ;;  %v902_v57 = vadd.f32 %v901_v0, %v871_v41  ;;  %v686_v0 = vadd.s32 %v1566_v5, %v653_v51  ;;  %v655_v10 = vadd.s32 176, %v1551_v60 }
  0xe8   : > { %v809_v52 = vmul.f32 %v1047_v20, %v1693_v18  ;;  %v878_v61 = vmul.f32 %v808_v29, %v1690_v17  ;;  %v812_v17 = vmul.f32 %v1050_v47, %v1586_v24  ;;  %v1056_v20 = vsel %vm722_vm6, 1.0, %v1308_v32 }
  0xe9   : > { %v834_v7 = vadd.f32 %v833_v49, %v803_v22  ;;  %v903_v3 = vadd.f32 %v902_v57, %v872_v46  ;;  %v540_v12 = vpop.f32.mrf.mxu2  ;;  %v564_v4 = vpop.f32.mrf.mxu3  ;;  %v807_v22 = vmul.f32 %v1045_v43, %v1623_v56  ;;  %v687_v49 = vadd.s32 %v1566_v5, %v654_v31 }
  0xea   : > { %v1724_v1 = vadd.f32 %v1506_v39, %v540_v12  ;;  %v1730_v62 = vadd.f32 %v1506_v39, %v564_v4  ;;  %v875_v39 = vmul.f32 %v805_v40, %v1564_v2  ;;  %v1049_v2 = vsel %vm715_vm15, 1.0, %v1308_v32 }
  0xeb   : > { %v835_v9 = vadd.f32 %v834_v7, %v804_v35  ;;  %v904_v16 = vadd.f32 %v903_v3, %v873_v30  ;;  %v877_v41 = vmul.f32 %v807_v22, %v1623_v56  ;;  %v810_v30 = vmul.f32 %v1676_v59, %v1534_v53 }
  0xec   : > { %v1188_v19 = vpack.c.bf16 %v1724_v1, %v1721_v13  ;;  %v1208_v21 = vpack.c.bf16 %v1730_v62, %v1727_v11  ;;  %v656_v56 = vadd.s32 184, %v1551_v60  ;;  %v811_v50 = vmul.f32 %v1049_v2, %v1537_v54 }
  0xed   : > { %v905_v23 = vadd.f32 %v904_v16, %v874_v6  ;;  %v836_v26 = vadd.f32 %v835_v9, %v805_v40  ;;  %v1051_v43 = vsel %vm717_vm3, 1.0, %v1308_v32  ;;  %v658_v59 = vadd.s32 200, %v1551_v60 }
  0xee   : > { %1235 = vst [vmem:[%s1525_s26 + $0x58] sm:$0xff] %v1188_v19   ;;  %vm718_vm4 = vcmp.lt.s32.totalorder %v686_v0, 300  ;;  %v879_v7 = vmul.f32 %v809_v52, %v1693_v18  ;;  %v688_v3 = vadd.s32 %v1566_v5, %v655_v10  ;;  %v880_v12 = vmul.f32 %v810_v30, %v1534_v53 }
  0xef   : > { %v837_v35 = vadd.f32 %v836_v26, %v806_v15  ;;  %v906_v36 = vadd.f32 %v905_v23, %v875_v39  ;;  %1239 = vst [vmem:[%s1525_s26 + $0x78] sm:$0xff] %v1208_v21   ;;  %v659_v4 = vadd.s32 208, %v1551_v60  ;;  %vm719_vm5 = vcmp.lt.s32.totalorder %v687_v49, 300 }
  0xf0   : > { %v689_v9 = vadd.s32 %v1566_v5, %v656_v56  ;;  %v881_v16 = vmul.f32 %v811_v50, %v1537_v54  ;;  %v813_v42 = vmul.f32 %v1051_v43, %v1589_v25  ;;  %v691_v18 = vadd.s32 %v1566_v5, %v658_v59 }
  0xf1   : > { %v838_v45 = vadd.f32 %v837_v35, %v807_v22  ;;  %v907_v46 = vadd.f32 %v906_v36, %v876_v33  ;;  %v1052_v51 = vsel %vm718_vm4, 1.0, %v1308_v32  ;;  %v1053_v21 = vsel %vm719_vm5, 1.0, %v1308_v32 }
  0xf2   : > { %vm720_vm7 = vcmp.lt.s32.totalorder %v688_v3, 300  ;;  %v882_v39 = vmul.f32 %v812_v17, %v1586_v24  ;;  %v692_v22 = vadd.s32 %v1566_v5, %v659_v4  ;;  %v660_v23 = vadd.s32 216, %v1551_v60 }
  0xf3   : > { %v839_v57 = vadd.f32 %v838_v45, %v808_v29  ;;  %v908_v6 = vadd.f32 %v907_v46, %v877_v41  ;;  %v814_v54 = vmul.f32 %v1052_v51, %v1654_v63  ;;  %vm721_vm8 = vcmp.lt.s32.totalorder %v689_v9, 300 }
  0xf4   : > { %v815_v31 = vmul.f32 %v1053_v21, %v1657_v37  ;;  %v1054_v33 = vsel %vm720_vm7, 1.0, %v1308_v32  ;;  %v661_v29 = vadd.s32 224, %v1551_v60  ;;  %v883_v24 = vmul.f32 %v813_v42, %v1589_v25 }
  0xf5   : > { %v909_v48 = vadd.f32 %v908_v6, %v878_v61  ;;  %v840_v40 = vadd.f32 %v839_v57, %v809_v52  ;;  %vm723_vm9 = vcmp.lt.s32.totalorder %v691_v18, 300  ;;  %vm724_vm10 = vcmp.lt.s32.totalorder %v692_v22, 300 }
  0xf6   : > { %v693_v2 = vadd.s32 %v1566_v5, %v660_v23  ;;  %v1055_v0 = vsel %vm721_vm8, 1.0, %v1308_v32  ;;  %v662_v10 = vadd.s32 232, %v1551_v60  ;;  %v884_v41 = vmul.f32 %v814_v54, %v1654_v63 }
  0xf7   : > { %v841_v15 = vadd.f32 %v840_v40, %v810_v30  ;;  %v910_v44 = vadd.f32 %v909_v48, %v879_v7  ;;  %v816_v52 = vmul.f32 %v1054_v33, %v1721_v13  ;;  %v1057_v30 = vsel %vm723_vm9, 1.0, %v1308_v32 }
  0xf8   : > { %v885_v25 = vmul.f32 %v815_v31, %v1657_v37  ;;  %v694_v47 = vadd.s32 %v1566_v5, %v661_v29  ;;  %v817_v57 = vmul.f32 %v1055_v0, %v1724_v1  ;;  %v663_v61 = vadd.s32 240, %v1551_v60 }
  0xf9   : > { %v842_v53 = vadd.f32 %v841_v15, %v811_v50  ;;  %v911_v19 = vadd.f32 %v910_v44, %v880_v12  ;;  %v818_v6 = vmul.f32 %v1056_v20, %v1545_v58  ;;  %v1058_v63 = vsel %vm724_vm10, 1.0, %v1308_v32 }
  0xfa   : > { %vm725_vm11 = vcmp.lt.s32.totalorder %v693_v2, 300  ;;  %v695_v56 = vadd.s32 %v1566_v5, %v662_v10  ;;  %v886_v37 = vmul.f32 %v816_v52, %v1721_v13  ;;  %v664_v59 = vadd.s32 248, %v1551_v60 }
  0xfb   : > { %v912_v26 = vadd.f32 %v911_v19, %v881_v16  ;;  %v843_v27 = vadd.f32 %v842_v53, %v812_v17  ;;  %v819_v48 = vmul.f32 %v1057_v30, %v1540_v55  ;;  %vm726_vm12 = vcmp.lt.s32.totalorder %v694_v47, 300 }
  0xfc   : > { %v887_v3 = vmul.f32 %v817_v57, %v1724_v1  ;;  %v696_v12 = vadd.s32 %v1566_v5, %v663_v61  ;;  %v888_v17 = vmul.f32 %v818_v6, %v1545_v58  ;;  %v820_v4 = vmul.f32 %v1058_v63, %v1602_v34 }
  0xfd   : > { %v844_v35 = vadd.f32 %v843_v27, %v813_v42  ;;  %v913_v36 = vadd.f32 %v912_v26, %v882_v39  ;;  %v1059_v15 = vsel %vm725_vm11, 1.0, %v1308_v32  ;;  %vm727_vm13 = vcmp.lt.s32.totalorder %v695_v56, 300 }
  0xfe   : > { %v697_v60 = vadd.s32 %v1566_v5, %v664_v59  ;;  %v889_v13 = vmul.f32 %v819_v48, %v1540_v55  ;;  %v1060_v16 = vsel %vm726_vm12, 1.0, %v1308_v32  ;;  %v821_v42 = vmul.f32 %v1059_v15, %v1594_v28 }
  0xff   : > { %v845_v45 = vadd.f32 %v844_v35, %v814_v54  ;;  %v914_v46 = vadd.f32 %v913_v36, %v883_v24  ;;  %vm728_vm14 = vcmp.lt.s32.totalorder %v696_v12, 300  ;;  %v890_v58 = vmul.f32 %v820_v4, %v1602_v34 }
 0x100   : > { %v1061_v51 = vsel %vm727_vm13, 1.0, %v1308_v32  ;;  %v822_v53 = vmul.f32 %v1060_v16, %v1660_v14  ;;  %vm729_vm15 = vcmp.lt.s32.totalorder %v697_v60, 300  ;;  %v1062_v5 = vsel %vm728_vm14, 1.0, %v1308_v32 }
 0x101   : > { %v846_v8 = vadd.f32 %v845_v45, %v815_v31  ;;  %v915_v49 = vadd.f32 %v914_v46, %v884_v41  ;;  %v891_v55 = vmul.f32 %v821_v42, %v1594_v28  ;;  %v823_v39 = vmul.f32 %v1061_v51, %v1663_v38 }
 0x102   : > { %v1063_v54 = vsel %vm729_vm15, 1.0, %v1308_v32  ;;  %v892_v34 = vmul.f32 %v822_v53, %v1660_v14  ;;  %v824_v20 = vmul.f32 %v1062_v5, %v1727_v11 }
 0x103   : > { %v916_v50 = vadd.f32 %v915_v49, %v885_v25  ;;  %v847_v43 = vadd.f32 %v846_v8, %v816_v52  ;;  %v893_v33 = vmul.f32 %v823_v39, %v1663_v38  ;;  %v825_v28 = vmul.f32 %v1063_v54, %v1730_v62 }
 0x104   : > { %v894_v36 = vmul.f32 %v824_v20, %v1727_v11 }
 0x105   : > { %v917_v40 = vadd.f32 %v916_v50, %v886_v37  ;;  %v848_v7 = vadd.f32 %v847_v43, %v817_v57  ;;  %v895_v14 = vmul.f32 %v825_v28, %v1730_v62 }
 0x107   : > { %v849_v44 = vadd.f32 %v848_v7, %v818_v6  ;;  %v918_v9 = vadd.f32 %v917_v40, %v887_v3 }
 0x109   : > { %v850_v1 = vadd.f32 %v849_v44, %v819_v48  ;;  %v919_v18 = vadd.f32 %v918_v9, %v888_v17 }
 0x10b   : > { %v920_v19 = vadd.f32 %v919_v18, %v889_v13  ;;  %v851_v21 = vadd.f32 %v850_v1, %v820_v4 }
 0x10d   : > { %v852_v22 = vadd.f32 %v851_v21, %v821_v42  ;;  %v921_v23 = vadd.f32 %v920_v19, %v890_v58 }
 0x10f   : > { %v853_v26 = vadd.f32 %v852_v22, %v822_v53  ;;  %v922_v27 = vadd.f32 %v921_v23, %v891_v55 }
 0x111   : > { %v854_v31 = vadd.f32 %v853_v26, %v823_v39  ;;  %v923_v29 = vadd.f32 %v922_v27, %v892_v34 }
 0x113   : > { %v924_v24 = vadd.f32 %v923_v29, %v893_v33  ;;  %v855_v35 = vadd.f32 %v854_v31, %v824_v20 }
 0x115   : > { %v925_v2 = vadd.f32 %v924_v24, %v894_v36  ;;  %v856_v32 = vadd.f32 %v855_v35, %v825_v28 }
 0x117   : > { %v857_v0 = vrot.slane %v856_v32, 4  ;;  %v926_v10 = vadd.f32 %v925_v2, %v895_v14 }
 0x119   : > { %v858_v41 = vadd.f32 %v857_v0, %v856_v32  ;;  %v927_v45 = vrot.slane %v926_v10, 4 }
 0x11b   : > { %v859_v46 = vrot.slane %v858_v41, 2  ;;  %v928_v52 = vadd.f32 %v927_v45, %v926_v10 }
 0x11d   : > { %v860_v38 = vadd.f32 %v859_v46, %v858_v41  ;;  %v929_v30 = vrot.slane %v928_v52, 2 }
 0x11f   : > { %v861_v25 = vrot.slane %v860_v38, 1  ;;  %v930_v47 = vadd.f32 %v929_v30, %v928_v52 }
 0x121   : > { %v862_v11 = vadd.f32 %v861_v25, %v860_v38  ;;  %v931_v8 = vrot.slane %v930_v47, 1 }
 0x123   : > { %863 = vst [vmem:[%s265_s30] sm:$0x1] %v862_v11  ;;  %v932_v62 = vadd.f32 %v931_v8, %v930_v47 }
 0x125   : > { %933 = vst [vmem:[%s265_s30 + $0x1] sm:$0x1] %v932_v62 }
 0x126 PF: > { %s17_s21 = sadd.s32 1, %s1306_s21  }
 0x127   : > { %p14_p5 = scmp.ge.s32.totalorder %s17_s21, 4  }
 0x129   :  { %16 = sbr.rel (!%p14_p5) target bundleno = 1 (0x1), region = 82 }

// kernel: gin_layer.5
= control target key start
LH: loop header
LB: loop body
LE: loop exit
PB: predicated region body
PF: predicated region fallthrough
CT: control target
= control target key end

     0   :  { %s690_s15 = smov 0   ;;  %s878_s0 = inlined_call_operand.vmem [shape: bf16[512,128], index: 0, kind: input, shape index: {}]   ;;  %s879_s1 = inlined_call_operand.vmem [shape: f32[1,128], index: 1, kind: input, shape index: {}]   ;;  %s880_s2 = inlined_call_operand.vmem [shape: f32[1,128], index: 2, kind: input, shape index: {}]   ;;  %s881_s3 = inlined_call_operand.vmem [shape: f32[512,128], index: 3, kind: input, shape index: {}]   ;;  %s882_s4 = inlined_call_operand.vmem [shape: f32[512,128], index: 4, kind: output, shape index: {}]  }
   0x1 LB: > { %s555_s16 = sadd.s32 4294967295, %s663_s15   ;;  %p559_p0 = scmp.ge.s32.totalorder %s663_s15, 1  ;;  %s663_s15 = sphi %s690_s15, %s14_s15  }
   0x2   : > { %p174_p1 = scmp.lt.s32.totalorder %s663_s15, 3 }
   0x4   : > { %p175_p2 = pnand %p559_p0, %p174_p1 }
   0x5   : > { %s560_s17 = sshll.u32 (!%p175_p2), %s555_s16, 5 }
   0x6   : > { %178 = sbr.rel (%p175_p2) target bundleno = 62 (0x3e), region = 36  ;;  %p206_p3 = scmp.lt.s32.totalorder (!%p175_p2), %s560_s17, 63 }
   0xb   : > { %s884_s17 = smov (!%p206_p3, %s560_s17), 63  ;;  %v709_v0 = vld [vmem:[%s879_s1] ss:$0 sm:$0xff] }
   0xc   : > { %s561_s18 = sshll.u32 %s884_s17, 2  ;;  %s563_s24 = sshll.u32 %s884_s17, 3  ;;  %v716_v3 = vld [vmem:[%s880_s2] ss:$0 sm:$0xff] }
   0xd   : > { %s704_s21 = scalar_lea.vmem %s878_s0, %s561_s18  ;;  %s725_s29 = scalar_lea.vmem %s881_s3, %s563_s24 }
   0xe   : > { %v569_v1 = vld [vmem:[%s704_s21] sm:$0xff]   ;;  %v632_v5 = vld [vmem:[%s704_s21 + $0x8] sm:$0xff]   ;;  %v633_v8 = vld [vmem:[%s704_s21 + $0x10] sm:$0xff]   ;;  %s751_s6 = scalar_lea.vmem %s882_s4, %s563_s24 }
   0xf   : > { %v570_v2 = vunpack.c.l.bf16 %v569_v1  ;;  %v571_v4 = vunpack.c.h.bf16 %v569_v1  ;;  %v574_v6 = vunpack.c.l.bf16 %v632_v5  ;;  %v575_v7 = vunpack.c.h.bf16 %v632_v5  ;;  %v634_v13 = vld [vmem:[%s704_s21 + $0x18] sm:$0xff]   ;;  %v391_v22 = vld [vmem:[%s725_s29] sm:$0xff]  ;;  %v392_v23 = vld [vmem:[%s725_s29 + $0x8] sm:$0xff] }
  0x10   : > { %v578_v11 = vunpack.c.l.bf16 %v633_v8  ;;  %v579_v12 = vunpack.c.h.bf16 %v633_v8  ;;  %v582_v16 = vunpack.c.l.bf16 %v634_v13  ;;  %v583_v17 = vunpack.c.h.bf16 %v634_v13  ;;  %v393_v30 = vld [vmem:[%s725_s29 + $0x10] sm:$0xff]  ;;  %v394_v31 = vld [vmem:[%s725_s29 + $0x18] sm:$0xff]  ;;  %v395_v36 = vld [vmem:[%s725_s29 + $0x20] sm:$0xff] }
  0x11   : > { %v291_v9 = vmul.f32 %v709_v0, %v570_v2  ;;  %v292_v10 = vmul.f32 %v709_v0, %v571_v4  ;;  %v293_v14 = vmul.f32 %v709_v0, %v574_v6  ;;  %v294_v15 = vmul.f32 %v709_v0, %v575_v7  ;;  %v396_v37 = vld [vmem:[%s725_s29 + $0x28] sm:$0xff]  ;;  %v635_v40 = vld [vmem:[%s704_s21 + $0x20] sm:$0xff]   ;;  %v397_v45 = vld [vmem:[%s725_s29 + $0x30] sm:$0xff] }
  0x12   : > { %v295_v20 = vmul.f32 %v709_v0, %v578_v11  ;;  %v296_v21 = vmul.f32 %v709_v0, %v579_v12  ;;  %v297_v26 = vmul.f32 %v709_v0, %v582_v16  ;;  %v298_v27 = vmul.f32 %v709_v0, %v583_v17  ;;  %v398_v46 = vld [vmem:[%s725_s29 + $0x38] sm:$0xff]  ;;  %v636_v47 = vld [vmem:[%s704_s21 + $0x28] sm:$0xff]   ;;  %v637_v52 = vld [vmem:[%s704_s21 + $0x30] sm:$0xff]  }
  0x13   : > { %v327_v18 = vadd.f32 %v716_v3, %v291_v9  ;;  %v328_v19 = vadd.f32 %v716_v3, %v292_v10  ;;  %v329_v24 = vadd.f32 %v716_v3, %v293_v14  ;;  %v330_v25 = vadd.f32 %v716_v3, %v294_v15  ;;  %v638_v57 = vld [vmem:[%s704_s21 + $0x38] sm:$0xff]   ;;  %v399_v12 = vld [vmem:[%s725_s29 + $0x40] sm:$0xff]  ;;  %v400_v13 = vld [vmem:[%s725_s29 + $0x48] sm:$0xff] }
  0x14   : > { %v331_v32 = vadd.f32 %v716_v3, %v295_v20  ;;  %v332_v33 = vadd.f32 %v716_v3, %v296_v21  ;;  %v333_v38 = vadd.f32 %v716_v3, %v297_v26  ;;  %v334_v39 = vadd.f32 %v716_v3, %v298_v27  ;;  %v401_v20 = vld [vmem:[%s725_s29 + $0x50] sm:$0xff]  ;;  %v402_v21 = vld [vmem:[%s725_s29 + $0x58] sm:$0xff]  ;;  %v403_v26 = vld [vmem:[%s725_s29 + $0x60] sm:$0xff] }
  0x15   : > { %v359_v28 = vmax.f32 %v327_v18, 0.0  ;;  %v360_v29 = vmax.f32 %v328_v19, 0.0  ;;  %v361_v34 = vmax.f32 %v329_v24, 0.0  ;;  %v362_v35 = vmax.f32 %v330_v25, 0.0  ;;  %v404_v27 = vld [vmem:[%s725_s29 + $0x68] sm:$0xff] }
  0x16   : > { %v363_v43 = vmax.f32 %v331_v32, 0.0  ;;  %v364_v44 = vmax.f32 %v332_v33, 0.0  ;;  %v365_v50 = vmax.f32 %v333_v38, 0.0  ;;  %v366_v51 = vmax.f32 %v334_v39, 0.0 }
  0x17   : > { %v423_v41 = vadd.f32 %v391_v22, %v359_v28  ;;  %v424_v42 = vadd.f32 %v392_v23, %v360_v29  ;;  %v425_v48 = vadd.f32 %v393_v30, %v361_v34  ;;  %v426_v49 = vadd.f32 %v394_v31, %v362_v35  ;;  %v639_v30 = vld [vmem:[%s704_s21 + $0x40] sm:$0xff]   ;;  %v405_v35 = vld [vmem:[%s725_s29 + $0x70] sm:$0xff] }
  0x18   : > { %v427_v53 = vadd.f32 %v395_v36, %v363_v43  ;;  %v428_v54 = vadd.f32 %v396_v37, %v364_v44  ;;  %v586_v55 = vunpack.c.l.bf16 %v635_v40  ;;  %v587_v56 = vunpack.c.h.bf16 %v635_v40  ;;  %v406_v36 = vld [vmem:[%s725_s29 + $0x78] sm:$0xff]  ;;  %v640_v37 = vld [vmem:[%s704_s21 + $0x48] sm:$0xff]  }
  0x19   : > { %455 = vst [vmem:[%s751_s6] sm:$0xff] %v423_v41  ;;  %v429_v58 = vadd.f32 %v397_v45, %v365_v50  ;;  %v430_v59 = vadd.f32 %v398_v46, %v366_v51  ;;  %v590_v60 = vunpack.c.l.bf16 %v636_v47  ;;  %v591_v61 = vunpack.c.h.bf16 %v636_v47  ;;  %v642_v47 = vld [vmem:[%s704_s21 + $0x58] sm:$0xff]  }
  0x1a   : > { %456 = vst [vmem:[%s751_s6 + $0x8] sm:$0xff] %v424_v42  ;;  %v299_v62 = vmul.f32 %v709_v0, %v586_v55  ;;  %v300_v63 = vmul.f32 %v709_v0, %v587_v56  ;;  %v594_v1 = vunpack.c.l.bf16 %v637_v52  ;;  %v595_v2 = vunpack.c.h.bf16 %v637_v52  ;;  %v641_v42 = vld [vmem:[%s704_s21 + $0x50] sm:$0xff]  }
  0x1b   : > { %457 = vst [vmem:[%s751_s6 + $0x10] sm:$0xff] %v425_v48  ;;  %v301_v4 = vmul.f32 %v709_v0, %v590_v60  ;;  %v302_v5 = vmul.f32 %v709_v0, %v591_v61  ;;  %v598_v6 = vunpack.c.l.bf16 %v638_v57  ;;  %v599_v7 = vunpack.c.h.bf16 %v638_v57 }
  0x1c   : > { %458 = vst [vmem:[%s751_s6 + $0x18] sm:$0xff] %v426_v49  ;;  %v335_v8 = vadd.f32 %v716_v3, %v299_v62  ;;  %v336_v9 = vadd.f32 %v716_v3, %v300_v63  ;;  %v303_v10 = vmul.f32 %v709_v0, %v594_v1  ;;  %v304_v11 = vmul.f32 %v709_v0, %v595_v2  ;;  %v407_v1 = vld [vmem:[%s725_s29 + $0x80] sm:$0xff]  ;;  %v408_v2 = vld [vmem:[%s725_s29 + $0x88] sm:$0xff] }
  0x1d   : > { %459 = vst [vmem:[%s751_s6 + $0x20] sm:$0xff] %v427_v53  ;;  %v337_v14 = vadd.f32 %v716_v3, %v301_v4  ;;  %v338_v15 = vadd.f32 %v716_v3, %v302_v5  ;;  %v305_v16 = vmul.f32 %v709_v0, %v598_v6  ;;  %v306_v17 = vmul.f32 %v709_v0, %v599_v7 }
  0x1e   : > { %460 = vst [vmem:[%s751_s6 + $0x28] sm:$0xff] %v428_v54  ;;  %v367_v18 = vmax.f32 %v335_v8, 0.0  ;;  %v368_v19 = vmax.f32 %v336_v9, 0.0  ;;  %v339_v22 = vadd.f32 %v716_v3, %v303_v10  ;;  %v340_v23 = vadd.f32 %v716_v3, %v304_v11  ;;  %v409_v10 = vld [vmem:[%s725_s29 + $0x90] sm:$0xff]  ;;  %v410_v11 = vld [vmem:[%s725_s29 + $0x98] sm:$0xff] }
  0x1f   : > { %461 = vst [vmem:[%s751_s6 + $0x30] sm:$0xff] %v429_v58  ;;  %v369_v24 = vmax.f32 %v337_v14, 0.0  ;;  %v370_v25 = vmax.f32 %v338_v15, 0.0  ;;  %v341_v28 = vadd.f32 %v716_v3, %v305_v16  ;;  %v342_v29 = vadd.f32 %v716_v3, %v306_v17  ;;  %v411_v16 = vld [vmem:[%s725_s29 + $0xa0] sm:$0xff]  ;;  %v412_v17 = vld [vmem:[%s725_s29 + $0xa8] sm:$0xff] }
  0x20   : > { %462 = vst [vmem:[%s751_s6 + $0x38] sm:$0xff] %v430_v59  ;;  %v431_v31 = vadd.f32 %v399_v12, %v367_v18  ;;  %v432_v32 = vadd.f32 %v400_v13, %v368_v19  ;;  %v371_v33 = vmax.f32 %v339_v22, 0.0  ;;  %v372_v34 = vmax.f32 %v340_v23, 0.0 }
  0x21   : > { %v433_v38 = vadd.f32 %v401_v20, %v369_v24  ;;  %v434_v39 = vadd.f32 %v402_v21, %v370_v25  ;;  %v373_v40 = vmax.f32 %v341_v28, 0.0  ;;  %v374_v41 = vmax.f32 %v342_v29, 0.0  ;;  %v643_v20 = vld [vmem:[%s704_s21 + $0x60] sm:$0xff]   ;;  %v413_v25 = vld [vmem:[%s725_s29 + $0xb0] sm:$0xff] }
  0x22   : > { %463 = vst [vmem:[%s751_s6 + $0x40] sm:$0xff] %v431_v31  ;;  %v435_v43 = vadd.f32 %v403_v26, %v371_v33  ;;  %v436_v44 = vadd.f32 %v404_v27, %v372_v34  ;;  %v602_v45 = vunpack.c.l.bf16 %v639_v30  ;;  %v603_v46 = vunpack.c.h.bf16 %v639_v30  ;;  %v414_v26 = vld [vmem:[%s725_s29 + $0xb8] sm:$0xff]  ;;  %v644_v27 = vld [vmem:[%s704_s21 + $0x68] sm:$0xff]  }
  0x23   : > { %464 = vst [vmem:[%s751_s6 + $0x48] sm:$0xff] %v432_v32  ;;  %v437_v48 = vadd.f32 %v405_v35, %v373_v40  ;;  %v438_v49 = vadd.f32 %v406_v36, %v374_v41  ;;  %v606_v50 = vunpack.c.l.bf16 %v640_v37  ;;  %v607_v51 = vunpack.c.h.bf16 %v640_v37  ;;  %v645_v32 = vld [vmem:[%s704_s21 + $0x70] sm:$0xff]   ;;  %v646_v37 = vld [vmem:[%s704_s21 + $0x78] sm:$0xff]  }
  0x24   : > { %465 = vst [vmem:[%s751_s6 + $0x50] sm:$0xff] %v433_v38  ;;  %v307_v52 = vmul.f32 %v709_v0, %v602_v45  ;;  %v308_v53 = vmul.f32 %v709_v0, %v603_v46  ;;  %v610_v54 = vunpack.c.l.bf16 %v641_v42  ;;  %v611_v55 = vunpack.c.h.bf16 %v641_v42 }
  0x25   : > { %466 = vst [vmem:[%s751_s6 + $0x58] sm:$0xff] %v434_v39  ;;  %v309_v56 = vmul.f32 %v709_v0, %v606_v50  ;;  %v310_v57 = vmul.f32 %v709_v0, %v607_v51  ;;  %v614_v58 = vunpack.c.l.bf16 %v642_v47  ;;  %v615_v59 = vunpack.c.h.bf16 %v642_v47 }
  0x26   : > { %467 = vst [vmem:[%s751_s6 + $0x60] sm:$0xff] %v435_v43  ;;  %v343_v60 = vadd.f32 %v716_v3, %v307_v52  ;;  %v344_v61 = vadd.f32 %v716_v3, %v308_v53  ;;  %v311_v62 = vmul.f32 %v709_v0, %v610_v54  ;;  %v312_v63 = vmul.f32 %v709_v0, %v611_v55  ;;  %v415_v54 = vld [vmem:[%s725_s29 + $0xc0] sm:$0xff]  ;;  %v416_v55 = vld [vmem:[%s725_s29 + $0xc8] sm:$0xff] }
  0x27   : > { %468 = vst [vmem:[%s751_s6 + $0x68] sm:$0xff] %v436_v44  ;;  %v345_v4 = vadd.f32 %v716_v3, %v309_v56  ;;  %v346_v5 = vadd.f32 %v716_v3, %v310_v57  ;;  %v313_v6 = vmul.f32 %v709_v0, %v614_v58  ;;  %v314_v7 = vmul.f32 %v709_v0, %v615_v59 }
  0x28   : > { %469 = vst [vmem:[%s751_s6 + $0x70] sm:$0xff] %v437_v48  ;;  %v375_v8 = vmax.f32 %v343_v60, 0.0  ;;  %v376_v9 = vmax.f32 %v344_v61, 0.0  ;;  %v347_v12 = vadd.f32 %v716_v3, %v311_v62  ;;  %v348_v13 = vadd.f32 %v716_v3, %v312_v63  ;;  %v417_v62 = vld [vmem:[%s725_s29 + $0xd0] sm:$0xff]  ;;  %v418_v63 = vld [vmem:[%s725_s29 + $0xd8] sm:$0xff] }
  0x29   : > { %470 = vst [vmem:[%s751_s6 + $0x78] sm:$0xff] %v438_v49  ;;  %v377_v14 = vmax.f32 %v345_v4, 0.0  ;;  %v378_v15 = vmax.f32 %v346_v5, 0.0  ;;  %v349_v18 = vadd.f32 %v716_v3, %v313_v6  ;;  %v350_v19 = vadd.f32 %v716_v3, %v314_v7  ;;  %v419_v6 = vld [vmem:[%s725_s29 + $0xe0] sm:$0xff] }
  0x2a   : > { %v439_v21 = vadd.f32 %v407_v1, %v375_v8  ;;  %v440_v22 = vadd.f32 %v408_v2, %v376_v9  ;;  %v379_v23 = vmax.f32 %v347_v12, 0.0  ;;  %v380_v24 = vmax.f32 %v348_v13, 0.0  ;;  %v420_v12 = vld [vmem:[%s725_s29 + $0xe8] sm:$0xff] }
  0x2b   : > { %v441_v28 = vadd.f32 %v409_v10, %v377_v14  ;;  %v442_v29 = vadd.f32 %v410_v11, %v378_v15  ;;  %v381_v30 = vmax.f32 %v349_v18, 0.0  ;;  %v382_v31 = vmax.f32 %v350_v19, 0.0  ;;  %v422_v19 = vld [vmem:[%s725_s29 + $0xf8] sm:$0xff] }
  0x2c   : > { %471 = vst [vmem:[%s751_s6 + $0x80] sm:$0xff] %v439_v21  ;;  %v443_v33 = vadd.f32 %v411_v16, %v379_v23  ;;  %v444_v34 = vadd.f32 %v412_v17, %v380_v24  ;;  %v618_v35 = vunpack.c.l.bf16 %v643_v20  ;;  %v619_v36 = vunpack.c.h.bf16 %v643_v20  ;;  %v421_v16 = vld [vmem:[%s725_s29 + $0xf0] sm:$0xff] }
  0x2d   : > { %472 = vst [vmem:[%s751_s6 + $0x88] sm:$0xff] %v440_v22  ;;  %v445_v38 = vadd.f32 %v413_v25, %v381_v30  ;;  %v446_v39 = vadd.f32 %v414_v26, %v382_v31  ;;  %v622_v40 = vunpack.c.l.bf16 %v644_v27  ;;  %v623_v41 = vunpack.c.h.bf16 %v644_v27 }
  0x2e   : > { %473 = vst [vmem:[%s751_s6 + $0x90] sm:$0xff] %v441_v28  ;;  %v315_v42 = vmul.f32 %v709_v0, %v618_v35  ;;  %v316_v43 = vmul.f32 %v709_v0, %v619_v36  ;;  %v626_v44 = vunpack.c.l.bf16 %v645_v32  ;;  %v627_v45 = vunpack.c.h.bf16 %v645_v32 }
  0x2f   : > { %474 = vst [vmem:[%s751_s6 + $0x98] sm:$0xff] %v442_v29  ;;  %v317_v46 = vmul.f32 %v709_v0, %v622_v40  ;;  %v318_v47 = vmul.f32 %v709_v0, %v623_v41  ;;  %v630_v48 = vunpack.c.l.bf16 %v646_v37  ;;  %v631_v49 = vunpack.c.h.bf16 %v646_v37 }
  0x30   : > { %475 = vst [vmem:[%s751_s6 + $0xa0] sm:$0xff] %v443_v33  ;;  %v351_v50 = vadd.f32 %v716_v3, %v315_v42  ;;  %v352_v51 = vadd.f32 %v716_v3, %v316_v43  ;;  %v319_v52 = vmul.f32 %v709_v0, %v626_v44  ;;  %v320_v53 = vmul.f32 %v709_v0, %v627_v45 }
  0x31   : > { %476 = vst [vmem:[%s751_s6 + $0xa8] sm:$0xff] %v444_v34  ;;  %v353_v56 = vadd.f32 %v716_v3, %v317_v46  ;;  %v354_v57 = vadd.f32 %v716_v3, %v318_v47  ;;  %v321_v58 = vmul.f32 %v709_v0, %v630_v48  ;;  %v322_v59 = vmul.f32 %v709_v0, %v631_v49 }
  0x32   : > { %477 = vst [vmem:[%s751_s6 + $0xb0] sm:$0xff] %v445_v38  ;;  %v383_v60 = vmax.f32 %v351_v50, 0.0  ;;  %v384_v61 = vmax.f32 %v352_v51, 0.0  ;;  %v355_v1 = vadd.f32 %v716_v3, %v319_v52  ;;  %v356_v2 = vadd.f32 %v716_v3, %v320_v53 }
  0x33   : > { %478 = vst [vmem:[%s751_s6 + $0xb8] sm:$0xff] %v446_v39  ;;  %v385_v4 = vmax.f32 %v353_v56, 0.0  ;;  %v386_v5 = vmax.f32 %v354_v57, 0.0  ;;  %v357_v0 = vadd.f32 %v716_v3, %v321_v58  ;;  %v358_v7 = vadd.f32 %v716_v3, %v322_v59 }
  0x34   : > { %v447_v8 = vadd.f32 %v415_v54, %v383_v60  ;;  %v448_v9 = vadd.f32 %v416_v55, %v384_v61  ;;  %v387_v10 = vmax.f32 %v355_v1, 0.0  ;;  %v388_v11 = vmax.f32 %v356_v2, 0.0 }
  0x35   : > { %v449_v13 = vadd.f32 %v417_v62, %v385_v4  ;;  %v450_v14 = vadd.f32 %v418_v63, %v386_v5  ;;  %v389_v15 = vmax.f32 %v357_v0, 0.0  ;;  %v390_v17 = vmax.f32 %v358_v7, 0.0 }
  0x36   : > { %479 = vst [vmem:[%s751_s6 + $0xc0] sm:$0xff] %v447_v8  ;;  %v451_v18 = vadd.f32 %v419_v6, %v387_v10  ;;  %v452_v3 = vadd.f32 %v420_v12, %v388_v11 }
  0x37   : > { %480 = vst [vmem:[%s751_s6 + $0xc8] sm:$0xff] %v448_v9  ;;  %v453_v20 = vadd.f32 %v421_v16, %v389_v15  ;;  %v454_v21 = vadd.f32 %v422_v19, %v390_v17 }
  0x38   : > { %481 = vst [vmem:[%s751_s6 + $0xd0] sm:$0xff] %v449_v13 }
  0x39   : > { %482 = vst [vmem:[%s751_s6 + $0xd8] sm:$0xff] %v450_v14 }
  0x3a   : > { %483 = vst [vmem:[%s751_s6 + $0xe0] sm:$0xff] %v451_v18 }
  0x3b   : > { %484 = vst [vmem:[%s751_s6 + $0xe8] sm:$0xff] %v452_v3 }
  0x3c   : > { %485 = vst [vmem:[%s751_s6 + $0xf0] sm:$0xff] %v453_v20 }
  0x3d   : > { %486 = vst [vmem:[%s751_s6 + $0xf8] sm:$0xff] %v454_v21 }
  0x3e PF: > { %s14_s15 = sadd.s32 1, %s663_s15  }
  0x3f   : > { %p11_p4 = scmp.ge.s32.totalorder %s14_s15, 4  }
  0x41   :  { %13 = sbr.rel (!%p11_p4) target bundleno = 1 (0x1), region = 69 }

// kernel: gin_layer.3
= control target key start
LH: loop header
LB: loop body
LE: loop exit
PB: predicated region body
PF: predicated region fallthrough
CT: control target
= control target key end

     0   :  { %s3197_s0 = inlined_call_operand.<no memory space> [shape: f32[1], index: 0, kind: input, shape index: {}]   ;;  %s3198_s1 = inlined_call_operand.vmem [shape: bf16[512,512], index: 1, kind: input, shape index: {}]   ;;  %s3199_s2 = inlined_call_operand.vmem [shape: bf16[512,128], index: 2, kind: input, shape index: {}]   ;;  %s3200_s3 = inlined_call_operand.vmem [shape: f32[512,128], index: 3, kind: input, shape index: {}]   ;;  %s3201_s4 = inlined_call_operand.vmem [shape: f32[128,128], index: 4, kind: input, shape index: {}]   ;;  %s3202_s5 = inlined_call_operand.vmem [shape: f32[1,128], index: 5, kind: input, shape index: {}]   ;;  %s3203_s6 = inlined_call_operand.vmem [shape: bf16[512,128], index: 6, kind: output, shape index: {0}]   ;;  %s3204_s7 = inlined_call_operand.vmem [shape: f32[2,2,128], index: 7, kind: output, shape index: {1}]  }
   0x1   :  { %3205 = sst [smem:[#allocation5_spill]] %s3198_s1 }
   0x2   :  { %13 = sst [smem:[#allocation3]] %s3197_s0 }
   0x3   :  { %s2500_s26 = smov 0   ;;  %s2502_s27 = smov 0  }
   0x4   :  { %s2504_s28 = smov 0   ;;  %s2506_s29 = smov 0  }
   0x5   :  { %s2508_s30 = smov 0   ;;  %s2510_s8 = smov 0  }
   0x6   :  { %s2512_s9 = smov 0  }
   0x7 LB: > { %s28_s0 = sadd.s32 1, %s2445_s30  ;;  %s31_s10 = sadd.s32 1, %s2449_s8  ;;  %s2453_s9 = sphi %s2512_s9, %s19_s9   ;;  %s2449_s8 = sphi %s2510_s8, %s3212_s8   ;;  %s2445_s30 = sphi %s2508_s30, %s3211_s30   ;;  %s2441_s29 = sphi %s2506_s29, %s3210_s29   ;;  %s2437_s28 = sphi %s2504_s28, %s3209_s28   ;;  %s2433_s27 = sphi %s2502_s27, %s3208_s27   ;;  %s2429_s26 = sphi %s2500_s26, %s3207_s26  }
   0x8   : > { %p29_p0 = scmp.ge.s32.totalorder %s28_s0, 2  ;;  %p68_p1 = scmp.ne.s32.totalorder %s2433_s27, %s2429_s26 }
   0x9   : > { %p69_p2 = scmp.eq.s32.totalorder %s2453_s9, 0  ;;  %s61_s14 = sadd.s32 1, %s2433_s27 }
   0xa   : > { %s3214_s0 = smov (%p29_p0, %s28_s0), 0  ;;  %s3216_s10 = smov (!%p29_p0, %s31_s10), %s2449_s8 }
   0xb   : > { %p70_p3 = por %p69_p2, %p68_p1  ;;  %p33_p4 = scmp.ge.s32.totalorder %s3216_s10, 2 }
   0xc   : > { %s57_s11 = ssub.s32 %s2445_s30, %s3214_s0  ;;  %p1888_p6 = scmp.ge.s32.totalorder %s2453_s9, 4 }
   0xd   : > { %s3218_s10 = smov (%p33_p4, %s3216_s10), 0 }
   0xe   : > { %s56_s12 = ssub.s32 %s2449_s8, %s3218_s10  ;;  %247 = sbr.rel (%p1888_p6) target bundleno = 61 (0x3d), region = 32 }
   0xf   : > { %s58_s13 = sor.u32 %s57_s11, %s56_s12 }
  0x10   : > { %p59_p5 = scmp.eq.s32.totalorder %s58_s13, 0 }
  0x12   : > { %s2551_s15 = scalar_select %p59_p5, %s2433_s27, %s61_s14  }
  0x13   : > { %250 = sbr.rel (!%p70_p3) target bundleno = 61 (0x3d), region = 36  ;;  %s252_s16 = sand.u32 (%p70_p3), 1, %s2433_s27  }
  0x14   : > { %s1891_s17 = sshll.u32 (%p70_p3), %s2445_s30, 1  ;;  %s1889_s18 = sshll.u32 (%p70_p3), %s252_s16, 8 }
  0x15   : > { %s2132_s19 = sshll.u32 (%p70_p3), %s2449_s8, 7  ;;  %s3206_s1 = sld [smem:[#allocation5_spill]] (%p70_p3) }
  0x16   : > { %s258_s20 = sadd.s32 (%p70_p3), %s2132_s19, %s1891_s17  ;;  %s2565_s25 = scalar_lea.vmem (%p70_p3), [#allocation4], %s1889_s18 }
  0x17   : > { %s1893_s21 = sshll.u32 (%p70_p3), %s258_s20, 2 }
  0x1b   : > { %s2560_s24 = scalar_lea.vmem %s3206_s1, %s1893_s21 }
  0x1c   : > { %v351_v0 = vld [vmem:[%s2560_s24] sm:$0xff]  ;;  %v353_v1 = vld [vmem:[%s2560_s24 + $0x10] sm:$0xff] }
  0x1d   : > { %v355_v2 = vld [vmem:[%s2560_s24 + $0x20] sm:$0xff]  ;;  %352 = vst [vmem:[%s2565_s25] sm:$0xff] %v351_v0  ;;  %v357_v3 = vld [vmem:[%s2560_s24 + $0x30] sm:$0xff] }
  0x1e   : > { %354 = vst [vmem:[%s2565_s25 + $0x8] sm:$0xff] %v353_v1  ;;  %v359_v4 = vld [vmem:[%s2560_s24 + $0x40] sm:$0xff]  ;;  %v361_v5 = vld [vmem:[%s2560_s24 + $0x50] sm:$0xff] }
  0x1f   : > { %356 = vst [vmem:[%s2565_s25 + $0x10] sm:$0xff] %v355_v2  ;;  %v363_v6 = vld [vmem:[%s2560_s24 + $0x60] sm:$0xff]  ;;  %v365_v7 = vld [vmem:[%s2560_s24 + $0x70] sm:$0xff] }
  0x20   : > { %358 = vst [vmem:[%s2565_s25 + $0x18] sm:$0xff] %v357_v3  ;;  %v367_v8 = vld [vmem:[%s2560_s24 + $0x80] sm:$0xff]  ;;  %v369_v9 = vld [vmem:[%s2560_s24 + $0x90] sm:$0xff] }
  0x21   : > { %360 = vst [vmem:[%s2565_s25 + $0x20] sm:$0xff] %v359_v4  ;;  %v371_v10 = vld [vmem:[%s2560_s24 + $0xa0] sm:$0xff]  ;;  %v373_v11 = vld [vmem:[%s2560_s24 + $0xb0] sm:$0xff] }
  0x22   : > { %362 = vst [vmem:[%s2565_s25 + $0x28] sm:$0xff] %v361_v5  ;;  %v375_v12 = vld [vmem:[%s2560_s24 + $0xc0] sm:$0xff]  ;;  %v377_v13 = vld [vmem:[%s2560_s24 + $0xd0] sm:$0xff] }
  0x23   : > { %364 = vst [vmem:[%s2565_s25 + $0x30] sm:$0xff] %v363_v6  ;;  %v379_v14 = vld [vmem:[%s2560_s24 + $0xe0] sm:$0xff]  ;;  %v381_v15 = vld [vmem:[%s2560_s24 + $0xf0] sm:$0xff] }
  0x24   : > { %366 = vst [vmem:[%s2565_s25 + $0x38] sm:$0xff] %v365_v7  ;;  %v383_v16 = vld [vmem:[%s2560_s24 + $0x100] sm:$0xff]  ;;  %v385_v17 = vld [vmem:[%s2560_s24 + $0x110] sm:$0xff] }
  0x25   : > { %368 = vst [vmem:[%s2565_s25 + $0x40] sm:$0xff] %v367_v8  ;;  %v387_v18 = vld [vmem:[%s2560_s24 + $0x120] sm:$0xff]  ;;  %v389_v19 = vld [vmem:[%s2560_s24 + $0x130] sm:$0xff] }
  0x26   : > { %370 = vst [vmem:[%s2565_s25 + $0x48] sm:$0xff] %v369_v9  ;;  %v391_v20 = vld [vmem:[%s2560_s24 + $0x140] sm:$0xff]  ;;  %v393_v21 = vld [vmem:[%s2560_s24 + $0x150] sm:$0xff] }
  0x27   : > { %372 = vst [vmem:[%s2565_s25 + $0x50] sm:$0xff] %v371_v10  ;;  %v395_v22 = vld [vmem:[%s2560_s24 + $0x160] sm:$0xff]  ;;  %v397_v23 = vld [vmem:[%s2560_s24 + $0x170] sm:$0xff] }
  0x28   : > { %374 = vst [vmem:[%s2565_s25 + $0x58] sm:$0xff] %v373_v11  ;;  %v399_v24 = vld [vmem:[%s2560_s24 + $0x180] sm:$0xff]  ;;  %v401_v25 = vld [vmem:[%s2560_s24 + $0x190] sm:$0xff] }
  0x29   : > { %376 = vst [vmem:[%s2565_s25 + $0x60] sm:$0xff] %v375_v12  ;;  %v403_v26 = vld [vmem:[%s2560_s24 + $0x1a0] sm:$0xff]  ;;  %v405_v27 = vld [vmem:[%s2560_s24 + $0x1b0] sm:$0xff] }
  0x2a   : > { %378 = vst [vmem:[%s2565_s25 + $0x68] sm:$0xff] %v377_v13  ;;  %v407_v28 = vld [vmem:[%s2560_s24 + $0x1c0] sm:$0xff]  ;;  %v409_v29 = vld [vmem:[%s2560_s24 + $0x1d0] sm:$0xff] }
  0x2b   : > { %380 = vst [vmem:[%s2565_s25 + $0x70] sm:$0xff] %v379_v14  ;;  %v411_v30 = vld [vmem:[%s2560_s24 + $0x1e0] sm:$0xff]  ;;  %v413_v31 = vld [vmem:[%s2560_s24 + $0x1f0] sm:$0xff] }
  0x2c   : > { %382 = vst [vmem:[%s2565_s25 + $0x78] sm:$0xff] %v381_v15 }
  0x2d   : > { %384 = vst [vmem:[%s2565_s25 + $0x80] sm:$0xff] %v383_v16 }
  0x2e   : > { %386 = vst [vmem:[%s2565_s25 + $0x88] sm:$0xff] %v385_v17 }
  0x2f   : > { %388 = vst [vmem:[%s2565_s25 + $0x90] sm:$0xff] %v387_v18 }
  0x30   : > { %390 = vst [vmem:[%s2565_s25 + $0x98] sm:$0xff] %v389_v19 }
  0x31   : > { %392 = vst [vmem:[%s2565_s25 + $0xa0] sm:$0xff] %v391_v20 }
  0x32   : > { %394 = vst [vmem:[%s2565_s25 + $0xa8] sm:$0xff] %v393_v21 }
  0x33   : > { %396 = vst [vmem:[%s2565_s25 + $0xb0] sm:$0xff] %v395_v22 }
  0x34   : > { %398 = vst [vmem:[%s2565_s25 + $0xb8] sm:$0xff] %v397_v23 }
  0x35   : > { %400 = vst [vmem:[%s2565_s25 + $0xc0] sm:$0xff] %v399_v24 }
  0x36   : > { %402 = vst [vmem:[%s2565_s25 + $0xc8] sm:$0xff] %v401_v25 }
  0x37   : > { %404 = vst [vmem:[%s2565_s25 + $0xd0] sm:$0xff] %v403_v26 }
  0x38   : > { %406 = vst [vmem:[%s2565_s25 + $0xd8] sm:$0xff] %v405_v27 }
  0x39   : > { %408 = vst [vmem:[%s2565_s25 + $0xe0] sm:$0xff] %v407_v28 }
  0x3a   : > { %410 = vst [vmem:[%s2565_s25 + $0xe8] sm:$0xff] %v409_v29 }
  0x3b   : > { %412 = vst [vmem:[%s2565_s25 + $0xf0] sm:$0xff] %v411_v30 }
  0x3c   : > { %414 = vst [vmem:[%s2565_s25 + $0xf8] sm:$0xff] %v413_v31 }
  0x3d PF: > { %p1894_p7 = scmp.ge.s32.totalorder %s2453_s9, 1  ;;  %p428_p8 = scmp.lt.s32.totalorder %s2453_s9, 5 }
  0x3f   : > { %p429_p9 = pnand %p1894_p7, %p428_p8 }
  0x40   : > { %s435_s11 = sand.u32 (!%p429_p9), 1, %s2429_s26   ;;  %s1896_s12 = sshll.u32 (!%p429_p9), %s2441_s29, 5 }
  0x41   : > { %432 = sbr.rel (%p429_p9) target bundleno = 689 (0x2b1), region = 78  ;;  %s1895_s13 = sshll.u32 (!%p429_p9), %s435_s11, 8 }
  0x42   : > { %p478_p10 = scmp.lt.s32.totalorder (!%p429_p9), %s1896_s12, 63  ;;  %p489_p11 = scmp.lt.s32.totalorder (!%p429_p9), %s2441_s29, 1 }
  0x43   : > { %s2649_s1 = scalar_lea.vmem (!%p429_p9), [#allocation4], %s1895_s13  ;;  %p1901_p12 = scmp.ne.s32.totalorder (!%p429_p9), %s2437_s28, 0 }
  0x46   : > { %s3220_s12 = smov (!%p478_p10, %s1896_s12), 63 }
  0x47   : > { %s490_s14 = scalar_select %p489_p11, %s2441_s29, 1 }
  0x48   : > { %s1897_s16 = sshll.u32 %s3220_s12, 3  ;;  %s1899_s17 = sshll.u32 %s3220_s12, 2 }
  0x49   : > { %s2637_s20 = scalar_lea.vmem %s3200_s3, %s1897_s16  ;;  %s2642_s23 = scalar_lea.vmem %s3203_s6, %s1899_s17 }
  0x4a   : > { %s1900_s24 = sshll.u32 %s490_s14, 1  ;;  %496 = sbr.rel (%p1901_p12) target bundleno = 112 (0x70), region = 86 }
  0x4b   : > { %s2647_s11 = scalar_lea.vmem %s3204_s7, %s1900_s24 }
  0x4f   : > { %v2455_v32 = vmov 0.0  }
  0x50   : > { %497 = vst [vmem:[#allocation2 + $0xb0] sm:$0xff] %v2455_v32 }
  0x51   : > { %498 = vst [vmem:[#allocation2] sm:$0xff] %v2455_v32 }
  0x52   : > { %499 = vst [vmem:[#allocation2 + $0xd8] sm:$0xff] %v2455_v32 }
  0x53   : > { %500 = vst [vmem:[#allocation2 + $0x18] sm:$0xff] %v2455_v32 }
  0x54   : > { %501 = vst [vmem:[#allocation2 + $0x50] sm:$0xff] %v2455_v32 }
  0x55   : > { %502 = vst [vmem:[#allocation2 + $0x68] sm:$0xff] %v2455_v32 }
  0x56   : > { %503 = vst [vmem:[#allocation2 + $0x30] sm:$0xff] %v2455_v32 }
  0x57   : > { %504 = vst [vmem:[#allocation2 + $0x48] sm:$0xff] %v2455_v32 }
  0x58   : > { %505 = vst [vmem:[#allocation2 + $0x80] sm:$0xff] %v2455_v32 }
  0x59   : > { %506 = vst [vmem:[#allocation2 + $0x88] sm:$0xff] %v2455_v32 }
  0x5a   : > { %507 = vst [vmem:[#allocation2 + $0xe8] sm:$0xff] %v2455_v32 }
  0x5b   : > { %508 = vst [vmem:[#allocation2 + $0xb8] sm:$0xff] %v2455_v32 }
  0x5c   : > { %509 = vst [vmem:[#allocation2 + $0x60] sm:$0xff] %v2455_v32 }
  0x5d   : > { %510 = vst [vmem:[#allocation2 + $0xf0] sm:$0xff] %v2455_v32 }
  0x5e   : > { %511 = vst [vmem:[#allocation2 + $0x8] sm:$0xff] %v2455_v32 }
  0x5f   : > { %512 = vst [vmem:[#allocation2 + $0x78] sm:$0xff] %v2455_v32 }
  0x60   : > { %513 = vst [vmem:[#allocation2 + $0x38] sm:$0xff] %v2455_v32 }
  0x61   : > { %514 = vst [vmem:[#allocation2 + $0x58] sm:$0xff] %v2455_v32 }
  0x62   : > { %515 = vst [vmem:[#allocation2 + $0x40] sm:$0xff] %v2455_v32 }
  0x63   : > { %516 = vst [vmem:[#allocation2 + $0xc8] sm:$0xff] %v2455_v32 }
  0x64   : > { %517 = vst [vmem:[#allocation2 + $0xe0] sm:$0xff] %v2455_v32 }
  0x65   : > { %518 = vst [vmem:[#allocation2 + $0x90] sm:$0xff] %v2455_v32 }
  0x66   : > { %519 = vst [vmem:[#allocation2 + $0x70] sm:$0xff] %v2455_v32 }
  0x67   : > { %520 = vst [vmem:[#allocation2 + $0xc0] sm:$0xff] %v2455_v32 }
  0x68   : > { %521 = vst [vmem:[#allocation2 + $0xa8] sm:$0xff] %v2455_v32 }
  0x69   : > { %522 = vst [vmem:[#allocation2 + $0xd0] sm:$0xff] %v2455_v32 }
  0x6a   : > { %523 = vst [vmem:[#allocation2 + $0x10] sm:$0xff] %v2455_v32 }
  0x6b   : > { %524 = vst [vmem:[#allocation2 + $0x28] sm:$0xff] %v2455_v32 }
  0x6c   : > { %525 = vst [vmem:[#allocation2 + $0xa0] sm:$0xff] %v2455_v32 }
  0x6d   : > { %526 = vst [vmem:[#allocation2 + $0xf8] sm:$0xff] %v2455_v32 }
  0x6e   : > { %527 = vst [vmem:[#allocation2 + $0x20] sm:$0xff] %v2455_v32 }
  0x6f   : > { %528 = vst [vmem:[#allocation2 + $0x98] sm:$0xff] %v2455_v32 }
  0x70 PF: > { %s1902_s12 = sshll.u32 %s2437_s28, 8  ;;  %v1906_v47 = vld [vmem:[%s2649_s1] sm:$0xf]  ;;  %v2150_v49 = vld [vmem:[%s2649_s1 + $0x4] sm:$0xf0]  ;;  %p2096_p13 = scmp.ne.s32.totalorder %s2437_s28, 1 }
  0x71   : > { %s530_s13 = sshra.s32 %s1902_s12, 3  ;;  %v1970_v50 = vld [vmem:[%s2649_s1 + $0x80] sm:$0xf]  ;;  %v2166_v52 = vld [vmem:[%s2649_s1 + $0x84] sm:$0xf0]  ;;  %v1907_v57 = vor.u32 %v2150_v49, %v1906_v47  ;;  %s2757_s17 = sld [smem:[#allocation3]] (!%p2096_p13) }
  0x72   : > { %s1903_s14 = sshll.u32 %s530_s13, 2  ;;  %v2149_v53 = vld [vmem:[%s2649_s1 + $0x4] sm:$0xf]  ;;  %v1908_v54 = vld [vmem:[%s2649_s1 + $0x8] sm:$0xf0]  ;;  %v1971_v58 = vor.u32 %v2166_v52, %v1970_v50 }
  0x73   : > { %s2656_s18 = scalar_lea.vmem %s3199_s2, %s1903_s14  ;;  %v2165_v55 = vld [vmem:[%s2649_s1 + $0x84] sm:$0xf]  ;;  %v1972_v56 = vld [vmem:[%s2649_s1 + $0x88] sm:$0xf0]  ;;  %v1911_v59 = vor.u32 %v2149_v53, %v1908_v54  ;;  %v1914_v61 = vld [vmem:[%s2649_s1 + $0x10] sm:$0xf] }
  0x74   : > { %v2140_v33 = vld [vmem:[%s2656_s18 + $0x38] sm:$0xff]  ;;  %v2139_v35 = vld [vmem:[%s2656_s18 + $0x30] sm:$0xff]  ;;  %v2138_v37 = vld [vmem:[%s2656_s18 + $0x28] sm:$0xff]  ;;  %v1975_v60 = vor.u32 %v2165_v55, %v1972_v56 }
  0x75   : > { %v2148_v34 = vld [vmem:[%s2656_s18 + $0x78] sm:$0xff]  ;;  %886 = vmatpush.bf16.msra.mxu0 %v2140_v33  ;;  %2276 = vmatpush.bf16.msra.mxu2 %v2140_v33  ;;  %v2147_v36 = vld [vmem:[%s2656_s18 + $0x70] sm:$0xff]  ;;  %v2146_v38 = vld [vmem:[%s2656_s18 + $0x68] sm:$0xff] }
  0x76   : > { %975 = vmatpush.bf16.msra.mxu1 %v2148_v34  ;;  %2284 = vmatpush.bf16.msra.mxu3 %v2148_v34  ;;  %v2137_v39 = vld [vmem:[%s2656_s18 + $0x20] sm:$0xff]  ;;  %v2136_v41 = vld [vmem:[%s2656_s18 + $0x18] sm:$0xff]  ;;  %v2135_v43 = vld [vmem:[%s2656_s18 + $0x10] sm:$0xff] }
  0x77   : > { %v2145_v40 = vld [vmem:[%s2656_s18 + $0x60] sm:$0xff]  ;;  %v2144_v42 = vld [vmem:[%s2656_s18 + $0x58] sm:$0xff]  ;;  %v2143_v44 = vld [vmem:[%s2656_s18 + $0x50] sm:$0xff]  ;;  %s1133_s25 = sadd.f32 (!%p2096_p13), 1.0, %s2757_s17 }
  0x78   : > { %v2134_v45 = vld [vmem:[%s2656_s18 + $0x8] sm:$0xff]  ;;  %v2133_v48 = vld [vmem:[%s2656_s18] sm:$0xff]  ;;  %v2152_v62 = vld [vmem:[%s2649_s1 + $0x14] sm:$0xf0] }
  0x79   : > { %887 = vmatpush.bf16.msra.mxu0 %v2139_v35  ;;  %2277 = vmatpush.bf16.msra.mxu2 %v2139_v35  ;;  %v2142_v46 = vld [vmem:[%s2656_s18 + $0x48] sm:$0xff]  ;;  %v2141_v51 = vld [vmem:[%s2656_s18 + $0x40] sm:$0xff]  ;;  %v1978_v63 = vld [vmem:[%s2649_s1 + $0x90] sm:$0xf]  ;;  %v1915_v5 = vor.u32 %v2152_v62, %v1914_v61 }
  0x7a   : > { %976 = vmatpush.bf16.msra.mxu1 %v2147_v36  ;;  %2285 = vmatpush.bf16.msra.mxu3 %v2147_v36  ;;  %v2168_v0 = vld [vmem:[%s2649_s1 + $0x94] sm:$0xf0]  ;;  %v2151_v1 = vld [vmem:[%s2649_s1 + $0x14] sm:$0xf]  ;;  %v1916_v2 = vld [vmem:[%s2649_s1 + $0x18] sm:$0xf0] }
  0x7b   : > { %v2167_v3 = vld [vmem:[%s2649_s1 + $0x94] sm:$0xf]  ;;  %v1980_v4 = vld [vmem:[%s2649_s1 + $0x98] sm:$0xf0]  ;;  %v1979_v6 = vor.u32 %v2168_v0, %v1978_v63  ;;  %v1919_v7 = vor.u32 %v2151_v1, %v1916_v2  ;;  %v1922_v9 = vld [vmem:[%s2649_s1 + $0x20] sm:$0xf] }
  0x7c   : > { %v1983_v8 = vor.u32 %v2167_v3, %v1980_v4  ;;  %v2154_v10 = vld [vmem:[%s2649_s1 + $0x24] sm:$0xf0]  ;;  %v1986_v11 = vld [vmem:[%s2649_s1 + $0xa0] sm:$0xf]  ;;  %v2153_v13 = vld [vmem:[%s2649_s1 + $0x24] sm:$0xf] }
  0x7d   : > { %888 = vmatpush.bf16.msra.mxu0 %v2138_v37  ;;  %2278 = vmatpush.bf16.msra.mxu2 %v2138_v37  ;;  %v2170_v12 = vld [vmem:[%s2649_s1 + $0xa4] sm:$0xf0]  ;;  %v1924_v14 = vld [vmem:[%s2649_s1 + $0x28] sm:$0xf0]  ;;  %v2169_v15 = vld [vmem:[%s2649_s1 + $0xa4] sm:$0xf]  ;;  %v1923_v17 = vor.u32 %v2154_v10, %v1922_v9 }
  0x7e   : > { %977 = vmatpush.bf16.msra.mxu1 %v2146_v38  ;;  %2286 = vmatpush.bf16.msra.mxu3 %v2146_v38  ;;  %v1988_v16 = vld [vmem:[%s2649_s1 + $0xa8] sm:$0xf0]  ;;  %v1987_v18 = vor.u32 %v2170_v12, %v1986_v11  ;;  %v1927_v19 = vor.u32 %v2153_v13, %v1924_v14  ;;  %v1930_v21 = vld [vmem:[%s2649_s1 + $0x30] sm:$0xf]  ;;  %v2156_v22 = vld [vmem:[%s2649_s1 + $0x34] sm:$0xf0] }
  0x7f   : > { %v1991_v20 = vor.u32 %v2169_v15, %v1988_v16  ;;  %v1994_v23 = vld [vmem:[%s2649_s1 + $0xb0] sm:$0xf]  ;;  %v2172_v24 = vld [vmem:[%s2649_s1 + $0xb4] sm:$0xf0]  ;;  %v2155_v25 = vld [vmem:[%s2649_s1 + $0x34] sm:$0xf]  ;;  %v1931_v29 = vor.u32 %v2156_v22, %v1930_v21 }
  0x80   : > { %v1932_v26 = vld [vmem:[%s2649_s1 + $0x38] sm:$0xf0]  ;;  %v2171_v27 = vld [vmem:[%s2649_s1 + $0xb4] sm:$0xf]  ;;  %v1995_v30 = vor.u32 %v2172_v24, %v1994_v23  ;;  %v1938_v33 = vld [vmem:[%s2649_s1 + $0x40] sm:$0xf] }
  0x81   : > { %889 = vmatpush.bf16.msra.mxu0 %v2137_v39  ;;  %2279 = vmatpush.bf16.msra.mxu2 %v2137_v39  ;;  %v1996_v28 = vld [vmem:[%s2649_s1 + $0xb8] sm:$0xf0]  ;;  %v1935_v31 = vor.u32 %v2155_v25, %v1932_v26  ;;  %v2158_v34 = vld [vmem:[%s2649_s1 + $0x44] sm:$0xf0]  ;;  %v2002_v35 = vld [vmem:[%s2649_s1 + $0xc0] sm:$0xf] }
  0x82   : > { %978 = vmatpush.bf16.msra.mxu1 %v2145_v40  ;;  %2287 = vmatpush.bf16.msra.mxu3 %v2145_v40  ;;  %v1999_v32 = vor.u32 %v2171_v27, %v1996_v28  ;;  %v2174_v36 = vld [vmem:[%s2649_s1 + $0xc4] sm:$0xf0]  ;;  %v2157_v37 = vld [vmem:[%s2649_s1 + $0x44] sm:$0xf]  ;;  %v1940_v38 = vld [vmem:[%s2649_s1 + $0x48] sm:$0xf0] }
  0x83   : > { %v2173_v39 = vld [vmem:[%s2649_s1 + $0xc4] sm:$0xf]  ;;  %v2004_v40 = vld [vmem:[%s2649_s1 + $0xc8] sm:$0xf0]  ;;  %v2010_v47 = vld [vmem:[%s2649_s1 + $0xd0] sm:$0xf] }
  0x84   : > { %v2159_v49 = vld [vmem:[%s2649_s1 + $0x54] sm:$0xf]  ;;  %v1948_v50 = vld [vmem:[%s2649_s1 + $0x58] sm:$0xf0]  ;;  %v2161_v61 = vld [vmem:[%s2649_s1 + $0x64] sm:$0xf] }
  0x85   : > { %890 = vmatpush.bf16.msra.mxu0 %v2136_v41  ;;  %2280 = vmatpush.bf16.msra.mxu2 %v2136_v41  ;;  %v1939_v41 = vor.u32 %v2158_v34, %v1938_v33  ;;  %v2012_v52 = vld [vmem:[%s2649_s1 + $0xd8] sm:$0xf0]  ;;  %v1951_v55 = vor.u32 %v2159_v49, %v1948_v50  ;;  %v1956_v62 = vld [vmem:[%s2649_s1 + $0x68] sm:$0xf0]  ;;  %v2177_v63 = vld [vmem:[%s2649_s1 + $0xe4] sm:$0xf] }
  0x86   : > { %979 = vmatpush.bf16.msra.mxu1 %v2144_v42  ;;  %2288 = vmatpush.bf16.msra.mxu3 %v2144_v42  ;;  %v2003_v42 = vor.u32 %v2174_v36, %v2002_v35  ;;  %v2020_v0 = vld [vmem:[%s2649_s1 + $0xe8] sm:$0xf0]  ;;  %v1959_v3 = vor.u32 %v2161_v61, %v1956_v62  ;;  %v2163_v9 = vld [vmem:[%s2649_s1 + $0x74] sm:$0xf]  ;;  %v1964_v10 = vld [vmem:[%s2649_s1 + $0x78] sm:$0xf0] }
  0x87   : > { %v2023_v4 = vor.u32 %v2177_v63, %v2020_v0  ;;  %v2179_v11 = vld [vmem:[%s2649_s1 + $0xf4] sm:$0xf]  ;;  %v2028_v12 = vld [vmem:[%s2649_s1 + $0xf8] sm:$0xf0]  ;;  %v1967_v15 = vor.u32 %v2163_v9, %v1964_v10  ;;  %v567_v27 = vld [vmem:[#allocation2] sm:$0xff] }
  0x88   : > { %v2031_v16 = vor.u32 %v2179_v11, %v2028_v12  ;;  %v582_v23 = vld [vmem:[#allocation2 + $0x38] sm:$0xff]  ;;  %v586_v63 = vld [vmem:[#allocation2 + $0xe0] sm:$0xff]  ;;  %v587_v9 = vld [vmem:[#allocation2 + $0x90] sm:$0xff] }
  0x89   : > { %891 = vmatpush.bf16.msra.mxu0 %v2135_v43  ;;  %2281 = vmatpush.bf16.msra.mxu2 %v2135_v43  ;;  %v1943_v43 = vor.u32 %v2157_v37, %v1940_v38  ;;  %v583_v33 = vld [vmem:[#allocation2 + $0x58] sm:$0xff] }
  0x8a   : > { %980 = vmatpush.bf16.msra.mxu1 %v2143_v44  ;;  %2289 = vmatpush.bf16.msra.mxu3 %v2143_v44  ;;  %v2007_v44 = vor.u32 %v2173_v39, %v2004_v40  ;;  %v568_v37 = vld [vmem:[#allocation2 + $0xd8] sm:$0xff] }
  0x8d   : > { %892 = vmatpush.bf16.msra.mxu0 %v2134_v45  ;;  %2282 = vmatpush.bf16.msra.mxu2 %v2134_v45  ;;  %v1946_v45 = vld [vmem:[%s2649_s1 + $0x50] sm:$0xf] }
  0x8e   : > { %981 = vmatpush.bf16.msra.mxu1 %v2142_v46  ;;  %2290 = vmatpush.bf16.msra.mxu3 %v2142_v46  ;;  %v2160_v46 = vld [vmem:[%s2649_s1 + $0x54] sm:$0xf0] }
  0x8f   : > { %v1947_v53 = vor.u32 %v2160_v46, %v1946_v45 }
  0x91   : > { %893 = vmatpush.bf16.msra.mxu0 %v2133_v48  ;;  %2283 = vmatpush.bf16.msra.mxu2 %v2133_v48  ;;  %v2176_v48 = vld [vmem:[%s2649_s1 + $0xd4] sm:$0xf0] }
  0x92   : > { %982 = vmatpush.bf16.msra.mxu1 %v2141_v51  ;;  %2291 = vmatpush.bf16.msra.mxu3 %v2141_v51  ;;  %v2175_v51 = vld [vmem:[%s2649_s1 + $0xd4] sm:$0xf]  ;;  %v2011_v54 = vor.u32 %v2176_v48, %v2010_v47  ;;  %v569_v47 = vld [vmem:[#allocation2 + $0x18] sm:$0xff] }
  0x93   : > { %v2015_v56 = vor.u32 %v2175_v51, %v2012_v52 }
  0x94   : > { %894 = vmatmul.bf16.vlgmr.msra.gmra.mxu0 %v1907_v57  ;;  %934 = vmatmul.bf16.vlgmr.msra.gmra.mxu2 %v1971_v58  ;;  %v1954_v57 = vld [vmem:[%s2649_s1 + $0x60] sm:$0xf]  ;;  %v2162_v58 = vld [vmem:[%s2649_s1 + $0x64] sm:$0xf0] }
  0x95   : > { %983 = vmatmul.bf16.vlgmr.msra.gmra.mxu1 %v1911_v59  ;;  %1023 = vmatmul.bf16.vlgmr.msra.gmra.mxu3 %v1975_v60  ;;  %v2018_v59 = vld [vmem:[%s2649_s1 + $0xe0] sm:$0xf]  ;;  %v2178_v60 = vld [vmem:[%s2649_s1 + $0xe4] sm:$0xf0]  ;;  %v1955_v1 = vor.u32 %v2162_v58, %v1954_v57  ;;  %v570_v57 = vld [vmem:[#allocation2 + $0x50] sm:$0xff] }
  0x96   : > { %v2019_v2 = vor.u32 %v2178_v60, %v2018_v59 }
  0xa4   : > { %899 = vmatmul.bf16.gmra.mxu0 %v1915_v5  ;;  %939 = vmatmul.bf16.gmra.mxu2 %v1979_v6  ;;  %v1962_v5 = vld [vmem:[%s2649_s1 + $0x70] sm:$0xf]  ;;  %v2164_v6 = vld [vmem:[%s2649_s1 + $0x74] sm:$0xf0] }
  0xa5   : > { %988 = vmatmul.bf16.gmra.mxu1 %v1919_v7  ;;  %1028 = vmatmul.bf16.gmra.mxu3 %v1983_v8  ;;  %v2026_v7 = vld [vmem:[%s2649_s1 + $0xf0] sm:$0xf]  ;;  %v2180_v8 = vld [vmem:[%s2649_s1 + $0xf4] sm:$0xf0]  ;;  %v1963_v13 = vor.u32 %v2164_v6, %v1962_v5 }
  0xa6   : > { %v2027_v14 = vor.u32 %v2180_v8, %v2026_v7 }
  0xb4   : > { %904 = vmatmul.bf16.gmra.mxu0 %v1923_v17  ;;  %944 = vmatmul.bf16.gmra.mxu2 %v1987_v18  ;;  %v566_v18 = vld [vmem:[#allocation2 + $0xb0] sm:$0xff] }
  0xb5   : > { %993 = vmatmul.bf16.gmra.mxu1 %v1927_v19  ;;  %1033 = vmatmul.bf16.gmra.mxu3 %v1991_v20 }
  0xc4   : > { %909 = vmatmul.bf16.gmra.mxu0 %v1931_v29  ;;  %949 = vmatmul.bf16.gmra.mxu2 %v1995_v30 }
  0xc5   : > { %998 = vmatmul.bf16.gmra.mxu1 %v1935_v31  ;;  %1038 = vmatmul.bf16.gmra.mxu3 %v1999_v32 }
  0xd4   : > { %914 = vmatmul.bf16.gmra.mxu0 %v1939_v41  ;;  %954 = vmatmul.bf16.gmra.mxu2 %v2003_v42 }
  0xd5   : > { %1003 = vmatmul.bf16.gmra.mxu1 %v1943_v43  ;;  %1043 = vmatmul.bf16.gmra.mxu3 %v2007_v44  ;;  %v584_v43 = vld [vmem:[#allocation2 + $0x40] sm:$0xff] }
  0xe4   : > { %919 = vmatmul.bf16.gmra.mxu0 %v1947_v53  ;;  %959 = vmatmul.bf16.gmra.mxu2 %v2011_v54  ;;  %v585_v53 = vld [vmem:[#allocation2 + $0xc8] sm:$0xff] }
  0xe5   : > { %1008 = vmatmul.bf16.gmra.mxu1 %v1951_v55  ;;  %1048 = vmatmul.bf16.gmra.mxu3 %v2015_v56 }
  0xf4   : > { %924 = vmatmul.bf16.gmra.mxu0 %v1955_v1  ;;  %964 = vmatmul.bf16.gmra.mxu2 %v2019_v2 }
  0xf5   : > { %1013 = vmatmul.bf16.gmra.mxu1 %v1959_v3  ;;  %1053 = vmatmul.bf16.gmra.mxu3 %v2023_v4  ;;  %v571_v3 = vld [vmem:[#allocation2 + $0x68] sm:$0xff] }
 0x104   : > { %929 = vmatmul.bf16.gmra.mxu0 %v1963_v13  ;;  %969 = vmatmul.bf16.gmra.mxu2 %v2027_v14  ;;  %v572_v13 = vld [vmem:[#allocation2 + $0x30] sm:$0xff] }
 0x105   : > { %1018 = vmatmul.bf16.gmra.mxu1 %v1967_v15  ;;  %1058 = vmatmul.bf16.gmra.mxu3 %v2031_v16 }
 0x111   : > { %v895_v17 = vpop.f32.mrf.mxu0 }
 0x112   : > { %v984_v19 = vpop.f32.mrf.mxu1 }
 0x113   : > { %v985_v20 = vadd.f32 %v984_v19, %v895_v17  ;;  %v588_v19 = vld [vmem:[#allocation2 + $0x70] sm:$0xff] }
 0x115   : > { %v1064_v21 = vadd.f32 %v985_v20, %v566_v18 }
 0x117   : > { %1096 = vst [vmem:[#allocation2 + $0xb0] sm:$0xff] %v1064_v21  ;;  %v935_v22 = vpop.f32.mrf.mxu2 }
 0x118   : > { %v1024_v24 = vpop.f32.mrf.mxu3 }
 0x119   : > { %v1025_v25 = vadd.f32 %v1024_v24, %v935_v22  ;;  %v897_v26 = vpop.f32.mrf.mxu0 }
 0x11a   : > { %v986_v28 = vpop.f32.mrf.mxu1 }
 0x11b   : > { %v1080_v29 = vadd.f32 %v1025_v25, %v582_v23  ;;  %v987_v30 = vadd.f32 %v986_v28, %v897_v26  ;;  %v573_v23 = vld [vmem:[#allocation2 + $0x48] sm:$0xff] }
 0x11d   : > { %1112 = vst [vmem:[#allocation2 + $0x38] sm:$0xff] %v1080_v29  ;;  %v1065_v31 = vadd.f32 %v987_v30, %v567_v27  ;;  %v589_v29 = vld [vmem:[#allocation2 + $0xc0] sm:$0xff] }
 0x11f   : > { %1097 = vst [vmem:[#allocation2] sm:$0xff] %v1065_v31  ;;  %v937_v32 = vpop.f32.mrf.mxu2 }
 0x120   : > { %v1026_v34 = vpop.f32.mrf.mxu3 }
 0x121   : > { %v1027_v35 = vadd.f32 %v1026_v34, %v937_v32  ;;  %v900_v36 = vpop.f32.mrf.mxu0 }
 0x122   : > { %v989_v38 = vpop.f32.mrf.mxu1 }
 0x123   : > { %v1081_v39 = vadd.f32 %v1027_v35, %v583_v33  ;;  %v990_v40 = vadd.f32 %v989_v38, %v900_v36  ;;  %v574_v33 = vld [vmem:[#allocation2 + $0x80] sm:$0xff] }
 0x125   : > { %1113 = vst [vmem:[#allocation2 + $0x58] sm:$0xff] %v1081_v39  ;;  %v1066_v41 = vadd.f32 %v990_v40, %v568_v37  ;;  %v590_v39 = vld [vmem:[#allocation2 + $0xa8] sm:$0xff] }
 0x127   : > { %1098 = vst [vmem:[#allocation2 + $0xd8] sm:$0xff] %v1066_v41  ;;  %v940_v42 = vpop.f32.mrf.mxu2 }
 0x128   : > { %v1029_v44 = vpop.f32.mrf.mxu3 }
 0x129   : > { %v1030_v45 = vadd.f32 %v1029_v44, %v940_v42  ;;  %v902_v46 = vpop.f32.mrf.mxu0 }
 0x12a   : > { %v991_v48 = vpop.f32.mrf.mxu1 }
 0x12b   : > { %v1082_v49 = vadd.f32 %v1030_v45, %v584_v43  ;;  %v992_v50 = vadd.f32 %v991_v48, %v902_v46  ;;  %v575_v43 = vld [vmem:[#allocation2 + $0x88] sm:$0xff] }
 0x12d   : > { %1114 = vst [vmem:[#allocation2 + $0x40] sm:$0xff] %v1082_v49  ;;  %v1067_v51 = vadd.f32 %v992_v50, %v569_v47  ;;  %v591_v49 = vld [vmem:[#allocation2 + $0xd0] sm:$0xff] }
 0x12f   : > { %1099 = vst [vmem:[#allocation2 + $0x18] sm:$0xff] %v1067_v51  ;;  %v942_v52 = vpop.f32.mrf.mxu2 }
 0x130   : > { %v1031_v54 = vpop.f32.mrf.mxu3 }
 0x131   : > { %v1032_v55 = vadd.f32 %v1031_v54, %v942_v52  ;;  %v905_v56 = vpop.f32.mrf.mxu0 }
 0x132   : > { %v994_v58 = vpop.f32.mrf.mxu1 }
 0x133   : > { %v1083_v59 = vadd.f32 %v1032_v55, %v585_v53  ;;  %v995_v60 = vadd.f32 %v994_v58, %v905_v56  ;;  %v576_v53 = vld [vmem:[#allocation2 + $0xe8] sm:$0xff] }
 0x135   : > { %1115 = vst [vmem:[#allocation2 + $0xc8] sm:$0xff] %v1083_v59  ;;  %v1068_v61 = vadd.f32 %v995_v60, %v570_v57  ;;  %v592_v59 = vld [vmem:[#allocation2 + $0x10] sm:$0xff] }
 0x137   : > { %1100 = vst [vmem:[#allocation2 + $0x50] sm:$0xff] %v1068_v61  ;;  %v945_v62 = vpop.f32.mrf.mxu2 }
 0x138   : > { %v1034_v0 = vpop.f32.mrf.mxu3 }
 0x139   : > { %v1035_v1 = vadd.f32 %v1034_v0, %v945_v62  ;;  %v907_v2 = vpop.f32.mrf.mxu0 }
 0x13a   : > { %v996_v4 = vpop.f32.mrf.mxu1 }
 0x13b   : > { %v1084_v5 = vadd.f32 %v1035_v1, %v586_v63  ;;  %v997_v6 = vadd.f32 %v996_v4, %v907_v2  ;;  %v577_v63 = vld [vmem:[#allocation2 + $0xb8] sm:$0xff] }
 0x13d   : > { %1116 = vst [vmem:[#allocation2 + $0xe0] sm:$0xff] %v1084_v5  ;;  %v1069_v7 = vadd.f32 %v997_v6, %v571_v3  ;;  %v593_v5 = vld [vmem:[#allocation2 + $0x28] sm:$0xff] }
 0x13f   : > { %1101 = vst [vmem:[#allocation2 + $0x68] sm:$0xff] %v1069_v7  ;;  %v947_v8 = vpop.f32.mrf.mxu2 }
 0x140   : > { %v1036_v10 = vpop.f32.mrf.mxu3 }
 0x141   : > { %v1037_v11 = vadd.f32 %v1036_v10, %v947_v8  ;;  %v910_v12 = vpop.f32.mrf.mxu0 }
 0x142   : > { %v999_v14 = vpop.f32.mrf.mxu1 }
 0x143   : > { %v1085_v15 = vadd.f32 %v1037_v11, %v587_v9  ;;  %v1000_v16 = vadd.f32 %v999_v14, %v910_v12  ;;  %v578_v9 = vld [vmem:[#allocation2 + $0x60] sm:$0xff] }
 0x145   : > { %1117 = vst [vmem:[#allocation2 + $0x90] sm:$0xff] %v1085_v15  ;;  %v1070_v17 = vadd.f32 %v1000_v16, %v572_v13  ;;  %v594_v15 = vld [vmem:[#allocation2 + $0xa0] sm:$0xff] }
 0x147   : > { %1102 = vst [vmem:[#allocation2 + $0x30] sm:$0xff] %v1070_v17  ;;  %v950_v18 = vpop.f32.mrf.mxu2 }
 0x148   : > { %v1039_v20 = vpop.f32.mrf.mxu3 }
 0x149   : > { %v1040_v21 = vadd.f32 %v1039_v20, %v950_v18  ;;  %v912_v22 = vpop.f32.mrf.mxu0 }
 0x14a   : > { %v1001_v24 = vpop.f32.mrf.mxu1 }
 0x14b   : > { %v1086_v25 = vadd.f32 %v1040_v21, %v588_v19  ;;  %v1002_v26 = vadd.f32 %v1001_v24, %v912_v22  ;;  %v579_v19 = vld [vmem:[#allocation2 + $0xf0] sm:$0xff] }
 0x14d   : > { %1118 = vst [vmem:[#allocation2 + $0x70] sm:$0xff] %v1086_v25  ;;  %v1071_v27 = vadd.f32 %v1002_v26, %v573_v23  ;;  %v595_v25 = vld [vmem:[#allocation2 + $0xf8] sm:$0xff] }
 0x14f   : > { %1103 = vst [vmem:[#allocation2 + $0x48] sm:$0xff] %v1071_v27  ;;  %v952_v28 = vpop.f32.mrf.mxu2 }
 0x150   : > { %v1041_v30 = vpop.f32.mrf.mxu3 }
 0x151   : > { %v1042_v31 = vadd.f32 %v1041_v30, %v952_v28  ;;  %v915_v32 = vpop.f32.mrf.mxu0 }
 0x152   : > { %v1004_v34 = vpop.f32.mrf.mxu1 }
 0x153   : > { %v1087_v35 = vadd.f32 %v1042_v31, %v589_v29  ;;  %v1005_v36 = vadd.f32 %v1004_v34, %v915_v32  ;;  %v580_v29 = vld [vmem:[#allocation2 + $0x8] sm:$0xff] }
 0x155   : > { %1119 = vst [vmem:[#allocation2 + $0xc0] sm:$0xff] %v1087_v35  ;;  %v1072_v37 = vadd.f32 %v1005_v36, %v574_v33  ;;  %v596_v35 = vld [vmem:[#allocation2 + $0x20] sm:$0xff] }
 0x157   : > { %1104 = vst [vmem:[#allocation2 + $0x80] sm:$0xff] %v1072_v37  ;;  %v955_v38 = vpop.f32.mrf.mxu2 }
 0x158   : > { %v1044_v40 = vpop.f32.mrf.mxu3 }
 0x159   : > { %v1045_v41 = vadd.f32 %v1044_v40, %v955_v38  ;;  %v917_v42 = vpop.f32.mrf.mxu0 }
 0x15a   : > { %v1006_v44 = vpop.f32.mrf.mxu1 }
 0x15b   : > { %v1088_v45 = vadd.f32 %v1045_v41, %v590_v39  ;;  %v1007_v46 = vadd.f32 %v1006_v44, %v917_v42  ;;  %v581_v39 = vld [vmem:[#allocation2 + $0x78] sm:$0xff] }
 0x15d   : > { %1120 = vst [vmem:[#allocation2 + $0xa8] sm:$0xff] %v1088_v45  ;;  %v1073_v47 = vadd.f32 %v1007_v46, %v575_v43  ;;  %v597_v45 = vld [vmem:[#allocation2 + $0x98] sm:$0xff] }
 0x15f   : > { %1105 = vst [vmem:[#allocation2 + $0x88] sm:$0xff] %v1073_v47  ;;  %v957_v48 = vpop.f32.mrf.mxu2 }
 0x160   : > { %v1046_v50 = vpop.f32.mrf.mxu3 }
 0x161   : > { %v1047_v51 = vadd.f32 %v1046_v50, %v957_v48  ;;  %v920_v52 = vpop.f32.mrf.mxu0 }
 0x162   : > { %v1009_v54 = vpop.f32.mrf.mxu1 }
 0x163   : > { %v1089_v55 = vadd.f32 %v1047_v51, %v591_v49  ;;  %v1010_v56 = vadd.f32 %v1009_v54, %v920_v52 }
 0x165   : > { %1121 = vst [vmem:[#allocation2 + $0xd0] sm:$0xff] %v1089_v55  ;;  %v1074_v57 = vadd.f32 %v1010_v56, %v576_v53 }
 0x167   : > { %1106 = vst [vmem:[#allocation2 + $0xe8] sm:$0xff] %v1074_v57  ;;  %v960_v58 = vpop.f32.mrf.mxu2 }
 0x168   : > { %v1049_v60 = vpop.f32.mrf.mxu3 }
 0x169   : > { %v1050_v61 = vadd.f32 %v1049_v60, %v960_v58  ;;  %v922_v62 = vpop.f32.mrf.mxu0 }
 0x16a   : > { %v1011_v0 = vpop.f32.mrf.mxu1 }
 0x16b   : > { %v1090_v1 = vadd.f32 %v1050_v61, %v592_v59  ;;  %v1012_v2 = vadd.f32 %v1011_v0, %v922_v62 }
 0x16d   : > { %1122 = vst [vmem:[#allocation2 + $0x10] sm:$0xff] %v1090_v1  ;;  %v1075_v3 = vadd.f32 %v1012_v2, %v577_v63 }
 0x16f   : > { %1107 = vst [vmem:[#allocation2 + $0xb8] sm:$0xff] %v1075_v3  ;;  %v962_v4 = vpop.f32.mrf.mxu2 }
 0x170   : > { %v1051_v6 = vpop.f32.mrf.mxu3 }
 0x171   : > { %v1052_v7 = vadd.f32 %v1051_v6, %v962_v4  ;;  %v925_v8 = vpop.f32.mrf.mxu0 }
 0x172   : > { %v1014_v10 = vpop.f32.mrf.mxu1 }
 0x173   : > { %v1091_v11 = vadd.f32 %v1052_v7, %v593_v5  ;;  %v1015_v12 = vadd.f32 %v1014_v10, %v925_v8 }
 0x175   : > { %1123 = vst [vmem:[#allocation2 + $0x28] sm:$0xff] %v1091_v11  ;;  %v1076_v13 = vadd.f32 %v1015_v12, %v578_v9 }
 0x177   : > { %1108 = vst [vmem:[#allocation2 + $0x60] sm:$0xff] %v1076_v13  ;;  %v965_v14 = vpop.f32.mrf.mxu2 }
 0x178   : > { %v1054_v16 = vpop.f32.mrf.mxu3 }
 0x179   : > { %v1055_v17 = vadd.f32 %v1054_v16, %v965_v14  ;;  %v927_v18 = vpop.f32.mrf.mxu0 }
 0x17a   : > { %v1016_v20 = vpop.f32.mrf.mxu1 }
 0x17b   : > { %v1092_v21 = vadd.f32 %v1055_v17, %v594_v15  ;;  %v1017_v22 = vadd.f32 %v1016_v20, %v927_v18 }
 0x17d   : > { %1124 = vst [vmem:[#allocation2 + $0xa0] sm:$0xff] %v1092_v21  ;;  %v1077_v23 = vadd.f32 %v1017_v22, %v579_v19 }
 0x17f   : > { %1109 = vst [vmem:[#allocation2 + $0xf0] sm:$0xff] %v1077_v23  ;;  %v967_v24 = vpop.f32.mrf.mxu2 }
 0x180   : > { %v1056_v26 = vpop.f32.mrf.mxu3 }
 0x181   : > { %v1057_v27 = vadd.f32 %v1056_v26, %v967_v24  ;;  %v930_v28 = vpop.f32.mrf.mxu0 }
 0x182   : > { %v1019_v30 = vpop.f32.mrf.mxu1 }
 0x183   : > { %v1093_v31 = vadd.f32 %v1057_v27, %v595_v25  ;;  %v1020_v32 = vadd.f32 %v1019_v30, %v930_v28 }
 0x185   : > { %1125 = vst [vmem:[#allocation2 + $0xf8] sm:$0xff] %v1093_v31  ;;  %v1078_v33 = vadd.f32 %v1020_v32, %v580_v29 }
 0x187   : > { %1110 = vst [vmem:[#allocation2 + $0x8] sm:$0xff] %v1078_v33  ;;  %v970_v34 = vpop.f32.mrf.mxu2 }
 0x188   : > { %v1059_v36 = vpop.f32.mrf.mxu3 }
 0x189   : > { %v1060_v37 = vadd.f32 %v1059_v36, %v970_v34  ;;  %v932_v38 = vpop.f32.mrf.mxu0 }
 0x18a   : > { %v1021_v40 = vpop.f32.mrf.mxu1 }
 0x18b   : > { %v1094_v41 = vadd.f32 %v1060_v37, %v596_v35  ;;  %v1022_v42 = vadd.f32 %v1021_v40, %v932_v38 }
 0x18d   : > { %1126 = vst [vmem:[#allocation2 + $0x20] sm:$0xff] %v1094_v41  ;;  %v1079_v43 = vadd.f32 %v1022_v42, %v581_v39 }
 0x18f   : > { %1111 = vst [vmem:[#allocation2 + $0x78] sm:$0xff] %v1079_v43  ;;  %v972_v44 = vpop.f32.mrf.mxu2 }
 0x190   : > { %v1061_v46 = vpop.f32.mrf.mxu3 }
 0x191   : > { %v1062_v47 = vadd.f32 %v1061_v46, %v972_v44  ;;  %1131 = sbr.rel (%p2096_p13) target bundleno = 689 (0x2b1), region = 90 }
 0x193   : > { %v1095_v48 = vadd.f32 %v1062_v47, %v597_v45 }
 0x195   : > { %1127 = vst [vmem:[#allocation2 + $0x98] sm:$0xff] %v1095_v48 }
 0x196   : > { %v1278_v49 = vld [vmem:[%s3201_s4 + $0x78] sm:$0xff]  ;;  %v1277_v50 = vld [vmem:[%s3201_s4 + $0x70] sm:$0xff]  ;;  %v1276_v51 = vld [vmem:[%s3201_s4 + $0x68] sm:$0xff]  ;;  %v2779_v62 = vstv %s1133_s25  ;;  %s2097_s25 = sshll.u32 %s2441_s29, 8 }
 0x197   : > { %1283 = vmatpush.msra.mxu0 %v1278_v49  ;;  %2292 = vmatpush.msra.mxu1 %v1278_v49  ;;  %v1275_v52 = vld [vmem:[%s3201_s4 + $0x60] sm:$0xff]  ;;  %v1274_v53 = vld [vmem:[%s3201_s4 + $0x58] sm:$0xff]  ;;  %v1273_v54 = vld [vmem:[%s3201_s4 + $0x50] sm:$0xff] }
 0x198   : > { %2293 = vmatpush.msra.mxu2 %v1278_v49  ;;  %2294 = vmatpush.msra.mxu3 %v1278_v49  ;;  %v1272_v55 = vld [vmem:[%s3201_s4 + $0x48] sm:$0xff]  ;;  %v1271_v56 = vld [vmem:[%s3201_s4 + $0x40] sm:$0xff]  ;;  %v1270_v57 = vld [vmem:[%s3201_s4 + $0x38] sm:$0xff] }
 0x199   : > { %1284 = vmatpush.msra.mxu0 %v1277_v50  ;;  %2295 = vmatpush.msra.mxu1 %v1277_v50  ;;  %v1269_v58 = vld [vmem:[%s3201_s4 + $0x30] sm:$0xff]  ;;  %v1268_v59 = vld [vmem:[%s3201_s4 + $0x28] sm:$0xff]  ;;  %v1267_v60 = vld [vmem:[%s3201_s4 + $0x20] sm:$0xff] }
 0x19a   : > { %2296 = vmatpush.msra.mxu2 %v1277_v50  ;;  %2297 = vmatpush.msra.mxu3 %v1277_v50  ;;  %v1134_v61 = vld [vmem:[%s2637_s20] sm:$0xff]  ;;  %v1266_v0 = vld [vmem:[%s3201_s4 + $0x18] sm:$0xff]  ;;  %v1265_v2 = vld [vmem:[%s3201_s4 + $0x10] sm:$0xff] }
 0x19b   : > { %1285 = vmatpush.msra.mxu0 %v1276_v51  ;;  %2298 = vmatpush.msra.mxu1 %v1276_v51  ;;  %v1142_v63 = vld [vmem:[%s2637_s20 + $0x40] sm:$0xff]  ;;  %v1167_v3 = vmul.f32 %v2779_v62, %v1134_v61  ;;  %v1199_v5 = vld [vmem:[#allocation2 + $0xb0] sm:$0xff]  ;;  %v1264_v7 = vld [vmem:[%s3201_s4 + $0x8] sm:$0xff] }
 0x19c   : > { %2299 = vmatpush.msra.mxu2 %v1276_v51  ;;  %2300 = vmatpush.msra.mxu3 %v1276_v51  ;;  %v1150_v1 = vld [vmem:[%s2637_s20 + $0x80] sm:$0xff]  ;;  %v1175_v4 = vmul.f32 %v2779_v62, %v1142_v63  ;;  %v1215_v9 = vld [vmem:[#allocation2 + $0x38] sm:$0xff]  ;;  %v1135_v13 = vld [vmem:[%s2637_s20 + $0x8] sm:$0xff] }
 0x19d   : > { %1286 = vmatpush.msra.mxu0 %v1275_v52  ;;  %2301 = vmatpush.msra.mxu1 %v1275_v52  ;;  %v1207_v6 = vld [vmem:[#allocation2 + $0x80] sm:$0xff]  ;;  %v1183_v8 = vmul.f32 %v2779_v62, %v1150_v1  ;;  %v1231_v11 = vadd.f32 %v1199_v5, %v1167_v3  ;;  %v1143_v14 = vld [vmem:[%s2637_s20 + $0x48] sm:$0xff]  ;;  %v1168_v20 = vmul.f32 %v2779_v62, %v1135_v13  ;;  %v1216_v26 = vld [vmem:[#allocation2 + $0x58] sm:$0xff] }
 0x19e   : > { %2302 = vmatpush.msra.mxu2 %v1275_v52  ;;  %2303 = vmatpush.msra.mxu3 %v1275_v52  ;;  %v1263_v10 = vld [vmem:[%s3201_s4] sm:$0xff]  ;;  %v1239_v12 = vadd.f32 %v1207_v6, %v1175_v4  ;;  %v1151_v18 = vld [vmem:[%s2637_s20 + $0x88] sm:$0xff]  ;;  %v1176_v21 = vmul.f32 %v2779_v62, %v1143_v14  ;;  %v1136_v29 = vld [vmem:[%s2637_s20 + $0x10] sm:$0xff] }
 0x19f   : > { %1287 = vmatpush.msra.mxu0 %v1274_v53  ;;  %2304 = vmatpush.msra.mxu1 %v1274_v53  ;;  %v1158_v15 = vld [vmem:[%s2637_s20 + $0xc0] sm:$0xff]  ;;  %v1247_v16 = vadd.f32 %v1215_v9, %v1183_v8  ;;  %v1223_v19 = vld [vmem:[#allocation2 + $0xa8] sm:$0xff]  ;;  %v1184_v25 = vmul.f32 %v2779_v62, %v1151_v18  ;;  %v1144_v30 = vld [vmem:[%s2637_s20 + $0x50] sm:$0xff]  ;;  %v1169_v36 = vmul.f32 %v2779_v62, %v1136_v29 }
 0x1a0   : > { %2305 = vmatpush.msra.mxu2 %v1274_v53  ;;  %2306 = vmatpush.msra.mxu3 %v1274_v53  ;;  %v1191_v17 = vmul.f32 %v2779_v62, %v1158_v15  ;;  %v1200_v23 = vld [vmem:[#allocation2] sm:$0xff]  ;;  %v1208_v24 = vld [vmem:[#allocation2 + $0x88] sm:$0xff]  ;;  %v1152_v34 = vld [vmem:[%s2637_s20 + $0x90] sm:$0xff]  ;;  %v1177_v37 = vmul.f32 %v2779_v62, %v1144_v30 }
 0x1a1   : > { %1288 = vmatpush.msra.mxu0 %v1273_v54  ;;  %2307 = vmatpush.msra.mxu1 %v1273_v54  ;;  %v1232_v27 = vadd.f32 %v1200_v23, %v1168_v20  ;;  %v1240_v28 = vadd.f32 %v1208_v24, %v1176_v21  ;;  %v1159_v31 = vld [vmem:[%s2637_s20 + $0xc8] sm:$0xff]  ;;  %v1248_v32 = vadd.f32 %v1216_v26, %v1184_v25  ;;  %v1224_v35 = vld [vmem:[#allocation2 + $0xd0] sm:$0xff]  ;;  %v1201_v39 = vld [vmem:[#allocation2 + $0xd8] sm:$0xff] }
 0x1a2   : > { %2308 = vmatpush.msra.mxu2 %v1273_v54  ;;  %2309 = vmatpush.msra.mxu3 %v1273_v54  ;;  %v1255_v22 = vadd.f32 %v1223_v19, %v1191_v17  ;;  %v1192_v33 = vmul.f32 %v2779_v62, %v1159_v31  ;;  %v1209_v40 = vld [vmem:[#allocation2 + $0xe8] sm:$0xff]  ;;  %v1185_v41 = vmul.f32 %v2779_v62, %v1152_v34  ;;  %v1217_v42 = vld [vmem:[#allocation2 + $0x40] sm:$0xff]  ;;  %v1137_v45 = vld [vmem:[%s2637_s20 + $0x18] sm:$0xff] }
 0x1a3   : > { %1289 = vmatpush.msra.mxu0 %v1272_v55  ;;  %2310 = vmatpush.msra.mxu1 %v1272_v55  ;;  %v1233_v43 = vadd.f32 %v1201_v39, %v1169_v36  ;;  %v1241_v44 = vadd.f32 %v1209_v40, %v1177_v37  ;;  %v1145_v46 = vld [vmem:[%s2637_s20 + $0x58] sm:$0xff]  ;;  %v1160_v47 = vld [vmem:[%s2637_s20 + $0xd0] sm:$0xff]  ;;  %v1170_v52 = vmul.f32 %v2779_v62, %v1137_v45  ;;  %v1138_v61 = vld [vmem:[%s2637_s20 + $0x20] sm:$0xff] }
 0x1a4   : > { %2311 = vmatpush.msra.mxu2 %v1272_v55  ;;  %2312 = vmatpush.msra.mxu3 %v1272_v55  ;;  %v1256_v38 = vadd.f32 %v1224_v35, %v1192_v33  ;;  %v1249_v48 = vadd.f32 %v1217_v42, %v1185_v41  ;;  %v1193_v49 = vmul.f32 %v2779_v62, %v1160_v47  ;;  %v1153_v50 = vld [vmem:[%s2637_s20 + $0x98] sm:$0xff]  ;;  %v1225_v51 = vld [vmem:[#allocation2 + $0x10] sm:$0xff]  ;;  %v1146_v63 = vld [vmem:[%s2637_s20 + $0x60] sm:$0xff] }
 0x1a5   : > { %1290 = vmatpush.msra.mxu0 %v1271_v56  ;;  %2313 = vmatpush.msra.mxu1 %v1271_v56  ;;  %v1178_v53 = vmul.f32 %v2779_v62, %v1145_v46  ;;  %v1202_v55 = vld [vmem:[#allocation2 + $0x18] sm:$0xff]  ;;  %v1154_v3 = vld [vmem:[%s2637_s20 + $0xa0] sm:$0xff]  ;;  %v1226_v4 = vld [vmem:[#allocation2 + $0x28] sm:$0xff]  ;;  %v1171_v5 = vmul.f32 %v2779_v62, %v1138_v61  ;;  %v1179_v6 = vmul.f32 %v2779_v62, %v1146_v63 }
 0x1a6   : > { %2314 = vmatpush.msra.mxu2 %v1271_v56  ;;  %2315 = vmatpush.msra.mxu3 %v1271_v56  ;;  %v1257_v54 = vadd.f32 %v1225_v51, %v1193_v49  ;;  %v1210_v56 = vld [vmem:[#allocation2 + $0xb8] sm:$0xff]  ;;  %v1203_v8 = vld [vmem:[#allocation2 + $0x50] sm:$0xff]  ;;  %v1211_v9 = vld [vmem:[#allocation2 + $0x60] sm:$0xff] }
 0x1a7   : > { %1291 = vmatpush.msra.mxu0 %v1270_v57  ;;  %2316 = vmatpush.msra.mxu1 %v1270_v57  ;;  %v1219_v13 = vld [vmem:[#allocation2 + $0xe0] sm:$0xff]  ;;  %v1235_v15 = vadd.f32 %v1203_v8, %v1171_v5  ;;  %v1139_v17 = vld [vmem:[%s2637_s20 + $0x28] sm:$0xff]  ;;  %v1212_v26 = vld [vmem:[#allocation2 + $0xf0] sm:$0xff] }
 0x1a8   : > { %2317 = vmatpush.msra.mxu2 %v1270_v57  ;;  %2318 = vmatpush.msra.mxu3 %v1270_v57  ;;  %v1186_v57 = vmul.f32 %v2779_v62, %v1153_v50  ;;  %v1227_v14 = vld [vmem:[#allocation2 + $0xa0] sm:$0xff]  ;;  %v1147_v18 = vld [vmem:[%s2637_s20 + $0x68] sm:$0xff]  ;;  %v1172_v23 = vmul.f32 %v2779_v62, %v1139_v17  ;;  %v1220_v29 = vld [vmem:[#allocation2 + $0x90] sm:$0xff] }
 0x1a9   : > { %1292 = vmatpush.msra.mxu0 %v1269_v58  ;;  %2319 = vmatpush.msra.mxu1 %v1269_v58  ;;  %v1155_v21 = vld [vmem:[%s2637_s20 + $0xa8] sm:$0xff]  ;;  %v1180_v24 = vmul.f32 %v2779_v62, %v1147_v18  ;;  %v1228_v30 = vld [vmem:[#allocation2 + $0xf8] sm:$0xff]  ;;  %v1140_v33 = vld [vmem:[%s2637_s20 + $0x30] sm:$0xff] }
 0x1aa   : > { %2320 = vmatpush.msra.mxu2 %v1269_v58  ;;  %2321 = vmatpush.msra.mxu3 %v1269_v58  ;;  %v1218_v58 = vld [vmem:[#allocation2 + $0xc8] sm:$0xff]  ;;  %v1148_v34 = vld [vmem:[%s2637_s20 + $0x70] sm:$0xff]  ;;  %v1173_v39 = vmul.f32 %v2779_v62, %v1140_v33  ;;  %v1229_v46 = vld [vmem:[#allocation2 + $0x20] sm:$0xff] }
 0x1ab   : > { %1293 = vmatpush.msra.mxu0 %v1268_v59  ;;  %2322 = vmatpush.msra.mxu1 %v1268_v59  ;;  %v1250_v1 = vadd.f32 %v1218_v58, %v1186_v57  ;;  %v1204_v25 = vld [vmem:[#allocation2 + $0x68] sm:$0xff]  ;;  %v1156_v37 = vld [vmem:[%s2637_s20 + $0xb0] sm:$0xff]  ;;  %v1181_v40 = vmul.f32 %v2779_v62, %v1148_v34  ;;  %v1141_v49 = vld [vmem:[%s2637_s20 + $0x38] sm:$0xff] }
 0x1ac   : > { %2323 = vmatpush.msra.mxu2 %v1268_v59  ;;  %2324 = vmatpush.msra.mxu3 %v1268_v59  ;;  %v1234_v59 = vadd.f32 %v1202_v55, %v1170_v52  ;;  %v1236_v31 = vadd.f32 %v1204_v25, %v1172_v23  ;;  %v1205_v41 = vld [vmem:[#allocation2 + $0x30] sm:$0xff]  ;;  %v1213_v42 = vld [vmem:[#allocation2 + $0x8] sm:$0xff]  ;;  %v1149_v50 = vld [vmem:[%s2637_s20 + $0x78] sm:$0xff]  ;;  %v1174_v55 = vmul.f32 %v2779_v62, %v1141_v49  ;;  %v1461_v23 = vlaneseq }
 0x1ad   : > { %1294 = vmatpush.msra.mxu0 %v1267_v60  ;;  %2325 = vmatpush.msra.mxu1 %v1267_v60  ;;  %v1221_v45 = vld [vmem:[#allocation2 + $0x70] sm:$0xff]  ;;  %v1237_v47 = vadd.f32 %v1205_v41, %v1173_v39  ;;  %v1206_v57 = vld [vmem:[#allocation2 + $0x48] sm:$0xff]  ;;  %v1214_v58 = vld [vmem:[#allocation2 + $0x78] sm:$0xff] }
 0x1ae   : > { %2326 = vmatpush.msra.mxu2 %v1267_v60  ;;  %2327 = vmatpush.msra.mxu3 %v1267_v60  ;;  %v1242_v60 = vadd.f32 %v1210_v56, %v1178_v53  ;;  %v1157_v53 = vld [vmem:[%s2637_s20 + $0xb8] sm:$0xff]  ;;  %v1182_v56 = vmul.f32 %v2779_v62, %v1149_v50  ;;  %v1222_v61 = vld [vmem:[#allocation2 + $0xc0] sm:$0xff] }
 0x1af   : > { %1295 = vmatpush.msra.mxu0 %v1266_v0  ;;  %2328 = vmatpush.msra.mxu1 %v1266_v0  ;;  %v1230_v63 = vld [vmem:[#allocation2 + $0x98] sm:$0xff] }
 0x1b0   : > { %2329 = vmatpush.msra.mxu2 %v1266_v0  ;;  %2330 = vmatpush.msra.mxu3 %v1266_v0  ;;  %v1161_v0 = vld [vmem:[%s2637_s20 + $0xd8] sm:$0xff] }
 0x1b1   : > { %1296 = vmatpush.msra.mxu0 %v1265_v2  ;;  %2331 = vmatpush.msra.mxu1 %v1265_v2 }
 0x1b2   : > { %2332 = vmatpush.msra.mxu2 %v1265_v2  ;;  %2333 = vmatpush.msra.mxu3 %v1265_v2  ;;  %v1194_v2 = vmul.f32 %v2779_v62, %v1161_v0  ;;  %v1238_v0 = vadd.f32 %v1206_v57, %v1174_v55 }
 0x1b3   : > { %1297 = vmatpush.msra.mxu0 %v1264_v7  ;;  %2334 = vmatpush.msra.mxu1 %v1264_v7 }
 0x1b4   : > { %2335 = vmatpush.msra.mxu2 %v1264_v7  ;;  %2336 = vmatpush.msra.mxu3 %v1264_v7  ;;  %v1258_v7 = vadd.f32 %v1226_v4, %v1194_v2 }
 0x1b5   : > { %1298 = vmatpush.msra.mxu0 %v1263_v10  ;;  %2337 = vmatpush.msra.mxu1 %v1263_v10 }
 0x1b6   : > { %1299 = vmatmul.f32.vlgmr.msra.gmra.mxu0 %v1231_v11  ;;  %1323 = vmatmul.f32.vlgmr.msra.gmra.mxu1 %v1239_v12  ;;  %v1187_v11 = vmul.f32 %v2779_v62, %v1154_v3 }
 0x1b7   : > { %2338 = vmatpush.msra.mxu2 %v1263_v10  ;;  %2339 = vmatpush.msra.mxu3 %v1263_v10  ;;  %v1162_v10 = vld [vmem:[%s2637_s20 + $0xe0] sm:$0xff] }
 0x1b8   : > { %1347 = vmatmul.f32.vlgmr.msra.gmra.mxu2 %v1247_v16  ;;  %1371 = vmatmul.f32.vlgmr.msra.gmra.mxu3 %v1255_v22  ;;  %v1195_v12 = vmul.f32 %v2779_v62, %v1162_v10  ;;  %v1243_v16 = vadd.f32 %v1211_v9, %v1179_v6  ;;  %v1251_v19 = vadd.f32 %v1219_v13, %v1187_v11  ;;  %v1163_v22 = vld [vmem:[%s2637_s20 + $0xe8] sm:$0xff]  ;;  %v2859_v6 = vld [vmem:[%s3202_s5] ss:$0 sm:$0xff] }
 0x1ba   : > { %v1259_v20 = vadd.f32 %v1227_v14, %v1195_v12 }
 0x1be   : > { %1302 = vmatmul.f32.gmra.mxu0 %v1232_v27  ;;  %1326 = vmatmul.f32.gmra.mxu1 %v1240_v28  ;;  %v1188_v27 = vmul.f32 %v2779_v62, %v1155_v21  ;;  %v1196_v28 = vmul.f32 %v2779_v62, %v1163_v22 }
 0x1c0   : > { %1350 = vmatmul.f32.gmra.mxu2 %v1248_v32  ;;  %1374 = vmatmul.f32.gmra.mxu3 %v1256_v38  ;;  %v1244_v32 = vadd.f32 %v1212_v26, %v1180_v24  ;;  %v1252_v35 = vadd.f32 %v1220_v29, %v1188_v27  ;;  %v1260_v36 = vadd.f32 %v1228_v30, %v1196_v28  ;;  %v1164_v38 = vld [vmem:[%s2637_s20 + $0xf0] sm:$0xff]  ;;  %v2897_v27 = vshrl.u32 %v1461_v23, 7 }
 0x1c6   : > { %1305 = vmatmul.f32.gmra.mxu0 %v1233_v43  ;;  %1329 = vmatmul.f32.gmra.mxu1 %v1241_v44  ;;  %v1189_v43 = vmul.f32 %v2779_v62, %v1156_v37  ;;  %v1197_v44 = vmul.f32 %v2779_v62, %v1164_v38  ;;  %v1463_v37 = vadd.s32 8, %v2897_v27 }
 0x1c8   : > { %1353 = vmatmul.f32.gmra.mxu2 %v1249_v48  ;;  %1377 = vmatmul.f32.gmra.mxu3 %v1257_v54  ;;  %v1245_v48 = vadd.f32 %v1213_v42, %v1181_v40  ;;  %v1253_v51 = vadd.f32 %v1221_v45, %v1189_v43  ;;  %v1261_v52 = vadd.f32 %v1229_v46, %v1197_v44  ;;  %v1165_v54 = vld [vmem:[%s2637_s20 + $0xf8] sm:$0xff]  ;;  %v1464_v40 = vadd.s32 16, %v2897_v27 }
 0x1c9   : > { %v1465_v42 = vadd.s32 24, %v2897_v27  ;;  %v1470_v44 = vadd.s32 64, %v2897_v27  ;;  %v1471_v45 = vadd.s32 72, %v2897_v27 }
 0x1ce   : > { %1308 = vmatmul.f32.gmra.mxu0 %v1234_v59  ;;  %1332 = vmatmul.f32.gmra.mxu1 %v1242_v60  ;;  %v1190_v59 = vmul.f32 %v2779_v62, %v1157_v53  ;;  %v1198_v60 = vmul.f32 %v2779_v62, %v1165_v54 }
 0x1d0   : > { %1356 = vmatmul.f32.gmra.mxu2 %v1250_v1  ;;  %1380 = vmatmul.f32.gmra.mxu3 %v1258_v7  ;;  %v1246_v1 = vadd.f32 %v1214_v58, %v1182_v56  ;;  %v1254_v2 = vadd.f32 %v1222_v61, %v1190_v59  ;;  %v1262_v3 = vadd.f32 %v1230_v63, %v1198_v60  ;;  %v1467_v58 = vadd.s32 40, %v2897_v27 }
 0x1d1   : > { %v1468_v59 = vadd.s32 48, %v2897_v27  ;;  %v2456_v61 = vmov 0.0  }
 0x1d6   : > { %1311 = vmatmul.f32.gmra.mxu0 %v1235_v15  ;;  %1335 = vmatmul.f32.gmra.mxu1 %v1243_v16 }
 0x1d8   : > { %1359 = vmatmul.f32.gmra.mxu2 %v1251_v19  ;;  %1383 = vmatmul.f32.gmra.mxu3 %v1259_v20 }
 0x1de   : > { %1314 = vmatmul.f32.gmra.mxu0 %v1236_v31  ;;  %1338 = vmatmul.f32.gmra.mxu1 %v1244_v32 }
 0x1e0   : > { %1362 = vmatmul.f32.gmra.mxu2 %v1252_v35  ;;  %1386 = vmatmul.f32.gmra.mxu3 %v1260_v36  ;;  %v2912_v36 = vstv %s2097_s25 }
 0x1e1   : > { %v1495_v41 = vadd.s32 %v2912_v36, %v2897_v27  ;;  %v1496_v43 = vadd.s32 %v2912_v36, %v1463_v37  ;;  %v1497_v46 = vadd.s32 %v2912_v36, %v1464_v40  ;;  %v1498_v49 = vadd.s32 %v2912_v36, %v1465_v42 }
 0x1e2   : > { %v1503_v55 = vadd.s32 %v2912_v36, %v1470_v44  ;;  %v1504_v56 = vadd.s32 %v2912_v36, %v1471_v45  ;;  %v1469_v44 = vadd.s32 56, %v2897_v27 }
 0x1e3   : > { %vm1527_vm0 = vcmp.lt.s32.totalorder %v1495_v41, 300  ;;  %vm1528_vm1 = vcmp.lt.s32.totalorder %v1496_v43, 300  ;;  %vm1529_vm2 = vcmp.lt.s32.totalorder %v1497_v46, 300  ;;  %vm1530_vm3 = vcmp.lt.s32.totalorder %v1498_v49, 300 }
 0x1e4   : > { %v2099_v63 = vsel %vm1528_vm1, 1.0, %v2456_v61  ;;  %vm1535_vm4 = vcmp.lt.s32.totalorder %v1503_v55, 300  ;;  %vm1536_vm5 = vcmp.lt.s32.totalorder %v1504_v56, 300 }
 0x1e5   : > { %v2106_v40 = vsel %vm1535_vm4, 1.0, %v2456_v61  ;;  %v2983_v41 = vsel %vm1536_vm5, 1.0, %v2456_v61 }
 0x1e6   : > { %1317 = vmatmul.f32.gmra.mxu0 %v1237_v47  ;;  %1341 = vmatmul.f32.gmra.mxu1 %v1245_v48 }
 0x1e8   : > { %1365 = vmatmul.f32.gmra.mxu2 %v1253_v51  ;;  %1389 = vmatmul.f32.gmra.mxu3 %v1261_v52  ;;  %v1466_v52 = vadd.s32 32, %v2897_v27 }
 0x1ee   : > { %1320 = vmatmul.f32.gmra.mxu0 %v1238_v0  ;;  %1344 = vmatmul.f32.gmra.mxu1 %v1246_v1  ;;  %v2098_v1 = vsel %vm1527_vm0, 1.0, %v2456_v61 }
 0x1f0   : > { %1368 = vmatmul.f32.gmra.mxu2 %v1254_v2  ;;  %1392 = vmatmul.f32.gmra.mxu3 %v1262_v3  ;;  %v1472_v2 = vadd.s32 80, %v2897_v27  ;;  %v1478_v3 = vadd.s32 128, %v2897_v27 }
 0x233   : > { %v1300_v4 = vpop.f32.mrf.mxu0  ;;  %v1324_v5 = vpop.f32.mrf.mxu1 }
 0x234   : > { %v2862_v8 = vadd.f32 %v2859_v6, %v1300_v4  ;;  %v2868_v10 = vadd.f32 %v2859_v6, %v1324_v5  ;;  %v1499_v4 = vadd.s32 %v2912_v36, %v1466_v52  ;;  %v2100_v5 = vsel %vm1529_vm2, 1.0, %v2456_v61 }
 0x236   : > { %vm1531_vm6 = vcmp.lt.s32.totalorder %v1499_v4, 300 }
 0x237   : > { %v2102_v43 = vsel %vm1531_vm6, 1.0, %v2456_v61 }
 0x23b   : > { %v1303_v62 = vpop.f32.mrf.mxu0  ;;  %v1327_v7 = vpop.f32.mrf.mxu1 }
 0x23c   : > { %v2865_v9 = vadd.f32 %v2859_v6, %v1303_v62  ;;  %v2871_v11 = vadd.f32 %v2859_v6, %v1327_v7  ;;  %v1348_v12 = vpop.f32.mrf.mxu2  ;;  %v1372_v13 = vpop.f32.mrf.mxu3 }
 0x23d   : > { %v2880_v20 = vadd.f32 %v2859_v6, %v1348_v12  ;;  %v2891_v25 = vadd.f32 %v2859_v6, %v1372_v13  ;;  %v2101_v12 = vsel %vm1530_vm3, 1.0, %v2456_v61 }
 0x23e   : > { %v2184_v14 = vpack.c.bf16 %v2865_v9, %v2862_v8  ;;  %v2204_v15 = vpack.c.bf16 %v2871_v11, %v2868_v10  ;;  %v1624_v7 = vmul.f32 %v2099_v63, %v2865_v9 }
 0x240   : > { %2185 = vst [vmem:[%s2642_s23] sm:$0xff] %v2184_v14   ;;  %v1500_v14 = vadd.s32 %v2912_v36, %v1467_v58 }
 0x241   : > { %2264 = vst [vmem:[%s2642_s23 + $0x20] sm:$0xff] %v2204_v15   ;;  %v1501_v15 = vadd.s32 %v2912_v36, %v1468_v59 }
 0x242   : > { %vm1532_vm7 = vcmp.lt.s32.totalorder %v1500_v14, 300 }
 0x243   : > { %v1306_v16 = vpop.f32.mrf.mxu0  ;;  %v1330_v17 = vpop.f32.mrf.mxu1  ;;  %vm1533_vm8 = vcmp.lt.s32.totalorder %v1501_v15, 300  ;;  %v2103_v49 = vsel %vm1532_vm7, 1.0, %v2456_v61 }
 0x244   : > { %v1351_v18 = vpop.f32.mrf.mxu2  ;;  %v1375_v19 = vpop.f32.mrf.mxu3  ;;  %v2901_v30 = vadd.f32 %v2859_v6, %v1306_v16  ;;  %v2907_v32 = vadd.f32 %v2859_v6, %v1330_v17  ;;  %v2104_v56 = vsel %vm1533_vm8, 1.0, %v2456_v61 }
 0x245   : > { %v2883_v21 = vadd.f32 %v2859_v6, %v1351_v18  ;;  %v2886_v22 = vadd.f32 %v2859_v6, %v1375_v19 }
 0x247   : > { %v2224_v24 = vpack.c.bf16 %v2883_v21, %v2880_v20  ;;  %v2244_v26 = vpack.c.bf16 %v2886_v22, %v2891_v25 }
 0x249   : > { %2268 = vst [vmem:[%s2642_s23 + $0x40] sm:$0xff] %v2224_v24  }
 0x24a   : > { %2272 = vst [vmem:[%s2642_s23 + $0x60] sm:$0xff] %v2244_v26  }
 0x24b   : > { %v1309_v28 = vpop.f32.mrf.mxu0  ;;  %v1333_v29 = vpop.f32.mrf.mxu1 }
 0x24c   : > { %v2904_v31 = vadd.f32 %v2859_v6, %v1309_v28  ;;  %v2910_v33 = vadd.f32 %v2859_v6, %v1333_v29  ;;  %v1354_v34 = vpop.f32.mrf.mxu2  ;;  %v1378_v35 = vpop.f32.mrf.mxu3  ;;  %v1623_v28 = vmul.f32 %v2098_v1, %v2862_v8  ;;  %v1505_v29 = vadd.s32 %v2912_v36, %v1472_v2 }
 0x24d   : > { %v2932_v53 = vadd.f32 %v2859_v6, %v1354_v34  ;;  %v2948_v0 = vadd.f32 %v2859_v6, %v1378_v35  ;;  %v1511_v34 = vadd.s32 %v2912_v36, %v1478_v3  ;;  %v1625_v35 = vmul.f32 %v2100_v5, %v2901_v30 }
 0x24e   : > { %v2189_v38 = vpack.c.bf16 %v2904_v31, %v2901_v30  ;;  %v2209_v39 = vpack.c.bf16 %v2910_v33, %v2907_v32  ;;  %v1626_v42 = vmul.f32 %v2101_v12, %v2904_v31  ;;  %v1693_v45 = vmul.f32 %v1623_v28, %v2862_v8 }
 0x24f   : > { %v1655_v46 = vadd.f32 %v1624_v7, %v1623_v28  ;;  %vm1537_vm9 = vcmp.lt.s32.totalorder %v1505_v29, 300  ;;  %vm1543_vm10 = vcmp.lt.s32.totalorder %v1511_v34, 300  ;;  %v1475_v12 = vadd.s32 104, %v2897_v27 }
 0x250   : > { %2261 = vst [vmem:[%s2642_s23 + $0x8] sm:$0xff] %v2189_v38   ;;  %v1696_v8 = vmul.f32 %v1626_v42, %v2904_v31 }
 0x251   : > { %2265 = vst [vmem:[%s2642_s23 + $0x28] sm:$0xff] %v2209_v39   ;;  %v1694_v39 = vmul.f32 %v1624_v7, %v2865_v9  ;;  %v1695_v9 = vmul.f32 %v1625_v35, %v2901_v30  ;;  %v1474_v7 = vadd.s32 96, %v2897_v27  ;;  %v1508_v29 = vadd.s32 %v2912_v36, %v1475_v12 }
 0x253   : > { %v1312_v47 = vpop.f32.mrf.mxu0  ;;  %v1336_v48 = vpop.f32.mrf.mxu1  ;;  %vm1540_vm14 = vcmp.lt.s32.totalorder %v1508_v29, 300 }
 0x254   : > { %v1357_v50 = vpop.f32.mrf.mxu2  ;;  %v1381_v51 = vpop.f32.mrf.mxu3  ;;  %v1313_v17 = vadd.f32 %v2859_v6, %v1312_v47  ;;  %v2966_v19 = vadd.f32 %v2859_v6, %v1336_v48  ;;  %v1473_v47 = vadd.s32 88, %v2897_v27  ;;  %v1479_v48 = vadd.s32 136, %v2897_v27 }
 0x255   : > { %v2935_v54 = vadd.f32 %v2859_v6, %v1357_v50  ;;  %v2940_v57 = vadd.f32 %v2859_v6, %v1381_v51  ;;  %v1725_v50 = vadd.f32 %v1694_v39, %v1693_v45  ;;  %v1656_v51 = vadd.f32 %v1655_v46, %v1625_v35 }
 0x256   : > { %v1627_v52 = vmul.f32 %v2102_v43, %v1313_v17  ;;  %v1631_v35 = vmul.f32 %v2106_v40, %v2868_v10  ;;  %v3027_v39 = vadd.s32 %v2912_v36, %v1479_v48  ;;  %v1476_v40 = vadd.s32 112, %v2897_v27 }
 0x257   : > { %v2229_v60 = vpack.c.bf16 %v2935_v54, %v2932_v53  ;;  %v2249_v62 = vpack.c.bf16 %v2940_v57, %v2948_v0  ;;  %v1726_v31 = vadd.f32 %v1725_v50, %v1695_v9 }
 0x258   : > { %v1697_v14 = vmul.f32 %v1627_v52, %v1313_v17  ;;  %v1509_v12 = vadd.s32 %v2912_v36, %v1476_v40  ;;  %vm1544_vm15 = vcmp.lt.s32.totalorder %v3027_v39, 300 }
 0x259   : > { %2269 = vst [vmem:[%s2642_s23 + $0x48] sm:$0xff] %v2229_v60   ;;  %v1502_v60 = vadd.s32 %v2912_v36, %v1469_v44 }
 0x25a   : > { %2273 = vst [vmem:[%s2642_s23 + $0x68] sm:$0xff] %v2249_v62   ;;  %v1506_v62 = vadd.s32 %v2912_v36, %v1473_v47  ;;  %vm1541_vm0 = vcmp.lt.s32.totalorder %v1509_v12, 300 }
 0x25b   : > { %v1315_v13 = vpop.f32.mrf.mxu0  ;;  %v1339_v16 = vpop.f32.mrf.mxu1  ;;  %vm1534_vm11 = vcmp.lt.s32.totalorder %v1502_v60, 300 }
 0x25c   : > { %v1316_v18 = vadd.f32 %v2859_v6, %v1315_v13  ;;  %v2969_v23 = vadd.f32 %v2859_v6, %v1339_v16  ;;  %v1360_v24 = vpop.f32.mrf.mxu2  ;;  %v1384_v26 = vpop.f32.mrf.mxu3  ;;  %v1657_v13 = vadd.f32 %v1656_v51, %v1626_v42  ;;  %vm1538_vm12 = vcmp.lt.s32.totalorder %v1506_v62, 300 }
 0x25d   : > { %v3000_v30 = vadd.f32 %v2859_v6, %v1360_v24  ;;  %v3006_v4 = vadd.f32 %v2859_v6, %v1384_v26  ;;  %v2108_v24 = vsel %vm1537_vm9, 1.0, %v2456_v61  ;;  %v3022_v26 = vsel %vm1543_vm10, 1.0, %v2456_v61 }
 0x25e   : > { %v2194_v37 = vpack.c.bf16 %v1316_v18, %v1313_v17  ;;  %v2214_v38 = vpack.c.bf16 %v2969_v23, %v2966_v19  ;;  %v1628_v2 = vmul.f32 %v2103_v49, %v1316_v18  ;;  %v1658_v17 = vadd.f32 %v1657_v13, %v1627_v52 }
 0x25f   : > { %v1507_v42 = vadd.s32 %v2912_v36, %v1474_v7  ;;  %v2105_v45 = vsel %vm1534_vm11, 1.0, %v2456_v61  ;;  %v1632_v51 = vmul.f32 %v2983_v41, %v2871_v11  ;;  %v1701_v13 = vmul.f32 %v1631_v35, %v2868_v10 }
 0x260   : > { %2262 = vst [vmem:[%s2642_s23 + $0x10] sm:$0xff] %v2194_v37   ;;  %v1727_v37 = vadd.f32 %v1726_v31, %v1696_v8  ;;  %v1659_v43 = vadd.f32 %v1658_v17, %v1628_v2  ;;  %v2111_v10 = vsel %vm1540_vm14, 1.0, %v2456_v61 }
 0x261   : > { %2266 = vst [vmem:[%s2642_s23 + $0x30] sm:$0xff] %v2214_v38   ;;  %v1698_v38 = vmul.f32 %v1628_v2, %v1316_v18  ;;  %vm1539_vm13 = vcmp.lt.s32.totalorder %v1507_v42, 300  ;;  %v1481_v2 = vadd.s32 152, %v2897_v27 }
 0x262   : > { %v1728_v34 = vadd.f32 %v1727_v37, %v1697_v14  ;;  %v2109_v14 = vsel %vm1538_vm12, 1.0, %v2456_v61  ;;  %v2110_v17 = vsel %vm1539_vm13, 1.0, %v2456_v61 }
 0x263   : > { %v1318_v55 = vpop.f32.mrf.mxu0  ;;  %v1342_v58 = vpop.f32.mrf.mxu1  ;;  %v1634_v62 = vmul.f32 %v2109_v14, %v2910_v33 }
 0x264   : > { %v1319_v59 = vadd.f32 %v2859_v6, %v1318_v55  ;;  %v1363_v63 = vpop.f32.mrf.mxu2  ;;  %v1387_v1 = vpop.f32.mrf.mxu3  ;;  %v3036_v47 = vadd.f32 %v2859_v6, %v1342_v58  ;;  %v1729_v52 = vadd.f32 %v1728_v34, %v1698_v38  ;;  %v1480_v55 = vadd.s32 144, %v2897_v27 }
 0x265   : > { %v3003_v3 = vadd.f32 %v2859_v6, %v1363_v63  ;;  %v3009_v5 = vadd.f32 %v2859_v6, %v1387_v1  ;;  %v1633_v1 = vmul.f32 %v2108_v24, %v2907_v32 }
 0x266   : > { %v1629_v28 = vmul.f32 %v2104_v56, %v1319_v59  ;;  %v1477_v56 = vadd.s32 120, %v2897_v27 }
 0x267   : > { %v2234_v15 = vpack.c.bf16 %v3003_v3, %v3000_v30  ;;  %v2254_v16 = vpack.c.bf16 %v3009_v5, %v3006_v4  ;;  %v1703_v37 = vmul.f32 %v1633_v1, %v2907_v32 }
 0x268   : > { %v1699_v9 = vmul.f32 %v1629_v28, %v1319_v59  ;;  %v1660_v8 = vadd.f32 %v1659_v43, %v1629_v28  ;;  %v1510_v28 = vadd.s32 %v2912_v36, %v1477_v56  ;;  %v1486_v56 = vadd.s32 192, %v2897_v27 }
 0x269   : > { %2270 = vst [vmem:[%s2642_s23 + $0x50] sm:$0xff] %v2234_v15   ;;  %v1513_v15 = vadd.s32 %v2912_v36, %v1480_v55 }
 0x26a   : > { %2274 = vst [vmem:[%s2642_s23 + $0x70] sm:$0xff] %v2254_v16   ;;  %v1730_v31 = vadd.f32 %v1729_v52, %v1699_v9  ;;  %vm1542_vm1 = vcmp.lt.s32.totalorder %v1510_v28, 300  ;;  %v2112_v9 = vsel %vm1541_vm0, 1.0, %v2456_v61  ;;  %v1519_v39 = vadd.s32 %v2912_v36, %v1486_v56 }
 0x26b   : > { %v1321_v44 = vpop.f32.mrf.mxu0  ;;  %v1345_v46 = vpop.f32.mrf.mxu1  ;;  %vm1545_vm2 = vcmp.lt.s32.totalorder %v1513_v15, 300 }
 0x26c   : > { %v1322_v18 = vadd.f32 %v2859_v6, %v1321_v44  ;;  %v3039_v48 = vadd.f32 %v2859_v6, %v1345_v46  ;;  %v1366_v49 = vpop.f32.mrf.mxu2  ;;  %v1390_v50 = vpop.f32.mrf.mxu3  ;;  %v2116_v14 = vsel %vm1545_vm2, 1.0, %v2456_v61  ;;  %vm1551_vm6 = vcmp.lt.s32.totalorder %v1519_v39, 300 }
 0x26d   : > { %v3067_v44 = vadd.f32 %v2859_v6, %v1366_v49  ;;  %v3073_v42 = vadd.f32 %v2859_v6, %v1390_v50 }
 0x26e   : > { %v2199_v60 = vpack.c.bf16 %v1322_v18, %v1319_v59  ;;  %v1630_v63 = vmul.f32 %v2105_v45, %v1322_v18  ;;  %v2219_v58 = vpack.c.bf16 %v3039_v48, %v3036_v47  ;;  %v1702_v59 = vmul.f32 %v1632_v51, %v2871_v11 }
 0x26f   : > { %v1514_v11 = vadd.s32 %v2912_v36, %v1481_v2  ;;  %v1635_v45 = vmul.f32 %v2110_v17, %v2966_v19 }
 0x270   : > { %2263 = vst [vmem:[%s2642_s23 + $0x18] sm:$0xff] %v2199_v60   ;;  %v1661_v41 = vadd.f32 %v1660_v8, %v1630_v63  ;;  %v1700_v7 = vmul.f32 %v1630_v63, %v1322_v18  ;;  %v1482_v18 = vadd.s32 160, %v2897_v27  ;;  %v2113_v8 = vsel %vm1542_vm1, 1.0, %v2456_v61 }
 0x271   : > { %2267 = vst [vmem:[%s2642_s23 + $0x38] sm:$0xff] %v2219_v58   ;;  %v1483_v60 = vadd.s32 168, %v2897_v27  ;;  %v1705_v63 = vmul.f32 %v1635_v45, %v2966_v19  ;;  %v1637_v58 = vmul.f32 %v2112_v9, %v3036_v47  ;;  %vm1546_vm3 = vcmp.lt.s32.totalorder %v1514_v11, 300 }
 0x272   : > { %v1662_v16 = vadd.f32 %v1661_v41, %v1631_v35  ;;  %v1731_v24 = vadd.f32 %v1730_v31, %v1700_v7  ;;  %v1515_v31 = vadd.s32 %v2912_v36, %v1482_v18  ;;  %v1484_v41 = vadd.s32 176, %v2897_v27 }
 0x273   : > { %v1638_v19 = vmul.f32 %v2113_v8, %v3039_v48  ;;  %v1707_v28 = vmul.f32 %v1637_v58, %v3036_v47  ;;  %v1641_v47 = vmul.f32 %v2116_v14, %v2932_v53  ;;  %v2122_v8 = vsel %vm1551_vm6, 1.0, %v2456_v61 }
 0x274   : > { %v1663_v38 = vadd.f32 %v1662_v16, %v1632_v51  ;;  %v1732_v34 = vadd.f32 %v1731_v24, %v1701_v13  ;;  %v1369_v43 = vpop.f32.mrf.mxu2  ;;  %v1393_v35 = vpop.f32.mrf.mxu3  ;;  %v1636_v51 = vmul.f32 %v2111_v10, %v2969_v23  ;;  %v1516_v16 = vadd.s32 %v2912_v36, %v1483_v60 }
 0x275   : > { %v3070_v32 = vadd.f32 %v2859_v6, %v1369_v43  ;;  %v3076_v29 = vadd.f32 %v2859_v6, %v1393_v35  ;;  %v1704_v6 = vmul.f32 %v1634_v62, %v2910_v33  ;;  %v2115_v33 = vsel %vm1544_vm15, 1.0, %v2456_v61 }
 0x276   : > { %v1664_v40 = vadd.f32 %v1663_v38, %v1633_v1  ;;  %v1733_v46 = vadd.f32 %v1732_v34, %v1702_v59  ;;  %v1706_v7 = vmul.f32 %v1636_v51, %v2969_v23  ;;  %v1639_v59 = vmul.f32 %v3022_v26, %v2880_v20 }
 0x277   : > { %v2239_v49 = vpack.c.bf16 %v3070_v32, %v3067_v44  ;;  %v2259_v50 = vpack.c.bf16 %v3076_v29, %v3073_v42  ;;  %v1485_v23 = vadd.s32 184, %v2897_v27  ;;  %v1640_v17 = vmul.f32 %v2115_v33, %v2883_v21 }
 0x278   : > { %v1734_v52 = vadd.f32 %v1733_v46, %v1703_v37  ;;  %v1665_v55 = vadd.f32 %v1664_v40, %v1634_v62  ;;  %v2117_v10 = vsel %vm1546_vm3, 1.0, %v2456_v61  ;;  %v1487_v26 = vadd.s32 200, %v2897_v27 }
 0x279   : > { %2271 = vst [vmem:[%s2642_s23 + $0x58] sm:$0xff] %v2239_v49   ;;  %vm1547_vm4 = vcmp.lt.s32.totalorder %v1515_v31, 300  ;;  %v1708_v38 = vmul.f32 %v1638_v19, %v3039_v48  ;;  %v1517_v34 = vadd.s32 %v2912_v36, %v1484_v41  ;;  %v1709_v43 = vmul.f32 %v1639_v59, %v2880_v20 }
 0x27a   : > { %v1666_v1 = vadd.f32 %v1665_v55, %v1635_v45  ;;  %v1735_v2 = vadd.f32 %v1734_v52, %v1704_v6  ;;  %2275 = vst [vmem:[%s2642_s23 + $0x78] sm:$0xff] %v2259_v50   ;;  %v1488_v35 = vadd.s32 208, %v2897_v27  ;;  %vm1548_vm5 = vcmp.lt.s32.totalorder %v1516_v16, 300 }
 0x27b   : > { %v1518_v40 = vadd.s32 %v2912_v36, %v1485_v23  ;;  %v1710_v46 = vmul.f32 %v1640_v17, %v2883_v21  ;;  %v1642_v9 = vmul.f32 %v2117_v10, %v2935_v54  ;;  %v1520_v48 = vadd.s32 %v2912_v36, %v1487_v26 }
 0x27c   : > { %v1667_v12 = vadd.f32 %v1666_v1, %v1636_v51  ;;  %v1736_v13 = vadd.f32 %v1735_v2, %v1705_v63  ;;  %v2118_v18 = vsel %vm1547_vm4, 1.0, %v2456_v61  ;;  %v2119_v50 = vsel %vm1548_vm5, 1.0, %v2456_v61 }
 0x27d   : > { %vm1549_vm7 = vcmp.lt.s32.totalorder %v1517_v34, 300  ;;  %v1711_v6 = vmul.f32 %v1641_v47, %v2932_v53  ;;  %v1521_v51 = vadd.s32 %v2912_v36, %v1488_v35  ;;  %v1489_v52 = vadd.s32 216, %v2897_v27 }
 0x27e   : > { %v1668_v24 = vadd.f32 %v1667_v12, %v1637_v58  ;;  %v1737_v37 = vadd.f32 %v1736_v13, %v1706_v7  ;;  %v1643_v21 = vmul.f32 %v2118_v18, %v3000_v30  ;;  %vm1550_vm8 = vcmp.lt.s32.totalorder %v1518_v40, 300 }
 0x27f   : > { %v1644_v60 = vmul.f32 %v2119_v50, %v3003_v3  ;;  %v2120_v63 = vsel %vm1549_vm7, 1.0, %v2456_v61  ;;  %v1490_v58 = vadd.s32 224, %v2897_v27  ;;  %v1712_v53 = vmul.f32 %v1642_v9, %v2935_v54 }
 0x280   : > { %v1738_v15 = vadd.f32 %v1737_v37, %v1707_v28  ;;  %v1669_v62 = vadd.f32 %v1668_v24, %v1638_v19  ;;  %vm1552_vm9 = vcmp.lt.s32.totalorder %v1520_v48, 300  ;;  %vm1553_vm10 = vcmp.lt.s32.totalorder %v1521_v51, 300 }
 0x281   : > { %v1522_v33 = vadd.s32 %v2912_v36, %v1489_v52  ;;  %v2121_v31 = vsel %vm1550_vm8, 1.0, %v2456_v61  ;;  %v1491_v41 = vadd.s32 232, %v2897_v27  ;;  %v1713_v7 = vmul.f32 %v1643_v21, %v3000_v30 }
 0x282   : > { %v1670_v45 = vadd.f32 %v1669_v62, %v1639_v59  ;;  %v1739_v11 = vadd.f32 %v1738_v15, %v1708_v38  ;;  %v1645_v19 = vmul.f32 %v2120_v63, %v3067_v44  ;;  %v2123_v59 = vsel %vm1552_vm9, 1.0, %v2456_v61 }
 0x283   : > { %v1714_v54 = vmul.f32 %v1644_v60, %v3003_v3  ;;  %v1523_v14 = vadd.s32 %v2912_v36, %v1490_v58  ;;  %v1646_v24 = vmul.f32 %v2121_v31, %v3070_v32  ;;  %v1492_v28 = vadd.s32 240, %v2897_v27 }
 0x284   : > { %v1671_v20 = vadd.f32 %v1670_v45, %v1640_v17  ;;  %v1740_v49 = vadd.f32 %v1739_v11, %v1709_v43  ;;  %v1647_v37 = vmul.f32 %v2122_v8, %v2891_v25  ;;  %v2124_v30 = vsel %vm1553_vm10, 1.0, %v2456_v61 }
 0x285   : > { %vm1554_vm11 = vcmp.lt.s32.totalorder %v1522_v33, 300  ;;  %v1524_v23 = vadd.s32 %v2912_v36, %v1491_v41  ;;  %v1715_v3 = vmul.f32 %v1645_v19, %v3067_v44  ;;  %v1493_v26 = vadd.s32 248, %v2897_v27 }
 0x286   : > { %v1741_v55 = vadd.f32 %v1740_v49, %v1710_v46  ;;  %v1672_v56 = vadd.f32 %v1671_v20, %v1641_v47  ;;  %v1648_v15 = vmul.f32 %v2123_v59, %v2886_v22  ;;  %vm1555_vm12 = vcmp.lt.s32.totalorder %v1523_v14, 300 }
 0x287   : > { %v1716_v34 = vmul.f32 %v1646_v24, %v3070_v32  ;;  %v1525_v43 = vadd.s32 %v2912_v36, %v1492_v28  ;;  %v1717_v47 = vmul.f32 %v1647_v37, %v2891_v25  ;;  %v1649_v35 = vmul.f32 %v2124_v30, %v2948_v0 }
 0x288   : > { %v1673_v1 = vadd.f32 %v1672_v56, %v1642_v9  ;;  %v1742_v2 = vadd.f32 %v1741_v55, %v1711_v6  ;;  %v2125_v45 = vsel %vm1554_vm11, 1.0, %v2456_v61  ;;  %vm1556_vm13 = vcmp.lt.s32.totalorder %v1524_v23, 300 }
 0x289   : > { %v1526_v27 = vadd.s32 %v2912_v36, %v1493_v26  ;;  %v1718_v44 = vmul.f32 %v1648_v15, %v2886_v22  ;;  %v2126_v46 = vsel %vm1555_vm12, 1.0, %v2456_v61  ;;  %v1650_v9 = vmul.f32 %v2125_v45, %v2940_v57 }
 0x28a   : > { %v1674_v12 = vadd.f32 %v1673_v1, %v1643_v21  ;;  %v1743_v13 = vadd.f32 %v1742_v2, %v1712_v53  ;;  %vm1557_vm14 = vcmp.lt.s32.totalorder %v1525_v43, 300  ;;  %v1719_v25 = vmul.f32 %v1649_v35, %v2948_v0 }
 0x28b   : > { %v2127_v18 = vsel %vm1556_vm13, 1.0, %v2456_v61  ;;  %v1651_v20 = vmul.f32 %v2126_v46, %v3006_v4  ;;  %vm1558_vm15 = vcmp.lt.s32.totalorder %v1526_v27, 300  ;;  %v2128_v36 = vsel %vm1557_vm14, 1.0, %v2456_v61 }
 0x28c   : > { %v1675_v39 = vadd.f32 %v1674_v12, %v1644_v60  ;;  %v1744_v16 = vadd.f32 %v1743_v13, %v1713_v7  ;;  %v1720_v22 = vmul.f32 %v1650_v9, %v2940_v57  ;;  %v1652_v6 = vmul.f32 %v2127_v18, %v3009_v5 }
 0x28d   : > { %v2129_v21 = vsel %vm1558_vm15, 1.0, %v2456_v61  ;;  %v1721_v55 = vmul.f32 %v1651_v20, %v3006_v4  ;;  %v1653_v8 = vmul.f32 %v2128_v36, %v3073_v42 }
 0x28e   : > { %v1745_v17 = vadd.f32 %v1744_v16, %v1714_v54  ;;  %v1676_v10 = vadd.f32 %v1675_v39, %v1645_v19  ;;  %v1722_v63 = vmul.f32 %v1652_v6, %v3009_v5  ;;  %v1654_v53 = vmul.f32 %v2129_v21, %v3076_v29 }
 0x28f   : > { %v1723_v2 = vmul.f32 %v1653_v8, %v3073_v42 }
 0x290   : > { %v1746_v62 = vadd.f32 %v1745_v17, %v1715_v3  ;;  %v1677_v38 = vadd.f32 %v1676_v10, %v1646_v24  ;;  %v1724_v61 = vmul.f32 %v1654_v53, %v3076_v29 }
 0x292   : > { %v1678_v11 = vadd.f32 %v1677_v38, %v1647_v37  ;;  %v1747_v40 = vadd.f32 %v1746_v62, %v1716_v34 }
 0x294   : > { %v1679_v32 = vadd.f32 %v1678_v11, %v1648_v15  ;;  %v1748_v48 = vadd.f32 %v1747_v40, %v1717_v47 }
 0x296   : > { %v1749_v49 = vadd.f32 %v1748_v48, %v1718_v44  ;;  %v1680_v50 = vadd.f32 %v1679_v32, %v1649_v35 }
 0x298   : > { %v1681_v51 = vadd.f32 %v1680_v50, %v1650_v9  ;;  %v1750_v52 = vadd.f32 %v1749_v49, %v1719_v25 }
 0x29a   : > { %v1682_v0 = vadd.f32 %v1681_v51, %v1651_v20  ;;  %v1751_v56 = vadd.f32 %v1750_v52, %v1720_v22 }
 0x29c   : > { %v1683_v60 = vadd.f32 %v1682_v0, %v1652_v6  ;;  %v1752_v58 = vadd.f32 %v1751_v56, %v1721_v55 }
 0x29e   : > { %v1753_v1 = vadd.f32 %v1752_v58, %v1722_v63  ;;  %v1684_v57 = vadd.f32 %v1683_v60, %v1653_v8 }
 0x2a0   : > { %v1754_v33 = vadd.f32 %v1753_v1, %v1723_v2  ;;  %v1685_v31 = vadd.f32 %v1684_v57, %v1654_v53 }
 0x2a2   : > { %v1686_v4 = vrot.slane %v1685_v31, 4  ;;  %v1755_v41 = vadd.f32 %v1754_v33, %v1724_v61 }
 0x2a4   : > { %v1687_v7 = vadd.f32 %v1686_v4, %v1685_v31  ;;  %v1756_v12 = vrot.slane %v1755_v41, 4 }
 0x2a6   : > { %v1688_v13 = vrot.slane %v1687_v7, 2  ;;  %v1757_v19 = vadd.f32 %v1756_v12, %v1755_v41 }
 0x2a8   : > { %v1689_v5 = vadd.f32 %v1688_v13, %v1687_v7  ;;  %v1758_v59 = vrot.slane %v1757_v19, 2 }
 0x2aa   : > { %v1690_v54 = vrot.slane %v1689_v5, 1  ;;  %v1759_v14 = vadd.f32 %v1758_v59, %v1757_v19 }
 0x2ac   : > { %v1691_v39 = vadd.f32 %v1690_v54, %v1689_v5  ;;  %v1760_v16 = vrot.slane %v1759_v14, 1 }
 0x2ae   : > { %1692 = vst [vmem:[%s2647_s11] sm:$0x1] %v1691_v39  ;;  %v1761_v42 = vadd.f32 %v1760_v16, %v1759_v14 }
 0x2b0   : > { %1762 = vst [vmem:[%s2647_s11 + $0x1] sm:$0x1] %v1761_v42 }
 0x2b1 PF: > { %s19_s9 = sadd.s32 1, %s2453_s9   ;;  %s3207_s26 = smov %s2433_s27 }
 0x2b2   : > { %p16_p0 = scmp.ge.s32.totalorder %s19_s9, 6   ;;  %s3208_s27 = smov %s2551_s15 }
 0x2b3   : > { %s3209_s28 = smov %s2445_s30  ;;  %s3210_s29 = smov %s2449_s8 }
 0x2b4   : > { %s3211_s30 = smov %s3214_s0  ;;  %s3212_s8 = smov %s3218_s10 }
 0x2b5   :  { %18 = sbr.rel (!%p16_p0) target bundleno = 7 (0x7), region = 141 }

</bundles_post_ra>
